<compile_context>
chip_gen: v6e
topology: v6e:2x2x1
jax: 0.10.0
libtpu: 0.0.40
codegen_flags: <defaults>
</compile_context>

<pallas_src>
import functools

import jax
import jax.numpy as jnp
from jax import lax
from jax.experimental import pallas as pl
from jax.experimental.pallas import tpu as pltpu

KSIZE = 7
PAD = KSIZE // 2

_RED_CHUNK = 1024        # lanes per fused sum/max chunk (accumulators stay in vregs)
_CONV_CHUNK_MAX = 8192   # lanes per 7x7-conv output chunk (bounds conv temporaries)


def _round_up(v, m):
    return (v + m - 1) // m * m


def _tpu_vmem_budget_bytes():
    """Per-core VMEM the kernels plan against (physical minus headroom)."""
    phys = None
    try:
        phys = int(getattr(pltpu.get_tpu_info(), "vmem_capacity_bytes", 0)) or None
    except Exception:
        phys = None
    if phys is None:
        phys = 64 * 2**20            # conservative (v7x-sized) assumption
    # ~20% headroom for Mosaic-internal scratch / untracked temporaries:
    # v7x (64 MiB) -> ~51 MiB cap, v5e/v6e (128 MiB) -> ~102 MiB cap.
    return max(16 * 2**20, int(phys * 0.8))


def _largest_c_tile(C, max_rows):
    """Largest divisor of C that is <= max_rows and a multiple of 8 (or C)."""
    max_rows = int(max_rows)
    if C <= 8 or C <= max_rows:
        return C
    best = 0
    for d in range(8, min(C, max_rows) + 1, 8):
        if C % d == 0:
            best = d
    return best if best > 0 else C   # fall back to whole C (correctness first)


def _conv_fixed_bytes(HW, W, Lp, conv_chunk):
    ol = min(conv_chunk, HW)
    ext = ol + 6 * W
    pad_bytes = 8 * Lp * 4           # (2, Lp) f32 scratch, sublane-padded to 8 rows
    views = 14 * ext * 4             # hoisted masked column views
    misc = (3 * ext + 3 * ol) * 4    # iota / col / part / acc / attn temporaries
    return pad_bytes + views + misc


# ---------------------------------------------------------------------------
# In-kernel building blocks
# ---------------------------------------------------------------------------

def _accumulate_channel_stats(x_ref, pad_ref, *, rows, HW, OFF_A, is_first,
                              single_step):
    """Single-read fused channel sum (f32) / max (f32) of x_ref[0, :rows, :].

    Results land in pad_ref row 0 (sum) and row 1 (max) at lanes
    [OFF_A, OFF_A + HW).  `is_first` selects assign vs. accumulate when the
    channel dimension is split across several grid steps.
    """
    n8 = rows // 8
    rem = rows - n8 * 8
    for ss in range(0, HW, _RED_CHUNK):
        sl = min(_RED_CHUNK, HW - ss)
        s8 = None
        m8 = None
        for ci in range(n8):
            blk = x_ref[0, ci * 8:(ci + 1) * 8, ss:ss + sl].astype(jnp.float32)
            if s8 is None:
                s8, m8 = blk, blk
            else:
                s8 = s8 + blk
                m8 = jnp.maximum(m8, blk)
        if s8 is not None:
            s1 = jnp.sum(s8, axis=0, keepdims=True)
            m1 = jnp.max(m8, axis=0, keepdims=True)
        else:
            s1 = None
            m1 = None
        if rem:
            blk = x_ref[0, n8 * 8:rows, ss:ss + sl].astype(jnp.float32)
            sr = jnp.sum(blk, axis=0, keepdims=True)
            mr = jnp.max(blk, axis=0, keepdims=True)
            s1 = sr if s1 is None else s1 + sr
            m1 = mr if m1 is None else jnp.maximum(m1, mr)
        lo = OFF_A + ss
        hi = lo + sl

        def _assign(s1=s1, m1=m1, lo=lo, hi=hi):
            pad_ref[0:1, lo:hi] = s1
            pad_ref[1:2, lo:hi] = m1

        def _accum(s1=s1, m1=m1, lo=lo, hi=hi):
            pad_ref[0:1, lo:hi] = pad_ref[0:1, lo:hi] + s1
            pad_ref[1:2, lo:hi] = jnp.maximum(pad_ref[1:2, lo:hi], m1)

        if single_step:
            _assign()
        else:
            pl.when(is_first)(_assign)
            pl.when(jnp.logical_not(is_first))(_accum)


def _conv7x7_sigmoid(pad_ref, wts, emit, *, W, HW, OFF_A, Lp, conv_chunk):
    """7x7 / padding=3 / bias-free conv over the 2-channel [sum*(1/C), max]
    map stored in pad_ref, followed by sigmoid.  Calls emit(os, ol, attn_f32)
    for each output chunk (attn_f32 has shape (1, ol))."""
    D = OFF_A - (3 * W + 3)
    # Zero only the padding borders; the interior was just (re)written.
    pad_ref[0:2, 0:OFF_A] = jnp.zeros((2, OFF_A), jnp.float32)
    pad_ref[0:2, OFF_A + HW:Lp] = jnp.zeros((2, Lp - OFF_A - HW), jnp.float32)

    for os in range(0, HW, conv_chunk):
        ol = min(conv_chunk, HW - os)
        ext = ol + 6 * W
        # Column index of each extended position (row raster of width W).
        col = (lax.broadcasted_iota(jnp.int32, (1, ext), 1) + (os % W)) % W
        # 14 hoisted, column-masked shifted views of the padded maps.
        cvs = []
        for c in range(2):
            row = []
            for kj in range(KSIZE):
                start = os + D + kj
                v = pad_ref[c:c + 1, start:start + ext]
                off = kj - PAD
                if off < 0:
                    v = jnp.where(col >= -off, v, 0.0)
                elif off > 0:
                    v = jnp.where(col < W - off, v, 0.0)
                row.append(v)
            cvs.append(row)
        # 98 scalar-weight FMAs folded into 7 row-offset partial sums.
        acc = None
        for ki in range(KSIZE):
            part = None
            for c in range(2):
                base = c * KSIZE * KSIZE + ki * KSIZE
                for kj in range(KSIZE):
                    t = wts[base + kj] * cvs[c][kj]
                    part = t if part is None else part + t
            pk = part[:, ki * W:ki * W + ol]
            acc = pk if acc is None else acc + pk
        emit(os, ol, jax.nn.sigmoid(acc))


# ---------------------------------------------------------------------------
# Kernels
# ---------------------------------------------------------------------------

def _cbam_fused_kernel(x_ref, w_ref, o_ref, pad_ref, *, C, W, HW, OFF_A, Lp,
                       conv_chunk):
    """Single pass: reduce -> conv -> sigmoid -> gate, one batch image/step."""
    _accumulate_channel_stats(x_ref, pad_ref, rows=C, HW=HW, OFF_A=OFF_A,
                              is_first=None, single_step=True)
    wts = [w_ref[i] for i in range(2 * KSIZE * KSIZE)]   # hoisted SMEM scalars

    def emit(os, ol, attn_f32):
        a = attn_f32.astype(o_ref.dtype)                 # (1, ol), native dtype
        o_ref[0, :, os:os + ol] = x_ref[0, :, os:os + ol] * a

    _conv7x7_sigmoid(pad_ref, wts, emit, W=W, HW=HW, OFF_A=OFF_A, Lp=Lp,
                     conv_chunk=conv_chunk)


def _cbam_attn_kernel(x_ref, w_ref, o_ref, pad_ref, *, c_tile, n_ct, W, HW,
                      OFF_A, Lp, conv_chunk):
    """Two-pass path, pass 1: C-tiled reduce; conv+sigmoid on the last tile."""
    ct = pl.program_id(1)
    _accumulate_channel_stats(x_ref, pad_ref, rows=c_tile, HW=HW, OFF_A=OFF_A,
                              is_first=(ct == 0), single_step=(n_ct == 1))

    def do_conv():
        wts = [w_ref[i] for i in range(2 * KSIZE * KSIZE)]

        def emit(os, ol, attn_f32):
            o_ref[0, :, os:os + ol] = attn_f32.astype(o_ref.dtype)

        _conv7x7_sigmoid(pad_ref, wts, emit, W=W, HW=HW, OFF_A=OFF_A, Lp=Lp,
                         conv_chunk=conv_chunk)

    if n_ct == 1:
        do_conv()
    else:
        pl.when(ct == n_ct - 1)(do_conv)


def _cbam_gate_kernel(x_ref, a_ref, o_ref):
    """Two-pass path, pass 2: out = x * attn (native dtype, lane-dense)."""
    o_ref[...] = x_ref[...] * a_ref[...]


# ---------------------------------------------------------------------------
# Wrapper
# ---------------------------------------------------------------------------

def cbam_spatial(x, conv_weight, *, force_two_pass=False):
    """CBAM spatial attention: x * sigmoid(conv7x7(cat[mean_c(x), max_c(x)])).

    x: [B, C, H, W]; conv_weight: [1, 2, 7, 7] (OIHW, bias=False).
    """
    B, C, H, W = x.shape
    HW = H * W
    isz = x.dtype.itemsize

    # Padded row-raster geometry: live data starts at a 128-aligned offset so
    # the avg/max interior writes are unmasked, lane-aligned stores.
    OFF_A = _round_up(3 * W + 3, 128)
    Lp = _round_up(OFF_A + HW + 3 * W + 3, 128)
    conv_chunk = min(_round_up(HW, 128), _CONV_CHUNK_MAX)

    # Fold the 1/C of the channel mean into the avg-channel conv taps (free).
    w = conv_weight.astype(jnp.float32) * jnp.array(
        [1.0 / C, 1.0], jnp.float32)[None, :, None, None]
    w_flat = w.reshape(-1)                                   # (98,)

    x_flat = x.reshape(B, C, HW)                             # lane-dense spatial axis

    budget = _tpu_vmem_budget_bytes()
    conv_fixed = _conv_fixed_bytes(HW, W, Lp, conv_chunk)

    # ------------- fused single-pass path (whole image per grid step) -------
    fused_need = 4 * C * HW * isz + conv_fixed + (2 << 20)
    if not force_two_pass and fused_need <= int(0.9 * budget):
        kernel = functools.partial(_cbam_fused_kernel, C=C, W=W, HW=HW,
                                   OFF_A=OFF_A, Lp=Lp, conv_chunk=conv_chunk)
        out_flat = pl.pallas_call(
            kernel,
            out_shape=jax.ShapeDtypeStruct((B, C, HW), x.dtype),
            grid_spec=pltpu.PrefetchScalarGridSpec(
                num_scalar_prefetch=0,
                grid=(B,),
                in_specs=[
                    pl.BlockSpec((1, C, HW), lambda b: (b, 0, 0)),
                    pl.BlockSpec(memory_space=pltpu.MemorySpace.SMEM),
                ],
                out_specs=pl.BlockSpec((1, C, HW), lambda b: (b, 0, 0)),
                scratch_shapes=[pltpu.VMEM((2, Lp), jnp.float32)],
            ),
            compiler_params=pltpu.CompilerParams(
                dimension_semantics=("parallel",),
                vmem_limit_bytes=int(max(budget, fused_need)),
            ),
        )(x_flat, w_flat)
        return out_flat.reshape(B, C, H, W)

    # ------------- two-pass path (C-tiled; fits v7x VMEM, feeds both TCs) ---
    # Pass 1: C-tiled channel reduce -> 7x7 conv -> sigmoid -> attn (B, 1, HW).
    avail1 = int(0.85 * budget) - conv_fixed - 2 * HW * isz
    c1 = _largest_c_tile(C, max(1, avail1 // max(1, 2 * HW * isz)))
    n_ct = C // c1
    need1 = 2 * c1 * HW * isz + 2 * HW * isz + conv_fixed + (2 << 20)

    attn_kernel = functools.partial(_cbam_attn_kernel, c_tile=c1, n_ct=n_ct,
                                    W=W, HW=HW, OFF_A=OFF_A, Lp=Lp,
                                    conv_chunk=conv_chunk)
    attn = pl.pallas_call(
        attn_kernel,
        out_shape=jax.ShapeDtypeStruct((B, 1, HW), x.dtype),
        grid_spec=pltpu.PrefetchScalarGridSpec(
            num_scalar_prefetch=0,
            grid=(B, n_ct),
            in_specs=[
                pl.BlockSpec((1, c1, HW), lambda b, ct: (b, ct, 0)),
                pl.BlockSpec(memory_space=pltpu.MemorySpace.SMEM),
            ],
            out_specs=pl.BlockSpec((1, 1, HW), lambda b, ct: (b, 0, 0)),
            scratch_shapes=[pltpu.VMEM((2, Lp), jnp.float32)],
        ),
        compiler_params=pltpu.CompilerParams(
            dimension_semantics=("parallel", "arbitrary"),
            vmem_limit_bytes=int(max(budget, need1)),
        ),
    )(x_flat, w_flat)

    # Pass 2: out = x * attn on a purely parallel (B, C-tile) grid (HBM-bound).
    avail2 = int(0.85 * budget) - 2 * HW * isz
    c2 = _largest_c_tile(C, max(1, avail2 // max(1, 4 * HW * isz)))
    n_ct2 = C // c2
    need2 = (4 * c2 * HW + 2 * HW) * isz + (2 << 20)

    out_flat = pl.pallas_call(
        _cbam_gate_kernel,
        out_shape=jax.ShapeDtypeStruct((B, C, HW), x.dtype),
        grid_spec=pltpu.PrefetchScalarGridSpec(
            num_scalar_prefetch=0,
            grid=(B, n_ct2),
            in_specs=[
                pl.BlockSpec((1, c2, HW), lambda b, c: (b, c, 0)),
                pl.BlockSpec((1, 1, HW), lambda b, c: (b, 0, 0)),
            ],
            out_specs=pl.BlockSpec((1, c2, HW), lambda b, c: (b, c, 0)),
        ),
        compiler_params=pltpu.CompilerParams(
            dimension_semantics=("parallel", "parallel"),
            vmem_limit_bytes=int(max(budget, need2)),
        ),
    )(x_flat, attn)
    return out_flat.reshape(B, C, H, W)


# ---------------------------------------------------------------------------
# Pure-JAX reference mirroring the PyTorch forward
# ---------------------------------------------------------------------------

def cbam_spatial_ref(x, conv_weight):
    xf = x.astype(jnp.float32)
    avg = jnp.mean(xf, axis=1, keepdims=True)
    mxv = jnp.max(xf, axis=1, keepdims=True)
    feat = jnp.concatenate([avg, mxv], axis=1)               # (B, 2, H, W)
    out = lax.conv_general_dilated(
        feat, conv_weight.astype(jnp.float32),
        window_strides=(1, 1),
        padding=[(PAD, PAD), (PAD, PAD)],
        dimension_numbers=("NCHW", "OIHW", "NCHW"),
    )
    return (xf * jax.nn.sigmoid(out)).astype(x.dtype)


if __name__ == "__main__":
    key = jax.random.PRNGKey(0)
    kx, kw = jax.random.split(key)

    B, C, H, W = 2, 4, 16, 16
    x = jax.random.normal(kx, (B, C, H, W), dtype=jnp.float32)
    # nn.Conv2d(2, 1, 7, padding=3, bias=False) -> weight shape (1, 2, 7, 7).
    conv_weight = 0.1 * jax.random.normal(kw, (1, 2, KSIZE, KSIZE),
                                          dtype=jnp.float32)

    ref = cbam_spatial_ref(x, conv_weight)

    # Fused single-pass path (auto-selected at this size).
    out_fused = jax.block_until_ready(cbam_spatial(x, conv_weight))
    assert out_fused.shape == (B, C, H, W)
    assert jnp.allclose(out_fused, ref, atol=1e-5, rtol=1e-5), \
        "fused path mismatch vs reference"

    # Two-pass (C-tiled reduce/conv + parallel gate) path, forced for coverage.
    out_2p = jax.block_until_ready(
        cbam_spatial(x, conv_weight, force_two_pass=True))
    assert jnp.allclose(out_2p, ref, atol=1e-5, rtol=1e-5), \
        "two-pass path mismatch vs reference"

    print("KERNEL_OK")
</pallas_src>

<mosaic_0001>
module attributes {stable_mosaic.version = 11 : i64} {
  func.func @_cbam_fused_kernel(%arg0: i32, %arg1: memref<1x4x256xf32, #tpu.memory_space<vmem>>, %arg2: memref<98xf32, #tpu.memory_space<smem>>, %arg3: memref<1x4x256xf32, #tpu.memory_space<vmem>>, %arg4: memref<2x512xf32, #tpu.memory_space<vmem>>) attributes {dimension_semantics = [#tpu.dimension_semantics<parallel>], iteration_bounds = array<i64: 2>, scalar_prefetch = 0 : i64, scratch_operands = 1 : i64, tpu.core_type = #tpu.core_type<tc>, window_params = [{transform_indices = @transform_0, window_bounds = array<i64: 1, 4, 256>}, {transform_indices = @transform_1, window_bounds = array<i64: 98>}, {transform_indices = @transform_2, window_bounds = array<i64: 1, 4, 256>}]} {
    %c0 = arith.constant 0 : index
    %c0_0 = arith.constant 0 : index
    %c0_1 = arith.constant 0 : index
    %0 = vector.load %arg1[%c0, %c0_0, %c0_1] : memref<1x4x256xf32, #tpu.memory_space<vmem>>, vector<1x4x256xf32>
    %1 = vector.shape_cast %0 : vector<1x4x256xf32> to vector<4x256xf32>
    %cst = arith.constant dense<0.000000e+00> : vector<256xf32>
    %2 = vector.multi_reduction <add>, %1, %cst [0] : vector<4x256xf32> to vector<256xf32>
    %3 = vector.shape_cast %2 : vector<256xf32> to vector<1x256xf32>
    %cst_2 = arith.constant dense<0xFF800000> : vector<256xf32>
    %4 = vector.multi_reduction <maximumf>, %1, %cst_2 [0] : vector<4x256xf32> to vector<256xf32>
    %5 = vector.shape_cast %4 : vector<256xf32> to vector<1x256xf32>
    %c0_3 = arith.constant 0 : index
    %c128 = arith.constant 128 : index
    %6 = vector.load %arg4[%c0_3, %c128] : memref<2x512xf32, #tpu.memory_space<vmem>>, vector<1x256xf32>
    tpu.vector_store %arg4[%c0_3, %c128], %3 {strides = array<i32>} : memref<2x512xf32, #tpu.memory_space<vmem>>, vector<1x256xf32>,
    %c1 = arith.constant 1 : index
    %c128_4 = arith.constant 128 : index
    %7 = vector.load %arg4[%c1, %c128_4] : memref<2x512xf32, #tpu.memory_space<vmem>>, vector<1x256xf32>
    tpu.vector_store %arg4[%c1, %c128_4], %5 {strides = array<i32>} : memref<2x512xf32, #tpu.memory_space<vmem>>, vector<1x256xf32>,
    %c0_5 = arith.constant 0 : index
    %8 = memref.load %arg2[%c0_5] : memref<98xf32, #tpu.memory_space<smem>>
    %c1_6 = arith.constant 1 : index
    %9 = memref.load %arg2[%c1_6] : memref<98xf32, #tpu.memory_space<smem>>
    %c2 = arith.constant 2 : index
    %10 = memref.load %arg2[%c2] : memref<98xf32, #tpu.memory_space<smem>>
    %c3 = arith.constant 3 : index
    %11 = memref.load %arg2[%c3] : memref<98xf32, #tpu.memory_space<smem>>
    %c4 = arith.constant 4 : index
    %12 = memref.load %arg2[%c4] : memref<98xf32, #tpu.memory_space<smem>>
    %c5 = arith.constant 5 : index
    %13 = memref.load %arg2[%c5] : memref<98xf32, #tpu.memory_space<smem>>
    %c6 = arith.constant 6 : index
    %14 = memref.load %arg2[%c6] : memref<98xf32, #tpu.memory_space<smem>>
    %c7 = arith.constant 7 : index
    %15 = memref.load %arg2[%c7] : memref<98xf32, #tpu.memory_space<smem>>
    %c8 = arith.constant 8 : index
    %16 = memref.load %arg2[%c8] : memref<98xf32, #tpu.memory_space<smem>>
    %c9 = arith.constant 9 : index
    %17 = memref.load %arg2[%c9] : memref<98xf32, #tpu.memory_space<smem>>
    %c10 = arith.constant 10 : index
    %18 = memref.load %arg2[%c10] : memref<98xf32, #tpu.memory_space<smem>>
    %c11 = arith.constant 11 : index
    %19 = memref.load %arg2[%c11] : memref<98xf32, #tpu.memory_space<smem>>
    %c12 = arith.constant 12 : index
    %20 = memref.load %arg2[%c12] : memref<98xf32, #tpu.memory_space<smem>>
    %c13 = arith.constant 13 : index
    %21 = memref.load %arg2[%c13] : memref<98xf32, #tpu.memory_space<smem>>
    %c14 = arith.constant 14 : index
    %22 = memref.load %arg2[%c14] : memref<98xf32, #tpu.memory_space<smem>>
    %c15 = arith.constant 15 : index
    %23 = memref.load %arg2[%c15] : memref<98xf32, #tpu.memory_space<smem>>
    %c16 = arith.constant 16 : index
    %24 = memref.load %arg2[%c16] : memref<98xf32, #tpu.memory_space<smem>>
    %c17 = arith.constant 17 : index
    %25 = memref.load %arg2[%c17] : memref<98xf32, #tpu.memory_space<smem>>
    %c18 = arith.constant 18 : index
    %26 = memref.load %arg2[%c18] : memref<98xf32, #tpu.memory_space<smem>>
    %c19 = arith.constant 19 : index
    %27 = memref.load %arg2[%c19] : memref<98xf32, #tpu.memory_space<smem>>
    %c20 = arith.constant 20 : index
    %28 = memref.load %arg2[%c20] : memref<98xf32, #tpu.memory_space<smem>>
    %c21 = arith.constant 21 : index
    %29 = memref.load %arg2[%c21] : memref<98xf32, #tpu.memory_space<smem>>
    %c22 = arith.constant 22 : index
    %30 = memref.load %arg2[%c22] : memref<98xf32, #tpu.memory_space<smem>>
    %c23 = arith.constant 23 : index
    %31 = memref.load %arg2[%c23] : memref<98xf32, #tpu.memory_space<smem>>
    %c24 = arith.constant 24 : index
    %32 = memref.load %arg2[%c24] : memref<98xf32, #tpu.memory_space<smem>>
    %c25 = arith.constant 25 : index
    %33 = memref.load %arg2[%c25] : memref<98xf32, #tpu.memory_space<smem>>
    %c26 = arith.constant 26 : index
    %34 = memref.load %arg2[%c26] : memref<98xf32, #tpu.memory_space<smem>>
    %c27 = arith.constant 27 : index
    %35 = memref.load %arg2[%c27] : memref<98xf32, #tpu.memory_space<smem>>
    %c28 = arith.constant 28 : index
    %36 = memref.load %arg2[%c28] : memref<98xf32, #tpu.memory_space<smem>>
    %c29 = arith.constant 29 : index
    %37 = memref.load %arg2[%c29] : memref<98xf32, #tpu.memory_space<smem>>
    %c30 = arith.constant 30 : index
    %38 = memref.load %arg2[%c30] : memref<98xf32, #tpu.memory_space<smem>>
    %c31 = arith.constant 31 : index
    %39 = memref.load %arg2[%c31] : memref<98xf32, #tpu.memory_space<smem>>
    %c32 = arith.constant 32 : index
    %40 = memref.load %arg2[%c32] : memref<98xf32, #tpu.memory_space<smem>>
    %c33 = arith.constant 33 : index
    %41 = memref.load %arg2[%c33] : memref<98xf32, #tpu.memory_space<smem>>
    %c34 = arith.constant 34 : index
    %42 = memref.load %arg2[%c34] : memref<98xf32, #tpu.memory_space<smem>>
    %c35 = arith.constant 35 : index
    %43 = memref.load %arg2[%c35] : memref<98xf32, #tpu.memory_space<smem>>
    %c36 = arith.constant 36 : index
    %44 = memref.load %arg2[%c36] : memref<98xf32, #tpu.memory_space<smem>>
    %c37 = arith.constant 37 : index
    %45 = memref.load %arg2[%c37] : memref<98xf32, #tpu.memory_space<smem>>
    %c38 = arith.constant 38 : index
    %46 = memref.load %arg2[%c38] : memref<98xf32, #tpu.memory_space<smem>>
    %c39 = arith.constant 39 : index
    %47 = memref.load %arg2[%c39] : memref<98xf32, #tpu.memory_space<smem>>
    %c40 = arith.constant 40 : index
    %48 = memref.load %arg2[%c40] : memref<98xf32, #tpu.memory_space<smem>>
    %c41 = arith.constant 41 : index
    %49 = memref.load %arg2[%c41] : memref<98xf32, #tpu.memory_space<smem>>
    %c42 = arith.constant 42 : index
    %50 = memref.load %arg2[%c42] : memref<98xf32, #tpu.memory_space<smem>>
    %c43 = arith.constant 43 : index
    %51 = memref.load %arg2[%c43] : memref<98xf32, #tpu.memory_space<smem>>
    %c44 = arith.constant 44 : index
    %52 = memref.load %arg2[%c44] : memref<98xf32, #tpu.memory_space<smem>>
    %c45 = arith.constant 45 : index
    %53 = memref.load %arg2[%c45] : memref<98xf32, #tpu.memory_space<smem>>
    %c46 = arith.constant 46 : index
    %54 = memref.load %arg2[%c46] : memref<98xf32, #tpu.memory_space<smem>>
    %c47 = arith.constant 47 : index
    %55 = memref.load %arg2[%c47] : memref<98xf32, #tpu.memory_space<smem>>
    %c48 = arith.constant 48 : index
    %56 = memref.load %arg2[%c48] : memref<98xf32, #tpu.memory_space<smem>>
    %c49 = arith.constant 49 : index
    %57 = memref.load %arg2[%c49] : memref<98xf32, #tpu.memory_space<smem>>
    %c50 = arith.constant 50 : index
    %58 = memref.load %arg2[%c50] : memref<98xf32, #tpu.memory_space<smem>>
    %c51 = arith.constant 51 : index
    %59 = memref.load %arg2[%c51] : memref<98xf32, #tpu.memory_space<smem>>
    %c52 = arith.constant 52 : index
    %60 = memref.load %arg2[%c52] : memref<98xf32, #tpu.memory_space<smem>>
    %c53 = arith.constant 53 : index
    %61 = memref.load %arg2[%c53] : memref<98xf32, #tpu.memory_space<smem>>
    %c54 = arith.constant 54 : index
    %62 = memref.load %arg2[%c54] : memref<98xf32, #tpu.memory_space<smem>>
    %c55 = arith.constant 55 : index
    %63 = memref.load %arg2[%c55] : memref<98xf32, #tpu.memory_space<smem>>
    %c56 = arith.constant 56 : index
    %64 = memref.load %arg2[%c56] : memref<98xf32, #tpu.memory_space<smem>>
    %c57 = arith.constant 57 : index
    %65 = memref.load %arg2[%c57] : memref<98xf32, #tpu.memory_space<smem>>
    %c58 = arith.constant 58 : index
    %66 = memref.load %arg2[%c58] : memref<98xf32, #tpu.memory_space<smem>>
    %c59 = arith.constant 59 : index
    %67 = memref.load %arg2[%c59] : memref<98xf32, #tpu.memory_space<smem>>
    %c60 = arith.constant 60 : index
    %68 = memref.load %arg2[%c60] : memref<98xf32, #tpu.memory_space<smem>>
    %c61 = arith.constant 61 : index
    %69 = memref.load %arg2[%c61] : memref<98xf32, #tpu.memory_space<smem>>
    %c62 = arith.constant 62 : index
    %70 = memref.load %arg2[%c62] : memref<98xf32, #tpu.memory_space<smem>>
    %c63 = arith.constant 63 : index
    %71 = memref.load %arg2[%c63] : memref<98xf32, #tpu.memory_space<smem>>
    %c64 = arith.constant 64 : index
    %72 = memref.load %arg2[%c64] : memref<98xf32, #tpu.memory_space<smem>>
    %c65 = arith.constant 65 : index
    %73 = memref.load %arg2[%c65] : memref<98xf32, #tpu.memory_space<smem>>
    %c66 = arith.constant 66 : index
    %74 = memref.load %arg2[%c66] : memref<98xf32, #tpu.memory_space<smem>>
    %c67 = arith.constant 67 : index
    %75 = memref.load %arg2[%c67] : memref<98xf32, #tpu.memory_space<smem>>
    %c68 = arith.constant 68 : index
    %76 = memref.load %arg2[%c68] : memref<98xf32, #tpu.memory_space<smem>>
    %c69 = arith.constant 69 : index
    %77 = memref.load %arg2[%c69] : memref<98xf32, #tpu.memory_space<smem>>
    %c70 = arith.constant 70 : index
    %78 = memref.load %arg2[%c70] : memref<98xf32, #tpu.memory_space<smem>>
    %c71 = arith.constant 71 : index
    %79 = memref.load %arg2[%c71] : memref<98xf32, #tpu.memory_space<smem>>
    %c72 = arith.constant 72 : index
    %80 = memref.load %arg2[%c72] : memref<98xf32, #tpu.memory_space<smem>>
    %c73 = arith.constant 73 : index
    %81 = memref.load %arg2[%c73] : memref<98xf32, #tpu.memory_space<smem>>
    %c74 = arith.constant 74 : index
    %82 = memref.load %arg2[%c74] : memref<98xf32, #tpu.memory_space<smem>>
    %c75 = arith.constant 75 : index
    %83 = memref.load %arg2[%c75] : memref<98xf32, #tpu.memory_space<smem>>
    %c76 = arith.constant 76 : index
    %84 = memref.load %arg2[%c76] : memref<98xf32, #tpu.memory_space<smem>>
    %c77 = arith.constant 77 : index
    %85 = memref.load %arg2[%c77] : memref<98xf32, #tpu.memory_space<smem>>
    %c78 = arith.constant 78 : index
    %86 = memref.load %arg2[%c78] : memref<98xf32, #tpu.memory_space<smem>>
    %c79 = arith.constant 79 : index
    %87 = memref.load %arg2[%c79] : memref<98xf32, #tpu.memory_space<smem>>
    %c80 = arith.constant 80 : index
    %88 = memref.load %arg2[%c80] : memref<98xf32, #tpu.memory_space<smem>>
    %c81 = arith.constant 81 : index
    %89 = memref.load %arg2[%c81] : memref<98xf32, #tpu.memory_space<smem>>
    %c82 = arith.constant 82 : index
    %90 = memref.load %arg2[%c82] : memref<98xf32, #tpu.memory_space<smem>>
    %c83 = arith.constant 83 : index
    %91 = memref.load %arg2[%c83] : memref<98xf32, #tpu.memory_space<smem>>
    %c84 = arith.constant 84 : index
    %92 = memref.load %arg2[%c84] : memref<98xf32, #tpu.memory_space<smem>>
    %c85 = arith.constant 85 : index
    %93 = memref.load %arg2[%c85] : memref<98xf32, #tpu.memory_space<smem>>
    %c86 = arith.constant 86 : index
    %94 = memref.load %arg2[%c86] : memref<98xf32, #tpu.memory_space<smem>>
    %c87 = arith.constant 87 : index
    %95 = memref.load %arg2[%c87] : memref<98xf32, #tpu.memory_space<smem>>
    %c88 = arith.constant 88 : index
    %96 = memref.load %arg2[%c88] : memref<98xf32, #tpu.memory_space<smem>>
    %c89 = arith.constant 89 : index
    %97 = memref.load %arg2[%c89] : memref<98xf32, #tpu.memory_space<smem>>
    %c90 = arith.constant 90 : index
    %98 = memref.load %arg2[%c90] : memref<98xf32, #tpu.memory_space<smem>>
    %c91 = arith.constant 91 : index
    %99 = memref.load %arg2[%c91] : memref<98xf32, #tpu.memory_space<smem>>
    %c92 = arith.constant 92 : index
    %100 = memref.load %arg2[%c92] : memref<98xf32, #tpu.memory_space<smem>>
    %c93 = arith.constant 93 : index
    %101 = memref.load %arg2[%c93] : memref<98xf32, #tpu.memory_space<smem>>
    %c94 = arith.constant 94 : index
    %102 = memref.load %arg2[%c94] : memref<98xf32, #tpu.memory_space<smem>>
    %c95 = arith.constant 95 : index
    %103 = memref.load %arg2[%c95] : memref<98xf32, #tpu.memory_space<smem>>
    %c96 = arith.constant 96 : index
    %104 = memref.load %arg2[%c96] : memref<98xf32, #tpu.memory_space<smem>>
    %c97 = arith.constant 97 : index
    %105 = memref.load %arg2[%c97] : memref<98xf32, #tpu.memory_space<smem>>
    %cst_7 = arith.constant 0.000000e+00 : f32
    %106 = vector.broadcast %cst_7 : f32 to vector<2x128xf32>
    %c0_8 = arith.constant 0 : index
    %c0_9 = arith.constant 0 : index
    %107 = vector.load %arg4[%c0_8, %c0_9] : memref<2x512xf32, #tpu.memory_space<vmem>>, vector<2x128xf32>
    tpu.vector_store %arg4[%c0_8, %c0_9], %106 {strides = array<i32>} : memref<2x512xf32, #tpu.memory_space<vmem>>, vector<2x128xf32>,
    %cst_10 = arith.constant 0.000000e+00 : f32
    %108 = vector.broadcast %cst_10 : f32 to vector<2x128xf32>
    %c0_11 = arith.constant 0 : index
    %c384 = arith.constant 384 : index
    %109 = vector.load %arg4[%c0_11, %c384] : memref<2x512xf32, #tpu.memory_space<vmem>>, vector<2x128xf32>
    tpu.vector_store %arg4[%c0_11, %c384], %108 {strides = array<i32>} : memref<2x512xf32, #tpu.memory_space<vmem>>, vector<2x128xf32>,
    %110 = tpu.iota {dimensions = array<i32: 1>} : vector<1x352xi32>
    %c0_i32 = arith.constant 0 : i32
    %111 = vector.broadcast %c0_i32 : i32 to vector<1x352xi32>
    %112 = arith.addi %110, %111 : vector<1x352xi32>
    %c16_i32 = arith.constant 16 : i32
    %c0_i32_12 = arith.constant 0 : i32
    %113 = arith.cmpi eq, %c16_i32, %c0_i32_12 : i32
    %c1_i32 = arith.constant 1 : i32
    %114 = arith.select %113, %c1_i32, %c16_i32 : i32
    %115 = vector.broadcast %114 : i32 to vector<1x352xi32>
    %116 = arith.remsi %112, %115 : vector<1x352xi32>
    %c0_i32_13 = arith.constant 0 : i32
    %117 = vector.broadcast %c0_i32_13 : i32 to vector<1x352xi32>
    %118 = arith.cmpi ne, %116, %117 : vector<1x352xi32>
    %c0_i32_14 = arith.constant 0 : i32
    %119 = vector.broadcast %c0_i32_14 : i32 to vector<1x352xi32>
    %120 = arith.cmpi slt, %116, %119 : vector<1x352xi32>
    %c0_i32_15 = arith.constant 0 : i32
    %121 = arith.cmpi slt, %114, %c0_i32_15 : i32
    %122 = vector.broadcast %121 : i1 to vector<1x352xi1>
    %123 = vector.broadcast %122 : vector<1x352xi1> to vector<1x352xi1>
    %124 = arith.xori %120, %123 : vector<1x352xi1>
    %125 = arith.andi %124, %118 : vector<1x352xi1>
    %126 = vector.broadcast %114 : i32 to vector<1x352xi32>
    %127 = arith.addi %116, %126 : vector<1x352xi32>
    %128 = arith.select %125, %127, %116 : vector<1x352xi1>, vector<1x352xi32>
    %c0_16 = arith.constant 0 : index
    %c77_17 = arith.constant 77 : index
    %129 = vector.load %arg4[%c0_16, %c77_17] : memref<2x512xf32, #tpu.memory_space<vmem>>, vector<1x352xf32>
    %c3_i32 = arith.constant 3 : i32
    %130 = vector.broadcast %c3_i32 : i32 to vector<1x352xi32>
    %131 = arith.cmpi sge, %128, %130 : vector<1x352xi32>
    %cst_18 = arith.constant 0.000000e+00 : f32
    %132 = vector.broadcast %cst_18 : f32 to vector<1x352xf32>
    %133 = arith.select %131, %129, %132 : vector<1x352xi1>, vector<1x352xf32>
    %c0_19 = arith.constant 0 : index
    %c78_20 = arith.constant 78 : index
    %134 = vector.load %arg4[%c0_19, %c78_20] : memref<2x512xf32, #tpu.memory_space<vmem>>, vector<1x352xf32>
    %c2_i32 = arith.constant 2 : i32
    %135 = vector.broadcast %c2_i32 : i32 to vector<1x352xi32>
    %136 = arith.cmpi sge, %128, %135 : vector<1x352xi32>
    %cst_21 = arith.constant 0.000000e+00 : f32
    %137 = vector.broadcast %cst_21 : f32 to vector<1x352xf32>
    %138 = arith.select %136, %134, %137 : vector<1x352xi1>, vector<1x352xf32>
    %c0_22 = arith.constant 0 : index
    %c79_23 = arith.constant 79 : index
    %139 = vector.load %arg4[%c0_22, %c79_23] : memref<2x512xf32, #tpu.memory_space<vmem>>, vector<1x352xf32>
    %c1_i32_24 = arith.constant 1 : i32
    %140 = vector.broadcast %c1_i32_24 : i32 to vector<1x352xi32>
    %141 = arith.cmpi sge, %128, %140 : vector<1x352xi32>
    %cst_25 = arith.constant 0.000000e+00 : f32
    %142 = vector.broadcast %cst_25 : f32 to vector<1x352xf32>
    %143 = arith.select %141, %139, %142 : vector<1x352xi1>, vector<1x352xf32>
    %c0_26 = arith.constant 0 : index
    %c80_27 = arith.constant 80 : index
    %144 = vector.load %arg4[%c0_26, %c80_27] : memref<2x512xf32, #tpu.memory_space<vmem>>, vector<1x352xf32>
    %c0_28 = arith.constant 0 : index
    %c81_29 = arith.constant 81 : index
    %145 = vector.load %arg4[%c0_28, %c81_29] : memref<2x512xf32, #tpu.memory_space<vmem>>, vector<1x352xf32>
    %c15_i32 = arith.constant 15 : i32
    %146 = vector.broadcast %c15_i32 : i32 to vector<1x352xi32>
    %147 = arith.cmpi slt, %128, %146 : vector<1x352xi32>
    %cst_30 = arith.constant 0.000000e+00 : f32
    %148 = vector.broadcast %cst_30 : f32 to vector<1x352xf32>
    %149 = arith.select %147, %145, %148 : vector<1x352xi1>, vector<1x352xf32>
    %c0_31 = arith.constant 0 : index
    %c82_32 = arith.constant 82 : index
    %150 = vector.load %arg4[%c0_31, %c82_32] : memref<2x512xf32, #tpu.memory_space<vmem>>, vector<1x352xf32>
    %c14_i32 = arith.constant 14 : i32
    %151 = vector.broadcast %c14_i32 : i32 to vector<1x352xi32>
    %152 = arith.cmpi slt, %128, %151 : vector<1x352xi32>
    %cst_33 = arith.constant 0.000000e+00 : f32
    %153 = vector.broadcast %cst_33 : f32 to vector<1x352xf32>
    %154 = arith.select %152, %150, %153 : vector<1x352xi1>, vector<1x352xf32>
    %c0_34 = arith.constant 0 : index
    %c83_35 = arith.constant 83 : index
    %155 = vector.load %arg4[%c0_34, %c83_35] : memref<2x512xf32, #tpu.memory_space<vmem>>, vector<1x352xf32>
    %c13_i32 = arith.constant 13 : i32
    %156 = vector.broadcast %c13_i32 : i32 to vector<1x352xi32>
    %157 = arith.cmpi slt, %128, %156 : vector<1x352xi32>
    %cst_36 = arith.constant 0.000000e+00 : f32
    %158 = vector.broadcast %cst_36 : f32 to vector<1x352xf32>
    %159 = arith.select %157, %155, %158 : vector<1x352xi1>, vector<1x352xf32>
    %c1_37 = arith.constant 1 : index
    %c77_38 = arith.constant 77 : index
    %160 = vector.load %arg4[%c1_37, %c77_38] : memref<2x512xf32, #tpu.memory_space<vmem>>, vector<1x352xf32>
    %c3_i32_39 = arith.constant 3 : i32
    %161 = vector.broadcast %c3_i32_39 : i32 to vector<1x352xi32>
    %162 = arith.cmpi sge, %128, %161 : vector<1x352xi32>
    %cst_40 = arith.constant 0.000000e+00 : f32
    %163 = vector.broadcast %cst_40 : f32 to vector<1x352xf32>
    %164 = arith.select %162, %160, %163 : vector<1x352xi1>, vector<1x352xf32>
    %c1_41 = arith.constant 1 : index
    %c78_42 = arith.constant 78 : index
    %165 = vector.load %arg4[%c1_41, %c78_42] : memref<2x512xf32, #tpu.memory_space<vmem>>, vector<1x352xf32>
    %c2_i32_43 = arith.constant 2 : i32
    %166 = vector.broadcast %c2_i32_43 : i32 to vector<1x352xi32>
    %167 = arith.cmpi sge, %128, %166 : vector<1x352xi32>
    %cst_44 = arith.constant 0.000000e+00 : f32
    %168 = vector.broadcast %cst_44 : f32 to vector<1x352xf32>
    %169 = arith.select %167, %165, %168 : vector<1x352xi1>, vector<1x352xf32>
    %c1_45 = arith.constant 1 : index
    %c79_46 = arith.constant 79 : index
    %170 = vector.load %arg4[%c1_45, %c79_46] : memref<2x512xf32, #tpu.memory_space<vmem>>, vector<1x352xf32>
    %c1_i32_47 = arith.constant 1 : i32
    %171 = vector.broadcast %c1_i32_47 : i32 to vector<1x352xi32>
    %172 = arith.cmpi sge, %128, %171 : vector<1x352xi32>
    %cst_48 = arith.constant 0.000000e+00 : f32
    %173 = vector.broadcast %cst_48 : f32 to vector<1x352xf32>
    %174 = arith.select %172, %170, %173 : vector<1x352xi1>, vector<1x352xf32>
    %c1_49 = arith.constant 1 : index
    %c80_50 = arith.constant 80 : index
    %175 = vector.load %arg4[%c1_49, %c80_50] : memref<2x512xf32, #tpu.memory_space<vmem>>, vector<1x352xf32>
    %c1_51 = arith.constant 1 : index
    %c81_52 = arith.constant 81 : index
    %176 = vector.load %arg4[%c1_51, %c81_52] : memref<2x512xf32, #tpu.memory_space<vmem>>, vector<1x352xf32>
    %c15_i32_53 = arith.constant 15 : i32
    %177 = vector.broadcast %c15_i32_53 : i32 to vector<1x352xi32>
    %178 = arith.cmpi slt, %128, %177 : vector<1x352xi32>
    %cst_54 = arith.constant 0.000000e+00 : f32
    %179 = vector.broadcast %cst_54 : f32 to vector<1x352xf32>
    %180 = arith.select %178, %176, %179 : vector<1x352xi1>, vector<1x352xf32>
    %c1_55 = arith.constant 1 : index
    %c82_56 = arith.constant 82 : index
    %181 = vector.load %arg4[%c1_55, %c82_56] : memref<2x512xf32, #tpu.memory_space<vmem>>, vector<1x352xf32>
    %c14_i32_57 = arith.constant 14 : i32
    %182 = vector.broadcast %c14_i32_57 : i32 to vector<1x352xi32>
    %183 = arith.cmpi slt, %128, %182 : vector<1x352xi32>
    %cst_58 = arith.constant 0.000000e+00 : f32
    %184 = vector.broadcast %cst_58 : f32 to vector<1x352xf32>
    %185 = arith.select %183, %181, %184 : vector<1x352xi1>, vector<1x352xf32>
    %c1_59 = arith.constant 1 : index
    %c83_60 = arith.constant 83 : index
    %186 = vector.load %arg4[%c1_59, %c83_60] : memref<2x512xf32, #tpu.memory_space<vmem>>, vector<1x352xf32>
    %c13_i32_61 = arith.constant 13 : i32
    %187 = vector.broadcast %c13_i32_61 : i32 to vector<1x352xi32>
    %188 = arith.cmpi slt, %128, %187 : vector<1x352xi32>
    %cst_62 = arith.constant 0.000000e+00 : f32
    %189 = vector.broadcast %cst_62 : f32 to vector<1x352xf32>
    %190 = arith.select %188, %186, %189 : vector<1x352xi1>, vector<1x352xf32>
    %191 = vector.broadcast %8 : f32 to vector<1x352xf32>
    %192 = arith.mulf %191, %133 : vector<1x352xf32>
    %193 = vector.broadcast %9 : f32 to vector<1x352xf32>
    %194 = arith.mulf %193, %138 : vector<1x352xf32>
    %195 = arith.addf %192, %194 : vector<1x352xf32>
    %196 = vector.broadcast %10 : f32 to vector<1x352xf32>
    %197 = arith.mulf %196, %143 : vector<1x352xf32>
    %198 = arith.addf %195, %197 : vector<1x352xf32>
    %199 = vector.broadcast %11 : f32 to vector<1x352xf32>
    %200 = arith.mulf %199, %144 : vector<1x352xf32>
    %201 = arith.addf %198, %200 : vector<1x352xf32>
    %202 = vector.broadcast %12 : f32 to vector<1x352xf32>
    %203 = arith.mulf %202, %149 : vector<1x352xf32>
    %204 = arith.addf %201, %203 : vector<1x352xf32>
    %205 = vector.broadcast %13 : f32 to vector<1x352xf32>
    %206 = arith.mulf %205, %154 : vector<1x352xf32>
    %207 = arith.addf %204, %206 : vector<1x352xf32>
    %208 = vector.broadcast %14 : f32 to vector<1x352xf32>
    %209 = arith.mulf %208, %159 : vector<1x352xf32>
    %210 = arith.addf %207, %209 : vector<1x352xf32>
    %211 = vector.broadcast %57 : f32 to vector<1x352xf32>
    %212 = arith.mulf %211, %164 : vector<1x352xf32>
    %213 = arith.addf %210, %212 : vector<1x352xf32>
    %214 = vector.broadcast %58 : f32 to vector<1x352xf32>
    %215 = arith.mulf %214, %169 : vector<1x352xf32>
    %216 = arith.addf %213, %215 : vector<1x352xf32>
    %217 = vector.broadcast %59 : f32 to vector<1x352xf32>
    %218 = arith.mulf %217, %174 : vector<1x352xf32>
    %219 = arith.addf %216, %218 : vector<1x352xf32>
    %220 = vector.broadcast %60 : f32 to vector<1x352xf32>
    %221 = arith.mulf %220, %175 : vector<1x352xf32>
    %222 = arith.addf %219, %221 : vector<1x352xf32>
    %223 = vector.broadcast %61 : f32 to vector<1x352xf32>
    %224 = arith.mulf %223, %180 : vector<1x352xf32>
    %225 = arith.addf %222, %224 : vector<1x352xf32>
    %226 = vector.broadcast %62 : f32 to vector<1x352xf32>
    %227 = arith.mulf %226, %185 : vector<1x352xf32>
    %228 = arith.addf %225, %227 : vector<1x352xf32>
    %229 = vector.broadcast %63 : f32 to vector<1x352xf32>
    %230 = arith.mulf %229, %190 : vector<1x352xf32>
    %231 = arith.addf %228, %230 : vector<1x352xf32>
    %232 = vector.extract_strided_slice %231 {offsets = [0, 0], sizes = [1, 256], strides = [1, 1]} : vector<1x352xf32> to vector<1x256xf32>
    %233 = vector.broadcast %15 : f32 to vector<1x352xf32>
    %234 = arith.mulf %233, %133 : vector<1x352xf32>
    %235 = vector.broadcast %16 : f32 to vector<1x352xf32>
    %236 = arith.mulf %235, %138 : vector<1x352xf32>
    %237 = arith.addf %234, %236 : vector<1x352xf32>
    %238 = vector.broadcast %17 : f32 to vector<1x352xf32>
    %239 = arith.mulf %238, %143 : vector<1x352xf32>
    %240 = arith.addf %237, %239 : vector<1x352xf32>
    %241 = vector.broadcast %18 : f32 to vector<1x352xf32>
    %242 = arith.mulf %241, %144 : vector<1x352xf32>
    %243 = arith.addf %240, %242 : vector<1x352xf32>
    %244 = vector.broadcast %19 : f32 to vector<1x352xf32>
    %245 = arith.mulf %244, %149 : vector<1x352xf32>
    %246 = arith.addf %243, %245 : vector<1x352xf32>
    %247 = vector.broadcast %20 : f32 to vector<1x352xf32>
    %248 = arith.mulf %247, %154 : vector<1x352xf32>
    %249 = arith.addf %246, %248 : vector<1x352xf32>
    %250 = vector.broadcast %21 : f32 to vector<1x352xf32>
    %251 = arith.mulf %250, %159 : vector<1x352xf32>
    %252 = arith.addf %249, %251 : vector<1x352xf32>
    %253 = vector.broadcast %64 : f32 to vector<1x352xf32>
    %254 = arith.mulf %253, %164 : vector<1x352xf32>
    %255 = arith.addf %252, %254 : vector<1x352xf32>
    %256 = vector.broadcast %65 : f32 to vector<1x352xf32>
    %257 = arith.mulf %256, %169 : vector<1x352xf32>
    %258 = arith.addf %255, %257 : vector<1x352xf32>
    %259 = vector.broadcast %66 : f32 to vector<1x352xf32>
    %260 = arith.mulf %259, %174 : vector<1x352xf32>
    %261 = arith.addf %258, %260 : vector<1x352xf32>
    %262 = vector.broadcast %67 : f32 to vector<1x352xf32>
    %263 = arith.mulf %262, %175 : vector<1x352xf32>
    %264 = arith.addf %261, %263 : vector<1x352xf32>
    %265 = vector.broadcast %68 : f32 to vector<1x352xf32>
    %266 = arith.mulf %265, %180 : vector<1x352xf32>
    %267 = arith.addf %264, %266 : vector<1x352xf32>
    %268 = vector.broadcast %69 : f32 to vector<1x352xf32>
    %269 = arith.mulf %268, %185 : vector<1x352xf32>
    %270 = arith.addf %267, %269 : vector<1x352xf32>
    %271 = vector.broadcast %70 : f32 to vector<1x352xf32>
    %272 = arith.mulf %271, %190 : vector<1x352xf32>
    %273 = arith.addf %270, %272 : vector<1x352xf32>
    %274 = vector.extract_strided_slice %273 {offsets = [0, 16], sizes = [1, 256], strides = [1, 1]} : vector<1x352xf32> to vector<1x256xf32>
    %275 = arith.addf %232, %274 : vector<1x256xf32>
    %276 = vector.broadcast %22 : f32 to vector<1x352xf32>
    %277 = arith.mulf %276, %133 : vector<1x352xf32>
    %278 = vector.broadcast %23 : f32 to vector<1x352xf32>
    %279 = arith.mulf %278, %138 : vector<1x352xf32>
    %280 = arith.addf %277, %279 : vector<1x352xf32>
    %281 = vector.broadcast %24 : f32 to vector<1x352xf32>
    %282 = arith.mulf %281, %143 : vector<1x352xf32>
    %283 = arith.addf %280, %282 : vector<1x352xf32>
    %284 = vector.broadcast %25 : f32 to vector<1x352xf32>
    %285 = arith.mulf %284, %144 : vector<1x352xf32>
    %286 = arith.addf %283, %285 : vector<1x352xf32>
    %287 = vector.broadcast %26 : f32 to vector<1x352xf32>
    %288 = arith.mulf %287, %149 : vector<1x352xf32>
    %289 = arith.addf %286, %288 : vector<1x352xf32>
    %290 = vector.broadcast %27 : f32 to vector<1x352xf32>
    %291 = arith.mulf %290, %154 : vector<1x352xf32>
    %292 = arith.addf %289, %291 : vector<1x352xf32>
    %293 = vector.broadcast %28 : f32 to vector<1x352xf32>
    %294 = arith.mulf %293, %159 : vector<1x352xf32>
    %295 = arith.addf %292, %294 : vector<1x352xf32>
    %296 = vector.broadcast %71 : f32 to vector<1x352xf32>
    %297 = arith.mulf %296, %164 : vector<1x352xf32>
    %298 = arith.addf %295, %297 : vector<1x352xf32>
    %299 = vector.broadcast %72 : f32 to vector<1x352xf32>
    %300 = arith.mulf %299, %169 : vector<1x352xf32>
    %301 = arith.addf %298, %300 : vector<1x352xf32>
    %302 = vector.broadcast %73 : f32 to vector<1x352xf32>
    %303 = arith.mulf %302, %174 : vector<1x352xf32>
    %304 = arith.addf %301, %303 : vector<1x352xf32>
    %305 = vector.broadcast %74 : f32 to vector<1x352xf32>
    %306 = arith.mulf %305, %175 : vector<1x352xf32>
    %307 = arith.addf %304, %306 : vector<1x352xf32>
    %308 = vector.broadcast %75 : f32 to vector<1x352xf32>
    %309 = arith.mulf %308, %180 : vector<1x352xf32>
    %310 = arith.addf %307, %309 : vector<1x352xf32>
    %311 = vector.broadcast %76 : f32 to vector<1x352xf32>
    %312 = arith.mulf %311, %185 : vector<1x352xf32>
    %313 = arith.addf %310, %312 : vector<1x352xf32>
    %314 = vector.broadcast %77 : f32 to vector<1x352xf32>
    %315 = arith.mulf %314, %190 : vector<1x352xf32>
    %316 = arith.addf %313, %315 : vector<1x352xf32>
    %317 = vector.extract_strided_slice %316 {offsets = [0, 32], sizes = [1, 256], strides = [1, 1]} : vector<1x352xf32> to vector<1x256xf32>
    %318 = arith.addf %275, %317 : vector<1x256xf32>
    %319 = vector.broadcast %29 : f32 to vector<1x352xf32>
    %320 = arith.mulf %319, %133 : vector<1x352xf32>
    %321 = vector.broadcast %30 : f32 to vector<1x352xf32>
    %322 = arith.mulf %321, %138 : vector<1x352xf32>
    %323 = arith.addf %320, %322 : vector<1x352xf32>
    %324 = vector.broadcast %31 : f32 to vector<1x352xf32>
    %325 = arith.mulf %324, %143 : vector<1x352xf32>
    %326 = arith.addf %323, %325 : vector<1x352xf32>
    %327 = vector.broadcast %32 : f32 to vector<1x352xf32>
    %328 = arith.mulf %327, %144 : vector<1x352xf32>
    %329 = arith.addf %326, %328 : vector<1x352xf32>
    %330 = vector.broadcast %33 : f32 to vector<1x352xf32>
    %331 = arith.mulf %330, %149 : vector<1x352xf32>
    %332 = arith.addf %329, %331 : vector<1x352xf32>
    %333 = vector.broadcast %34 : f32 to vector<1x352xf32>
    %334 = arith.mulf %333, %154 : vector<1x352xf32>
    %335 = arith.addf %332, %334 : vector<1x352xf32>
    %336 = vector.broadcast %35 : f32 to vector<1x352xf32>
    %337 = arith.mulf %336, %159 : vector<1x352xf32>
    %338 = arith.addf %335, %337 : vector<1x352xf32>
    %339 = vector.broadcast %78 : f32 to vector<1x352xf32>
    %340 = arith.mulf %339, %164 : vector<1x352xf32>
    %341 = arith.addf %338, %340 : vector<1x352xf32>
    %342 = vector.broadcast %79 : f32 to vector<1x352xf32>
    %343 = arith.mulf %342, %169 : vector<1x352xf32>
    %344 = arith.addf %341, %343 : vector<1x352xf32>
    %345 = vector.broadcast %80 : f32 to vector<1x352xf32>
    %346 = arith.mulf %345, %174 : vector<1x352xf32>
    %347 = arith.addf %344, %346 : vector<1x352xf32>
    %348 = vector.broadcast %81 : f32 to vector<1x352xf32>
    %349 = arith.mulf %348, %175 : vector<1x352xf32>
    %350 = arith.addf %347, %349 : vector<1x352xf32>
    %351 = vector.broadcast %82 : f32 to vector<1x352xf32>
    %352 = arith.mulf %351, %180 : vector<1x352xf32>
    %353 = arith.addf %350, %352 : vector<1x352xf32>
    %354 = vector.broadcast %83 : f32 to vector<1x352xf32>
    %355 = arith.mulf %354, %185 : vector<1x352xf32>
    %356 = arith.addf %353, %355 : vector<1x352xf32>
    %357 = vector.broadcast %84 : f32 to vector<1x352xf32>
    %358 = arith.mulf %357, %190 : vector<1x352xf32>
    %359 = arith.addf %356, %358 : vector<1x352xf32>
    %360 = vector.extract_strided_slice %359 {offsets = [0, 48], sizes = [1, 256], strides = [1, 1]} : vector<1x352xf32> to vector<1x256xf32>
    %361 = arith.addf %318, %360 : vector<1x256xf32>
    %362 = vector.broadcast %36 : f32 to vector<1x352xf32>
    %363 = arith.mulf %362, %133 : vector<1x352xf32>
    %364 = vector.broadcast %37 : f32 to vector<1x352xf32>
    %365 = arith.mulf %364, %138 : vector<1x352xf32>
    %366 = arith.addf %363, %365 : vector<1x352xf32>
    %367 = vector.broadcast %38 : f32 to vector<1x352xf32>
    %368 = arith.mulf %367, %143 : vector<1x352xf32>
    %369 = arith.addf %366, %368 : vector<1x352xf32>
    %370 = vector.broadcast %39 : f32 to vector<1x352xf32>
    %371 = arith.mulf %370, %144 : vector<1x352xf32>
    %372 = arith.addf %369, %371 : vector<1x352xf32>
    %373 = vector.broadcast %40 : f32 to vector<1x352xf32>
    %374 = arith.mulf %373, %149 : vector<1x352xf32>
    %375 = arith.addf %372, %374 : vector<1x352xf32>
    %376 = vector.broadcast %41 : f32 to vector<1x352xf32>
    %377 = arith.mulf %376, %154 : vector<1x352xf32>
    %378 = arith.addf %375, %377 : vector<1x352xf32>
    %379 = vector.broadcast %42 : f32 to vector<1x352xf32>
    %380 = arith.mulf %379, %159 : vector<1x352xf32>
    %381 = arith.addf %378, %380 : vector<1x352xf32>
    %382 = vector.broadcast %85 : f32 to vector<1x352xf32>
    %383 = arith.mulf %382, %164 : vector<1x352xf32>
    %384 = arith.addf %381, %383 : vector<1x352xf32>
    %385 = vector.broadcast %86 : f32 to vector<1x352xf32>
    %386 = arith.mulf %385, %169 : vector<1x352xf32>
    %387 = arith.addf %384, %386 : vector<1x352xf32>
    %388 = vector.broadcast %87 : f32 to vector<1x352xf32>
    %389 = arith.mulf %388, %174 : vector<1x352xf32>
    %390 = arith.addf %387, %389 : vector<1x352xf32>
    %391 = vector.broadcast %88 : f32 to vector<1x352xf32>
    %392 = arith.mulf %391, %175 : vector<1x352xf32>
    %393 = arith.addf %390, %392 : vector<1x352xf32>
    %394 = vector.broadcast %89 : f32 to vector<1x352xf32>
    %395 = arith.mulf %394, %180 : vector<1x352xf32>
    %396 = arith.addf %393, %395 : vector<1x352xf32>
    %397 = vector.broadcast %90 : f32 to vector<1x352xf32>
    %398 = arith.mulf %397, %185 : vector<1x352xf32>
    %399 = arith.addf %396, %398 : vector<1x352xf32>
    %400 = vector.broadcast %91 : f32 to vector<1x352xf32>
    %401 = arith.mulf %400, %190 : vector<1x352xf32>
    %402 = arith.addf %399, %401 : vector<1x352xf32>
    %403 = vector.extract_strided_slice %402 {offsets = [0, 64], sizes = [1, 256], strides = [1, 1]} : vector<1x352xf32> to vector<1x256xf32>
    %404 = arith.addf %361, %403 : vector<1x256xf32>
    %405 = vector.broadcast %43 : f32 to vector<1x352xf32>
    %406 = arith.mulf %405, %133 : vector<1x352xf32>
    %407 = vector.broadcast %44 : f32 to vector<1x352xf32>
    %408 = arith.mulf %407, %138 : vector<1x352xf32>
    %409 = arith.addf %406, %408 : vector<1x352xf32>
    %410 = vector.broadcast %45 : f32 to vector<1x352xf32>
    %411 = arith.mulf %410, %143 : vector<1x352xf32>
    %412 = arith.addf %409, %411 : vector<1x352xf32>
    %413 = vector.broadcast %46 : f32 to vector<1x352xf32>
    %414 = arith.mulf %413, %144 : vector<1x352xf32>
    %415 = arith.addf %412, %414 : vector<1x352xf32>
    %416 = vector.broadcast %47 : f32 to vector<1x352xf32>
    %417 = arith.mulf %416, %149 : vector<1x352xf32>
    %418 = arith.addf %415, %417 : vector<1x352xf32>
    %419 = vector.broadcast %48 : f32 to vector<1x352xf32>
    %420 = arith.mulf %419, %154 : vector<1x352xf32>
    %421 = arith.addf %418, %420 : vector<1x352xf32>
    %422 = vector.broadcast %49 : f32 to vector<1x352xf32>
    %423 = arith.mulf %422, %159 : vector<1x352xf32>
    %424 = arith.addf %421, %423 : vector<1x352xf32>
    %425 = vector.broadcast %92 : f32 to vector<1x352xf32>
    %426 = arith.mulf %425, %164 : vector<1x352xf32>
    %427 = arith.addf %424, %426 : vector<1x352xf32>
    %428 = vector.broadcast %93 : f32 to vector<1x352xf32>
    %429 = arith.mulf %428, %169 : vector<1x352xf32>
    %430 = arith.addf %427, %429 : vector<1x352xf32>
    %431 = vector.broadcast %94 : f32 to vector<1x352xf32>
    %432 = arith.mulf %431, %174 : vector<1x352xf32>
    %433 = arith.addf %430, %432 : vector<1x352xf32>
    %434 = vector.broadcast %95 : f32 to vector<1x352xf32>
    %435 = arith.mulf %434, %175 : vector<1x352xf32>
    %436 = arith.addf %433, %435 : vector<1x352xf32>
    %437 = vector.broadcast %96 : f32 to vector<1x352xf32>
    %438 = arith.mulf %437, %180 : vector<1x352xf32>
    %439 = arith.addf %436, %438 : vector<1x352xf32>
    %440 = vector.broadcast %97 : f32 to vector<1x352xf32>
    %441 = arith.mulf %440, %185 : vector<1x352xf32>
    %442 = arith.addf %439, %441 : vector<1x352xf32>
    %443 = vector.broadcast %98 : f32 to vector<1x352xf32>
    %444 = arith.mulf %443, %190 : vector<1x352xf32>
    %445 = arith.addf %442, %444 : vector<1x352xf32>
    %446 = vector.extract_strided_slice %445 {offsets = [0, 80], sizes = [1, 256], strides = [1, 1]} : vector<1x352xf32> to vector<1x256xf32>
    %447 = arith.addf %404, %446 : vector<1x256xf32>
    %448 = vector.broadcast %50 : f32 to vector<1x352xf32>
    %449 = arith.mulf %448, %133 : vector<1x352xf32>
    %450 = vector.broadcast %51 : f32 to vector<1x352xf32>
    %451 = arith.mulf %450, %138 : vector<1x352xf32>
    %452 = arith.addf %449, %451 : vector<1x352xf32>
    %453 = vector.broadcast %52 : f32 to vector<1x352xf32>
    %454 = arith.mulf %453, %143 : vector<1x352xf32>
    %455 = arith.addf %452, %454 : vector<1x352xf32>
    %456 = vector.broadcast %53 : f32 to vector<1x352xf32>
    %457 = arith.mulf %456, %144 : vector<1x352xf32>
    %458 = arith.addf %455, %457 : vector<1x352xf32>
    %459 = vector.broadcast %54 : f32 to vector<1x352xf32>
    %460 = arith.mulf %459, %149 : vector<1x352xf32>
    %461 = arith.addf %458, %460 : vector<1x352xf32>
    %462 = vector.broadcast %55 : f32 to vector<1x352xf32>
    %463 = arith.mulf %462, %154 : vector<1x352xf32>
    %464 = arith.addf %461, %463 : vector<1x352xf32>
    %465 = vector.broadcast %56 : f32 to vector<1x352xf32>
    %466 = arith.mulf %465, %159 : vector<1x352xf32>
    %467 = arith.addf %464, %466 : vector<1x352xf32>
    %468 = vector.broadcast %99 : f32 to vector<1x352xf32>
    %469 = arith.mulf %468, %164 : vector<1x352xf32>
    %470 = arith.addf %467, %469 : vector<1x352xf32>
    %471 = vector.broadcast %100 : f32 to vector<1x352xf32>
    %472 = arith.mulf %471, %169 : vector<1x352xf32>
    %473 = arith.addf %470, %472 : vector<1x352xf32>
    %474 = vector.broadcast %101 : f32 to vector<1x352xf32>
    %475 = arith.mulf %474, %174 : vector<1x352xf32>
    %476 = arith.addf %473, %475 : vector<1x352xf32>
    %477 = vector.broadcast %102 : f32 to vector<1x352xf32>
    %478 = arith.mulf %477, %175 : vector<1x352xf32>
    %479 = arith.addf %476, %478 : vector<1x352xf32>
    %480 = vector.broadcast %103 : f32 to vector<1x352xf32>
    %481 = arith.mulf %480, %180 : vector<1x352xf32>
    %482 = arith.addf %479, %481 : vector<1x352xf32>
    %483 = vector.broadcast %104 : f32 to vector<1x352xf32>
    %484 = arith.mulf %483, %185 : vector<1x352xf32>
    %485 = arith.addf %482, %484 : vector<1x352xf32>
    %486 = vector.broadcast %105 : f32 to vector<1x352xf32>
    %487 = arith.mulf %486, %190 : vector<1x352xf32>
    %488 = arith.addf %485, %487 : vector<1x352xf32>
    %489 = vector.extract_strided_slice %488 {offsets = [0, 96], sizes = [1, 256], strides = [1, 1]} : vector<1x352xf32> to vector<1x256xf32>
    %490 = arith.addf %447, %489 : vector<1x256xf32>
    %491 = arith.negf %490 : vector<1x256xf32>
    %492 = math.exp %491 : vector<1x256xf32>
    %cst_63 = arith.constant 1.000000e+00 : f32
    %493 = vector.broadcast %cst_63 : f32 to vector<1x256xf32>
    %494 = arith.addf %493, %492 : vector<1x256xf32>
    %495 = arith.divf %493, %494 : vector<1x256xf32>
    %c0_64 = arith.constant 0 : index
    %c0_65 = arith.constant 0 : index
    %c0_66 = arith.constant 0 : index
    %496 = vector.load %arg1[%c0_64, %c0_65, %c0_66] : memref<1x4x256xf32, #tpu.memory_space<vmem>>, vector<1x4x256xf32>
    %497 = vector.shape_cast %496 : vector<1x4x256xf32> to vector<4x256xf32>
    %498 = vector.broadcast %495 : vector<1x256xf32> to vector<4x256xf32>
    %499 = arith.mulf %497, %498 : vector<4x256xf32>
    %c0_67 = arith.constant 0 : index
    %c0_68 = arith.constant 0 : index
    %c0_69 = arith.constant 0 : index
    %500 = vector.load %arg3[%c0_67, %c0_68, %c0_69] : memref<1x4x256xf32, #tpu.memory_space<vmem>>, vector<1x4x256xf32>
    %501 = vector.shape_cast %500 : vector<1x4x256xf32> to vector<4x256xf32>
    %502 = vector.shape_cast %499 : vector<4x256xf32> to vector<1x4x256xf32>
    tpu.vector_store %arg3[%c0_67, %c0_68, %c0_69], %502 {strides = array<i32>} : memref<1x4x256xf32, #tpu.memory_space<vmem>>, vector<1x4x256xf32>,
    return
  }
  func.func @transform_0(%arg0: i32) -> (i32, i32, i32) {
    %c0_i32 = arith.constant 0 : i32
    %c0_i32_0 = arith.constant 0 : i32
    %c0_i32_1 = arith.constant 0 : i32
    return %arg0, %c0_i32, %c0_i32_0 : i32, i32, i32
  }
  func.func @transform_1(%arg0: i32) -> i32 {
    %c0_i32 = arith.constant 0 : i32
    %c0_i32_0 = arith.constant 0 : i32
    return %c0_i32 : i32
  }
  func.func @transform_2(%arg0: i32) -> (i32, i32, i32) {
    %c0_i32 = arith.constant 0 : i32
    %c0_i32_0 = arith.constant 0 : i32
    %c0_i32_1 = arith.constant 0 : i32
    return %arg0, %c0_i32, %c0_i32_0 : i32, i32, i32
  }
}

</mosaic_0001>

<bundles_post_ra>
// kernel: tpu_custom_call.1
= control target key start
LH: loop header
LB: loop body
LE: loop exit
PB: predicated region body
PF: predicated region fallthrough
CT: control target
= control target key end

     0   :  { %s4176_s0 = inlined_call_operand.hbm [shape: f32[2,4,256], index: 0, kind: input, shape index: {}]   ;;  %s4177_s1 = inlined_call_operand.vmem [shape: f32[98], index: 1, kind: input, shape index: {}]   ;;  %s4178_s2 = inlined_call_operand.hbm [shape: f32[2,4,256], index: 2, kind: output, shape index: {}]  }
   0x1   :  { %4279 = sst [smem:[#allocation83_spill]] %s4176_s0 }
   0x2   :  { %4280 = sst [smem:[#allocation84_spill]] %s4177_s1 }
   0x3   :  { %4281 = sst [smem:[#allocation85_spill]] %s4178_s2 }
   0x4   :  { %7 = vsyncpa [#allocation4], 0 }
   0x5   :  { %9 = vsyncpa [#allocation4 + $0x1], 0 }
   0x6   :  { %10 = vsyncpa [#allocation6], 0 }
   0x7   :  { %11 = vsyncpa [#allocation5], 0 }
   0x8   :  { %13 = vsyncpa [#allocation5 + $0x1], 0  ;;  %s2248_s9 = smov 0   ;;  %s2250_s10 = smov 0  }
   0x9   :  { %s2252_s11 = smov 0   ;;  %s2254_s12 = smov 0  }
   0xa LB: > { %4282 = sst [smem:[#allocation12_spill]] %s2202_s9  ;;  %s2269_s13 = sadd.s32 4294967295, %s2214_s12   ;;  %s2214_s12 = sphi %s2254_s12, %s4519_s12   ;;  %s2210_s11 = sphi %s2252_s11, %s4522_s11   ;;  %s2206_s10 = sphi %s2250_s10, %s4521_s10   ;;  %s2202_s9 = sphi %s2248_s9, %s4520_s9  }
   0xb   : > { %4283 = sst [smem:[#allocation13_spill]] %s2206_s10  ;;  %s1906_s14 = sadd.s32 4294967294, %s2214_s12  }
   0xc   : > { %4284 = sst [smem:[#allocation14_spill]] %s2210_s11  ;;  %p39_p0 = scmp.ne.s32.totalorder %s2206_s10, %s2202_s9 }
   0xd   : > { %4285 = sst [smem:[#allocation15_spill]] %s2214_s12  ;;  %p4179_p1 = scmp.eq.s32.totalorder %s2269_s13, 0 }
   0xe   : > { %4286 = sst [smem:[#allocation16_spill]] %s2269_s13  ;;  %p90_p3 = scmp.eq.s32.totalorder %s1906_s14, 1 }
   0xf   : > { %p2278_p4 = por %p4179_p1, %p39_p0  ;;  %p1907_p5 = scmp.ge.s32.totalorder %s2214_s12, 1 }
  0x10   : > { %p2283_p6 = por %p90_p3, %p39_p0  ;;  %p97_p7 = scmp.lt.s32.totalorder %s2214_s12, 3 }
  0x11   : > { %s4287_s15 = scalar_select %p2278_p4, 1, 0 }
  0x12   : > { %s4288_s16 = scalar_select %p2283_p6, 1, 0 }
  0x13   : > { %s4290_s1 = sld [smem:[#allocation84_spill]]  ;;  %p2291_p8 = pnand %p1907_p5, %p97_p7 }
  0x14   : > { %4289 = sst [smem:[#allocation17_spill]] %s4288_s16  ;;  %s2299_s21 = sadd.s32 1, %s2214_s12  }
  0x15   : > { %s4291_s20 = scalar_select %p2291_p8, 1, 0 }
  0x16   : > { %p2031_p10 = pneg %p2291_p8  ;;  %4292 = sst [smem:[#allocation18_spill]] %s2299_s21 }
  0x17   : > { %s23_s23 = ssub.s32 %s2214_s12, %s2299_s21  ;;  %s26_s25 = sadd.s32 1, %s2210_s11 }
  0x18   : > { %p2303_p11 = pnand %p2031_p10, %p4179_p1  ;;  %p2309_p12 = scmp.eq.s32.totalorder %s23_s23, 0 }
  0x19   : > { %s110_s19 = sshll.u32 %s4290_s1, 4  ;;  %p33_p13 = scmp.ne.s32.totalorder %s2210_s11, %s2206_s10  ;;  %s111_s19 = int_to_ptr.vmem [resolvable:$true] %s110_s19 }
  0x1a   : > { %s2103_s26 = scalar_lea.vmem %s111_s19, 16  ;;  %p2105_p3 = pneg %p2303_p11 }
  0x1b   : > { %p2104_p0 = scmp.ne.s32.totalorder %s111_s19, %s2103_s26  ;;  %p2111_p9 = scmp.lt.s32.totalorder %s111_s19, %s111_s19 }
  0x1c   : > { %p2112_p2 = scmp.lt.s32.totalorder %s2103_s26, %s2103_s26 }
  0x1d   : > { %p2106_p5 = pnand %p2105_p3, %p2104_p0 }
  0x1e   : > { %p2113_p10 = por %p2112_p2, %p2111_p9 }
  0x1f   : > { %p2107_p7 = pneg %p2106_p5 }
  0x21   : > { %p2114_p1 = pnand %p2113_p10, %p2107_p7 }
  0x23   : > { %2117 = shalt.err (!%p2114_p1)
}
  0x24   : > { %s2216_s27 = smov [#allocation7]   ;;  %p34_p2 = scmp.eq.s32.totalorder %s2214_s12, 0 }
  0x25   : > { %2034 = dma.vmem_to_smem (!%p2303_p11), %s111_s19, 16, %s2216_s27, [#allocation6]  }
  0x26   : > { %s2323_s28 = scalar_select %p2309_p12, %s2210_s11, %s26_s25  }
  0x27   : > { %p4296_p1 = scmp.eq.s32.totalorder %s2269_s13, 1  ;;  %p2044_p0 = scmp.lt.s32.totalorder %s2214_s12, 2 }
  0x28   : > { %4295 = sst [smem:[#allocation19_spill]] %s2323_s28  ;;  %s121_s30 = sand.u32 1, %s2210_s11  }
  0x29   : > { %p2331_p9 = por %p4296_p1, %p33_p13  ;;  %p35_p3 = por %p34_p2, %p33_p13 }
  0x2a   : > { %s1910_s3 = sshll.u32 %s121_s30, 3  ;;  %s2021_s4 = sshll.u32 %s2214_s12, 7 }
  0x2b   : > { %s4297_s29 = scalar_select %p2331_p9, 1, 0 }
  0x2c   : > { %s4299_s0 = sld [smem:[#allocation83_spill]]  ;;  %s125_s8 = scalar_lea.vmem [#allocation3], %s1910_s3 }
  0x2d   : > { %4298 = sst [smem:[#allocation20_spill]] %s4297_s29  ;;  %s133_s14 = sshll.u32 %s125_s8, 4  ;;  %s134_s14 = int_to_ptr.vmem [resolvable:$true] %s133_s14 }
  0x2e   : > { %p2346_p11 = pnand %p2044_p0, %p35_p3  ;;  %s122_s18 = scalar_lea.sflag [#allocation4], %s121_s30 }
  0x30   : > { %p2120_p13 = pneg %p2346_p11 }
  0x32   : > { %s2344_s7 = scalar_lea.hbm %s4299_s0, %s2021_s4  ;;  %s2123_s24 = scalar_lea.hbm %s4299_s0, 256 }
  0x33   : > { %s2118_s19 = scalar_lea.hbm %s2344_s7, 128  ;;  %p2124_p10 = scmp.lt.s32.totalorder %s2344_s7, %s4299_s0 }
  0x34   : > { %p2119_p12 = scmp.ne.s32.totalorder %s2344_s7, %s2118_s19  ;;  %p2125_p2 = scmp.lt.s32.totalorder %s2123_s24, %s2118_s19 }
  0x36   : > { %p2121_p5 = pnand %p2120_p13, %p2119_p12  ;;  %p2126_p1 = por %p2125_p2, %p2124_p10 }
  0x38   : > { %p2122_p7 = pneg %p2121_p5 }
  0x3a   : > { %p2127_p0 = pnand %p2126_p1, %p2122_p7 }
  0x3c   : > { %2130 = shalt.err (!%p2127_p0)
}
  0x3d   : > { %s2131_s27 = scalar_lea.vmem %s134_s14, 128  ;;  %s2217_s30 = smov [#allocation3]  }
  0x3e   : > { %p2132_p3 = scmp.ne.s32.totalorder %s134_s14, %s2131_s27  ;;  %s2136_s3 = sshll.u32 %s2217_s30, 4  ;;  %s2137_s3 = int_to_ptr.vmem [resolvable:$false] %s2136_s3 }
  0x3f   : > { %s2138_s4 = scalar_lea.vmem %s2137_s3, 256  ;;  %p2139_p12 = scmp.lt.s32.totalorder %s134_s14, %s2137_s3 }
  0x40   : > { %p2134_p6 = pnand %p2132_p3, %p2120_p13  ;;  %p2140_p5 = scmp.lt.s32.totalorder %s2138_s4, %s2131_s27 }
  0x42   : > { %p2135_p9 = pneg %p2134_p6  ;;  %p2141_p4 = por %p2140_p5, %p2139_p12 }
  0x44   : > { %p2142_p8 = pnand %p2141_p4, %p2135_p9 }
  0x46   : > { %2145 = shalt.err (!%p2142_p8)
}
  0x47   : > { %2038 = dma.hbm_to_vmem [thread:$0]  (!%p2346_p11), %s2344_s7, 128, %s134_s14, %s122_s18  }
  0x48   : > { %p4301_p7 = scmp.ne.s32.totalorder %s4291_s20, 0 }
  0x4a   : > { %142 = sbr.rel (%p4301_p7) target bundleno = 613 (0x265), region = 28 }
  0x4f   : > { %s2367_s5 = sand.u32 1, %s2206_s10   ;;  %p4304_p4 = scmp.ne.s32.totalorder %s4287_s15, 0 }
  0x50   : > { %4302 = sst [smem:[#allocation21_spill]] %s2367_s5  ;;  %s4183_s6 = sshll.u32 %s2367_s5, 3 }
  0x51   : > { %s145_s8 = scalar_lea.sflag [#allocation4], %s2367_s5  ;;  %s2373_s19 = scalar_lea.vmem [#allocation3], %s4183_s6 }
  0x52   : > { %4303 = sst [smem:[#allocation22_spill]] %s2373_s19 }
  0x53   : > { %2189 = dma.done.wait (%p4304_p4), %s145_s8, 128  }
  0x54   : > { %2191 = vsyncadd (%p4304_p4), %s145_s8, 4294967168  ;;  %p4305_p6 = scmp.eq.s32.totalorder %s2269_s13, 0 }
  0x56   : > { %2193 = dma.done.wait (%p4305_p6), [#allocation6], 16   ;;  %p4306_p8 = pmov %p4305_p6 }
  0x58   : > { %2195 = vsyncadd (%p4306_p8), [#allocation6], 4294967280 }
  0x59   : > { %157 = sfence }
  0x5a   : > { %v174_v0 = vld [vmem:[%s2373_s19] sm:$0xff]  ;;  %vm178_vm0 = vcmask 1043456   ;;  %v2218_v3 = vmov 0.0   ;;  %v213_v11 = vlaneseq  ;;  %v2219_v15 = vmov 1966171168   ;;  %s1947_s15 = sld [smem:[#allocation7 + $0x1f]] }
  0x5b   : > { %v176_v1 = vcombine.high %v174_v0, %v174_v0  ;;  %v179_v2 = vsel %vm178_vm0, %v174_v0, 0.0  ;;  %349 = vst [vmem:[#allocation2] sm:$0x3] %v2218_v3  ;;  %350 = vst [vmem:[#allocation2 + $0x6] sm:$0x3] %v2218_v3  ;;  %v193_v4 = vsel %vm178_vm0, %v174_v0, -inf  ;;  %v211_v16 = vunpack.c.l.s4 %v2219_v15 }
  0x5c   : > { %v180_v5 = vrot.slane %v179_v2, 4  ;;  %v194_v6 = vrot.slane %v193_v4, 4  ;;  %v214_v22 = vshrl.u32 %v213_v11, 7  ;;  %vm227_vm1 = vcmp.lt.s32.totalorder %v213_v11, 256  ;;  %s1954_s20 = sld [smem:[#allocation7 + $0x26]]  ;;  %s2220_s14 = smov 51  }
  0x5d   : > { %v186_v7 = vsel %vm178_vm0, %v176_v1, 0.0  ;;  %v200_v8 = vsel %vm178_vm0, %v176_v1, -inf  ;;  %v212_v26 = vunpack.c.0.s8 %v211_v16  ;;  %s1961_s7 = sld [smem:[#allocation7 + $0x2d]]  ;;  %s2221_s17 = smov 50   ;;  %vm420_vm2 = vcmask 416768  }
  0x5e   : > { %v181_v9 = vadd.f32 %v180_v5, %v179_v2  ;;  %v187_v10 = vrot.slane %v186_v7, 4  ;;  %v195_v12 = vmax.f32 %v193_v4, %v194_v6  ;;  %v201_v17 = vrot.slane %v200_v8, 4  ;;  %s4190_s18 = smov 49   ;;  %s4188_s22 = smov 47  }
  0x5f   : > { %v215_v33 = vsub.s32 %v212_v26, %v214_v22  ;;  %v2386_v43 = vsub.s32 0, %v214_v22  ;;  %v2388_v44 = vsub.s32 2, %v214_v22  ;;  %v2390_v45 = vsub.s32 1, %v214_v22  ;;  %s1926_s23 = sld [smem:[#allocation7 + $0xa]]  ;;  %s4186_s24 = smov 46  }
  0x60   : > { %v182_v13 = vrot.slane %v181_v9, 2  ;;  %v188_v14 = vadd.f32 %v187_v10, %v186_v7  ;;  %v196_v18 = vrot.slane %v195_v12, 2  ;;  %v202_v21 = vmax.f32 %v200_v8, %v201_v17  ;;  %s1933_s25 = sld [smem:[#allocation7 + $0x11]]  ;;  %s4184_s26 = smov 45  }
  0x61   : > { %4307 = vst [vmem:[#allocation23_spill] sm:$0xff] %v2386_v43  ;;  %v2392_v46 = vsub.s32 3, %v214_v22  ;;  %v1294_v52 = vstv %s1947_s15  ;;  %s1940_s27 = sld [smem:[#allocation7 + $0x18]]  ;;  %s4192_s30 = smov 48   ;;  %vm4258_vm6 = vcmask 408576   ;;  %vm4254_vm10 = vcmask 400384  }
  0x62   : > { %v183_v19 = vadd.f32 %v182_v13, %v181_v9  ;;  %v189_v20 = vrot.slane %v188_v14, 2  ;;  %v197_v23 = vmax.f32 %v195_v12, %v196_v18  ;;  %v203_v27 = vrot.slane %v202_v21, 2  ;;  %s2500_s3 = sld [smem:[#allocation7 + $0x7]]  ;;  %s4310_s11 = smov 48  }
  0x63   : > { %v1463_v53 = vstv %s1954_s20  ;;  %v1631_v55 = vstv %s1961_s7  ;;  %s2502_s4 = sld [smem:[#allocation7 + $0xe]]  ;;  %s4311_s5 = smov 49   ;;  %vm483_vm14 = vcmask 384000  }
  0x64   : > { %v184_v24 = vrot.slane %v183_v19, 1  ;;  %v190_v25 = vadd.f32 %v189_v20, %v188_v14  ;;  %v198_v28 = vrot.slane %v197_v23, 1  ;;  %v204_v31 = vmax.f32 %v202_v21, %v203_v27  ;;  %s2504_s8 = sld [smem:[#allocation7 + $0x3b]] }
  0x65   : > { %v787_v61 = vstv %s1926_s23  ;;  %s2510_s15 = sld [smem:[#allocation7 + $0x15]]  ;;  %v352_v27 = vand.u32 127, %v213_v11 }
  0x66   : > { %v185_v29 = vadd.f32 %v184_v24, %v183_v19  ;;  %v191_v30 = vrot.slane %v190_v25, 1  ;;  %v199_v34 = vmax.f32 %v197_v23, %v198_v28  ;;  %v205_v35 = vrot.slane %v204_v31, 1  ;;  %s2512_s20 = sld [smem:[#allocation7 + $0x8]] }
  0x67   : > { %v956_v2 = vstv %s1933_s25  ;;  %v1125_v8 = vstv %s1940_s27  ;;  %s2514_s7 = sld [smem:[#allocation7 + $0xf]] }
  0x68   : > { %v192_v32 = vadd.f32 %v191_v30, %v190_v25  ;;  %v206_v37 = vmax.f32 %v204_v31, %v205_v35  ;;  %s2523_s23 = sld [smem:[#allocation7 + $0x1c]]  ;;  %v354_v30 = vadd.s32 256, %v352_v27  ;;  %v353_v31 = vadd.s32 128, %v352_v27 }
  0x69   : > { %s2525_s25 = sld [smem:[#allocation7 + $0x1d]] }
  0x6a   : > { %v209_v36 = vcombine.low %v185_v29, %v192_v32  ;;  %v233_v39 = vcombine.low %v199_v34, %v206_v37  ;;  %s2527_s27 = sld [smem:[#allocation7 + $0x23]]  ;;  %v865_v11 = vstv %s2504_s8  ;;  %v2623_v34 = vand.u32 15, %v354_v30 }
  0x6b   : > { %s2529_s6 = sld [smem:[#allocation7 + $0x24]] }
  0x6c   : > { %v216_v38 = vrot.slane %v209_v36, %v215_v33  ;;  %v240_v41 = vrot.slane %v233_v39, %v215_v33  ;;  %s2553_s0 = sld [smem:[#allocation7 + $0x2a]]  ;;  %4317 = vst [vmem:[#allocation31_spill] sm:$0xff] %v2623_v34  ;;  %v2634_v39 = vand.u32 15, %v353_v31  ;;  %vm394_vm4 = vcmp.ge.s32.totalorder %v2623_v34, 3 }
  0x6d   : > { %s2555_s1 = sld [smem:[#allocation7 + $0x42]]  ;;  %vm4255_vm9 = vcmp.ge.s32.totalorder %v2623_v34, 2  ;;  %vm4252_vm13 = vcmp.ge.s32.totalorder %v2623_v34, 1 }
  0x6e   : > { %v223_v40 = vrot.slane %v216_v38, %v215_v33  ;;  %v247_v42 = vrot.slane %v240_v41, %v215_v33  ;;  %s2557_s28 = sld [smem:[#allocation7 + $0x2b]]  ;;  %v2632_v38 = vand.u32 15, %v352_v27  ;;  %4319 = vst [vmem:[#allocation33_spill] sm:$0xff] %v2634_v39  ;;  %v2642_v41 = vstv %s2502_s4 }
  0x6f   : > { %s2565_s10 = sld [smem:[#allocation7 + $0x12]]  ;;  %vm393_vm5 = vcmp.ge.s32.totalorder %v2634_v39, 3  ;;  %vm4256_vm8 = vcmp.ge.s32.totalorder %v2634_v39, 2  ;;  %vm4253_vm12 = vcmp.ge.s32.totalorder %v2634_v39, 1  ;;  %vm515_vm0 = vcmp.lt.s32.totalorder %v2634_v39, 13 }
  0x70   : > { %230 = vst.msk [vmem:[#allocation2 + $0x2] ss:$2 sm:$0x3] %vm227_vm1, %v223_v40  ;;  %250 = vst.msk [vmem:[#allocation2 + $0x3] ss:$2 sm:$0x3] %vm227_vm1, %v247_v42  ;;  %v2637_v40 = vstv %s2500_s3 }
  0x71   : > { %s2567_s21 = sld [smem:[#allocation7 + $0x19]]  ;;  %4318 = vst [vmem:[#allocation32_spill] sm:$0xff] %v2632_v38  ;;  %vm392_vm3 = vcmp.ge.s32.totalorder %v2632_v38, 3  ;;  %vm4257_vm7 = vcmp.ge.s32.totalorder %v2632_v38, 2  ;;  %vm4251_vm11 = vcmp.ge.s32.totalorder %v2632_v38, 1  ;;  %vm4259_vm15 = vcmp.lt.s32.totalorder %v2632_v38, 15 }
  0x72   : > { %4308 = sst [smem:[#allocation24_spill]] %s2553_s0  ;;  %vm516_vm1 = vcmp.lt.s32.totalorder %v2623_v34, 13 }
  0x73   : > { %s2569_s12 = sld [smem:[#allocation7 + $0x20]]  ;;  %v1034_v35 = vstv %s2555_s1 }
  0x74   : > { %4309 = sst [smem:[#allocation25_spill]] %s2557_s28 }
  0x75   : > { %s2576_s16 = sld [smem:[#allocation7 + $0x27]] }
  0x76   : > { %s2578_s9 = sld [smem:[#allocation7 + $0x2c]] }
  0x77   : > { %v2394_v47 = vld [vmem:[#allocation2] ss:$2 sm:$0xf]  ;;  %v2442_v63 = vld [vmem:[#allocation2 + $0x1] ss:$2 sm:$0xf] }
  0x78   : > { %v407_v48 = vrot.slane %v2394_v47, %v2388_v44  ;;  %v399_v49 = vrot.slane %v2394_v47, %v2386_v43  ;;  %v411_v50 = vrot.slane %v2394_v47, %v2392_v46  ;;  %v403_v51 = vrot.slane %v2394_v47, %v2390_v45  ;;  %s2580_s2 = sld [smem:[#allocation7]] }
  0x79   : > { %v2407_v54 = vmul.f32 %v1294_v52, %v2394_v47  ;;  %v2414_v57 = vmul.f32 %v1463_v53, %v2394_v47  ;;  %v2417_v58 = vmul.f32 %v1631_v55, %v2394_v47  ;;  %v788_v62 = vmul.f32 %v787_v61, %v2394_v47  ;;  %s2582_s29 = sld [smem:[#allocation7 + $0xc]] }
  0x7a   : > { %416 = vrot.lane.b32.xlu1 %v407_v48, %s2220_s14  ;;  %412 = vrot.lane.b32.xlu0 %v399_v49, %s2220_s14  ;;  %v2449_v1 = vrot.slane %v2442_v63, %v2386_v43  ;;  %v957_v5 = vmul.f32 %v956_v2, %v2394_v47  ;;  %v1126_v12 = vmul.f32 %v1125_v8, %v2394_v47  ;;  %s2588_s13 = sld [smem:[#allocation7 + $0x13]]  ;;  %v2676_v55 = vstv %s2514_s7 }
  0x7b   : > { %v1312_v56 = vrot.slane %v2407_v54, %v2392_v46  ;;  %v1481_v59 = vrot.slane %v2414_v57, %v2392_v46  ;;  %v1649_v60 = vrot.slane %v2417_v58, %v2392_v46  ;;  %v793_v0 = vrot.slane %v788_v62, %v2386_v43  ;;  %s2591_s19 = sld [smem:[#allocation7 + $0x1a]] }
  0x7c   : > { %v801_v3 = vrot.slane %v788_v62, %v2388_v44  ;;  %v797_v4 = vrot.slane %v788_v62, %v2390_v45  ;;  %v962_v6 = vrot.slane %v957_v5, %v2386_v43  ;;  %v805_v7 = vrot.slane %v788_v62, %v2392_v46  ;;  %s2593_s28 = sld [smem:[#allocation7 + $0x21]] }
  0x7d   : > { %v970_v9 = vrot.slane %v957_v5, %v2388_v44  ;;  %v966_v10 = vrot.slane %v957_v5, %v2390_v45  ;;  %v1131_v13 = vrot.slane %v1126_v12, %v2386_v43  ;;  %v974_v14 = vrot.slane %v957_v5, %v2392_v46  ;;  %s2595_s0 = sld [smem:[#allocation7 + $0x28]] }
  0x7e   : > { %418 = vrot.lane.b32.xlu1 %v411_v50, %s2220_s14  ;;  %414 = vrot.lane.b32.xlu0 %v403_v51, %s2220_s14  ;;  %v1139_v15 = vrot.slane %v1126_v12, %v2388_v44  ;;  %v1135_v16 = vrot.slane %v1126_v12, %v2390_v45  ;;  %v2478_v17 = vrot.slane %v2442_v63, %v2390_v45  ;;  %s2621_s8 = sld [smem:[#allocation7 + $0x49]]  ;;  %v2697_v62 = vstv %s2523_s23 }
  0x7f   : > { %v1143_v18 = vrot.slane %v1126_v12, %v2392_v46  ;;  %v2486_v19 = vrot.slane %v2442_v63, %v2392_v46  ;;  %v2490_v20 = vrot.slane %v2442_v63, %v2388_v44  ;;  %v1304_v21 = vrot.slane %v2407_v54, %v2390_v45  ;;  %s2651_s1 = sld [smem:[#allocation7 + $0x57]] }
  0x80   : > { %v1300_v22 = vrot.slane %v2407_v54, %v2386_v43  ;;  %v1308_v23 = vrot.slane %v2407_v54, %v2388_v44  ;;  %v1473_v24 = vrot.slane %v2414_v57, %v2390_v45  ;;  %v1469_v25 = vrot.slane %v2414_v57, %v2386_v43  ;;  %4312 = sst [smem:[#allocation26_spill]] %s2588_s13 }
  0x81   : > { %v1477_v26 = vrot.slane %v2414_v57, %v2388_v44  ;;  %v1641_v28 = vrot.slane %v2417_v58, %v2390_v45  ;;  %v1637_v29 = vrot.slane %v2417_v58, %v2386_v43  ;;  %s2606_s13 = sld [smem:[#allocation7 + $0x2e]]  ;;  %v2613_v32 = vmul.f32 %v865_v11, %v2442_v63 }
  0x82   : > { %435 = vrot.lane.b32.xlu1 %v403_v51, %s2221_s17  ;;  %433 = vrot.lane.b32.xlu0 %v399_v49, %s2221_s17  ;;  %4313 = sst [smem:[#allocation27_spill]] %s2593_s28  ;;  %v1645_v33 = vrot.slane %v2417_v58, %v2388_v44  ;;  %v2666_v53 = vmul.f32 %v1034_v35, %v2442_v63  ;;  %v2714_v5 = vstv %s2527_s27  ;;  %v2734_v12 = vstv %s2569_s12 }
  0x83   : > { %4314 = sst [smem:[#allocation28_spill]] %s2595_s0  ;;  %4325 = vst [vmem:[#allocation35_spill] sm:$0xff] %v2734_v12 }
  0x84   : > { %s2608_s28 = sld [smem:[#allocation7 + $0xd]] }
  0x85   : > { %s2610_s0 = sld [smem:[#allocation7 + $0x14]]  ;;  %v1541_v27 = vstv %s2651_s1 }
  0x86   : > { %439 = vrot.lane.b32.xlu1 %v411_v50, %s2221_s17  ;;  %437 = vrot.lane.b32.xlu0 %v407_v48, %s2221_s17  ;;  %s2668_s3 = sld [smem:[#allocation7 + $0x29]]  ;;  %v2813_v52 = vmul.f32 %v1541_v27, %v2442_v63  ;;  %v4347_v27 = vrot.slane %v2613_v32, %v2390_v45 }
  0x87   : > { %4315 = sst [smem:[#allocation29_spill]] %s2606_s13 }
  0x88   : > { %s2626_s13 = sld [smem:[#allocation7 + $0x22]]  ;;  %4344 = vst [vmem:[#allocation50_spill] sm:$0xff] %v2813_v52 }
  0x89   : > { %s2673_s4 = sld [smem:[#allocation7 + $0x30]] }
  0x8a   : > { %456 = vrot.lane.b32.xlu1 %v403_v51, %s4190_s18  ;;  %454 = vrot.lane.b32.xlu0 %v399_v49, %s4190_s18  ;;  %s4333_s12 = sld [smem:[#allocation29_spill]] }
  0x8b   : > { %v2792_v35 = vstv %s2610_s0  ;;  %s2816_s0 = sld [smem:[#allocation7 + $0x38]] }
  0x8c   : > { %4339 = vst [vmem:[#allocation45_spill] sm:$0xff] %v2792_v35  ;;  %s2900_s7 = sld [smem:[#allocation7 + $0x54]] }
  0x8d   : > { %s2950_s23 = sld [smem:[#allocation7 + $0x5b]] }
  0x8e   : > { %460 = vrot.lane.b32.xlu1 %v411_v50, %s4190_s18  ;;  %458 = vrot.lane.b32.xlu0 %v407_v48, %s4190_s18  ;;  %s2541_s18 = sld [smem:[#allocation7 + $0x1e]] }
  0x8f   : > { %s3108_s27 = sld [smem:[#allocation7 + $0x40]] }
  0x90   : > { %s3351_s1 = sld [smem:[#allocation7 + $0x55]] }
  0x92   : > { %477 = vrot.lane.b32.xlu1 %v403_v51, %s4188_s22  ;;  %475 = vrot.lane.b32.xlu0 %v399_v49, %s4188_s22 }
  0x94   : > { %v2703_v2 = vstv %s2541_s18  ;;  %s4328_s18 = sld [smem:[#allocation27_spill]] }
  0x96   : > { %481 = vrot.lane.b32.xlu1 %v411_v50, %s4188_s22  ;;  %479 = vrot.lane.b32.xlu0 %v407_v48, %s4188_s22  ;;  %s2539_s22 = sld [smem:[#allocation7 + $0x17]] }
  0x9a   : > { %498 = vrot.lane.b32.xlu1 %v403_v51, %s4186_s24  ;;  %496 = vrot.lane.b32.xlu0 %v399_v49, %s4186_s24  ;;  %v2781_v30 = vstv %s4328_s18  ;;  %s1978_s18 = sld [smem:[#allocation7 + $0x3e]] }
  0x9b   : > { %4336 = vst [vmem:[#allocation42_spill] sm:$0xff] %v2781_v30 }
  0x9c   : > { %v2685_v58 = vstv %s2539_s22  ;;  %s4320_s22 = sld [smem:[#allocation24_spill]] }
  0x9e   : > { %502 = vrot.lane.b32.xlu1 %v411_v50, %s4186_s24  ;;  %500 = vrot.lane.b32.xlu0 %v407_v48, %s4186_s24  ;;  %s2537_s24 = sld [smem:[#allocation7 + $0x10]] }
  0xa2   : > { %519 = vrot.lane.b32.xlu1 %v403_v51, %s4184_s26  ;;  %517 = vrot.lane.b32.xlu0 %v399_v49, %s4184_s26  ;;  %v2649_v49 = vstv %s2512_s20  ;;  %s4323_s20 = smov 47  }
  0xa6   : > { %523 = vrot.lane.b32.xlu1 %v411_v50, %s4184_s26  ;;  %521 = vrot.lane.b32.xlu0 %v407_v48, %s4184_s26  ;;  %s2535_s26 = sld [smem:[#allocation7 + $0x9]]  ;;  %v2654_v50 = vstv %s2510_s15  ;;  %v2822_v48 = vstv %s2673_s4 }
  0xa7   : > { %s2711_s15 = sld [smem:[#allocation7 + $0x3]]  ;;  %4346 = vst [vmem:[#allocation52_spill] sm:$0xff] %v2822_v48 }
  0xa8   : > { %s3528_s4 = sld [smem:[#allocation7 + $0x41]] }
  0xaa   : > { %806 = vrot.lane.b32.xlu1 %v793_v0, %s4192_s30  ;;  %554 = vrot.lane.b32.xlu0 %v2449_v1, %s2220_s14  ;;  %v2700_v0 = vstv %s2525_s25  ;;  %s3060_s25 = sld [smem:[#allocation7 + $0x39]] }
  0xac   : > { %v2671_v54 = vstv %s2535_s26  ;;  %s2694_s26 = sld [smem:[#allocation7 + $0x5e]] }
  0xae   : > { %810 = vrot.lane.b32.xlu1 %v801_v3, %s4192_s30  ;;  %808 = vrot.lane.b32.xlu0 %v797_v4, %s4192_s30  ;;  %v2706_v3 = vstv %s2565_s10  ;;  %v2709_v4 = vstv %s2567_s21  ;;  %s4324_s10 = sld [smem:[#allocation26_spill]] }
  0xaf   : > { %s2728_s21 = sld [smem:[#allocation7 + $0x34]] }
  0xb2   : > { %975 = vrot.lane.b32.xlu1 %v962_v6, %s4192_s30  ;;  %812 = vrot.lane.b32.xlu0 %v805_v7, %s4192_s30  ;;  %v2717_v6 = vstv %s2529_s6  ;;  %s2739_s6 = sld [smem:[#allocation7 + $0x2f]]  ;;  %v2810_v7 = vstv %s2626_s13 }
  0xb3   : > { %4322 = vst [vmem:[#allocation34_spill] sm:$0xff] %v2717_v6  ;;  %4343 = vst [vmem:[#allocation49_spill] sm:$0xff] %v2810_v7  ;;  %v1709_v51 = vstv %s2694_s26  ;;  %s2845_s13 = sld [smem:[#allocation7 + $0x46]] }
  0xb4   : > { %s3563_s26 = sld [smem:[#allocation7 + $0x48]] }
  0xb5   : > { %v727_v30 = vstv %s2728_s21  ;;  %s1983_s21 = sld [smem:[#allocation7 + $0x43]] }
  0xb6   : > { %979 = vrot.lane.b32.xlu1 %v970_v9, %s4192_s30  ;;  %977 = vrot.lane.b32.xlu0 %v966_v10, %s4192_s30  ;;  %v1203_v9 = vstv %s2621_s8  ;;  %s3293_s8 = sld [smem:[#allocation7 + $0x4e]] }
  0xba   : > { %1144 = vrot.lane.b32.xlu1 %v1131_v13, %s4192_s30  ;;  %981 = vrot.lane.b32.xlu0 %v974_v14, %s4192_s30  ;;  %v2737_v13 = vstv %s2576_s16  ;;  %v2742_v14 = vstv %s4320_s22  ;;  %s2786_s16 = sld [smem:[#allocation7 + $0x1]] }
  0xbb   : > { %4326 = vst [vmem:[#allocation36_spill] sm:$0xff] %v2737_v13  ;;  %4327 = vst [vmem:[#allocation37_spill] sm:$0xff] %v2742_v14  ;;  %s3683_s22 = sld [smem:[#allocation7 + $0x4f]] }
  0xbe   : > { %1148 = vrot.lane.b32.xlu1 %v1139_v15, %s4192_s30  ;;  %1146 = vrot.lane.b32.xlu0 %v1135_v16, %s4192_s30 }
  0xc2   : > { %556 = vrot.lane.b32.xlu1 %v2478_v17, %s2220_s14  ;;  %1150 = vrot.lane.b32.xlu0 %v1143_v18, %s4192_s30 }
  0xc6   : > { %560 = vrot.lane.b32.xlu1 %v2486_v19, %s2220_s14  ;;  %558 = vrot.lane.b32.xlu0 %v2490_v20, %s2220_s14  ;;  %s2516_s14 = sld [smem:[#allocation7 + $0x16]] }
  0xca   : > { %1315 = vrot.lane.b32.xlu1 %v1304_v21, %s4192_s30  ;;  %1313 = vrot.lane.b32.xlu0 %v1300_v22, %s4192_s30  ;;  %v2752_v21 = vstv %s2582_s29  ;;  %s2800_s29 = sld [smem:[#allocation7 + $0x2]] }
  0xcb   : > { %4329 = vst [vmem:[#allocation38_spill] sm:$0xff] %v2752_v21 }
  0xcc   : > { %v2682_v57 = vstv %s2516_s14  ;;  %s4358_s14 = smov 46  }
  0xce   : > { %1319 = vrot.lane.b32.xlu1 %v1312_v56, %s4192_s30  ;;  %1317 = vrot.lane.b32.xlu0 %v1308_v23, %s4192_s30  ;;  %s2551_s30 = sld [smem:[#allocation7 + $0x25]]  ;;  %v2679_v56 = vstv %s2537_s24  ;;  %v2756_v23 = vstv %s2578_s9 }
  0xcf   : > { %s4321_s24 = sld [smem:[#allocation25_spill]]  ;;  %4331 = vst [vmem:[#allocation39_spill] sm:$0xff] %v2756_v23 }
  0xd2   : > { %573 = vrot.lane.b32.xlu1 %v2478_v17, %s2221_s17  ;;  %571 = vrot.lane.b32.xlu0 %v2449_v1, %s2221_s17 }
  0xd4   : > { %v2731_v10 = vstv %s2551_s30  ;;  %s4330_s30 = sld [smem:[#allocation28_spill]] }
  0xd5   : > { %v2745_v15 = vstv %s4321_s24  ;;  %s3718_s24 = sld [smem:[#allocation7 + $0x56]] }
  0xd6   : > { %577 = vrot.lane.b32.xlu1 %v2486_v19, %s2221_s17  ;;  %575 = vrot.lane.b32.xlu0 %v2490_v20, %s2221_s17  ;;  %s2563_s17 = sld [smem:[#allocation7 + $0xb]] }
  0xda   : > { %1484 = vrot.lane.b32.xlu1 %v1473_v24, %s4310_s11  ;;  %1482 = vrot.lane.b32.xlu0 %v1469_v25, %s4310_s11  ;;  %v2761_v25 = vmul.f32 %v1203_v9, %v2442_v63  ;;  %v2784_v31 = vstv %s4330_s30  ;;  %v2798_v24 = vstv %s4333_s12  ;;  %s1985_s30 = sld [smem:[#allocation7 + $0x45]] }
  0xdb   : > { %4337 = vst [vmem:[#allocation43_spill] sm:$0xff] %v2784_v31  ;;  %4341 = vst [vmem:[#allocation47_spill] sm:$0xff] %v2798_v24  ;;  %v669_v31 = vstv %s2711_s15  ;;  %s3849_s15 = sld [smem:[#allocation7 + $0x5d]] }
  0xdc   : > { %v2692_v61 = vstv %s2563_s17  ;;  %v2871_v48 = vmul.f32 %v669_v31, %v2394_v47  ;;  %s4376_s17 = smov 45   ;;  %s1990_s12 = sld [smem:[#allocation7 + $0x4a]] }
  0xde   : > { %1488 = vrot.lane.b32.xlu1 %v1481_v59, %s4310_s11  ;;  %1486 = vrot.lane.b32.xlu0 %v1477_v26, %s4310_s11  ;;  %v2764_v26 = vstv %s4324_s10  ;;  %4351 = vst [vmem:[#allocation55_spill] sm:$0xff] %v2871_v48  ;;  %s1977_s10 = sld [smem:[#allocation7 + $0x3d]] }
  0xdf   : > { %4332 = vst [vmem:[#allocation40_spill] sm:$0xff] %v2764_v26 }
  0xe2   : > { %590 = vrot.lane.b32.xlu1 %v2478_v17, %s4311_s5  ;;  %588 = vrot.lane.b32.xlu0 %v2449_v1, %s4311_s5 }
  0xe6   : > { %594 = vrot.lane.b32.xlu1 %v2486_v19, %s4311_s5  ;;  %592 = vrot.lane.b32.xlu0 %v2490_v20, %s4311_s5  ;;  %s2615_s5 = sld [smem:[#allocation7 + $0x1b]] }
  0xea   : > { %1652 = vrot.lane.b32.xlu1 %v1641_v28, %s4310_s11  ;;  %1650 = vrot.lane.b32.xlu0 %v1637_v29, %s4310_s11  ;;  %v2768_v28 = vstv %s2591_s19  ;;  %s2857_s19 = sld [smem:[#allocation7 + $0x4d]] }
  0xeb   : > { %4334 = vst [vmem:[#allocation41_spill] sm:$0xff] %v2768_v28  ;;  %v2855_v28 = vstv %s2739_s6  ;;  %s1984_s6 = sld [smem:[#allocation7 + $0x44]] }
  0xec   : > { %4316 = sst [smem:[#allocation30_spill]] %s2615_s5  ;;  %v2628_v36 = vpop.permute.xlu1 %416  ;;  %v2630_v37 = vpop.permute.xlu0 %412  ;;  %4350 = vst [vmem:[#allocation54_spill] sm:$0xff] %v2855_v28 }
  0xed   : > { %s2639_s5 = sld [smem:[#allocation7 + $0x50]] }
  0xee   : > { %1656 = vrot.lane.b32.xlu1 %v1649_v60, %s4310_s11  ;;  %1654 = vrot.lane.b32.xlu0 %v1645_v33, %s4310_s11  ;;  %s4335_s9 = sld [smem:[#allocation30_spill]]  ;;  %v2789_v33 = vstv %s2608_s28 }
  0xef   : > { %4338 = vst [vmem:[#allocation44_spill] sm:$0xff] %v2789_v33  ;;  %s2827_s28 = sld [smem:[#allocation7 + $0x3f]] }
  0xf0   : > { %v2687_v59 = vpop.permute.xlu1 %418  ;;  %v2689_v60 = vpop.permute.xlu0 %414 }
  0xf1   : > { %v421_v28 = vsel %vm420_vm2, %v2630_v37, %v2689_v60  ;;  %v423_v47 = vsel %vm420_vm2, %v2628_v36, %v2687_v59  ;;  %v422_v31 = vsel %vm420_vm2, %v2689_v60, %v2628_v36  ;;  %v4353_v37 = vrot.slane %v2613_v32, %v2392_v46 }
  0xf2   : > { %607 = vrot.lane.b32.xlu1 %v2478_v17, %s4323_s20  ;;  %605 = vrot.lane.b32.xlu0 %v2449_v1, %s4323_s20  ;;  %v2930_v35 = vsel %vm393_vm5, %v422_v31, 0.0  ;;  %v2959_v60 = vstv %s2845_s13  ;;  %s3999_s13 = sld [smem:[#allocation7 + $0x58]] }
  0xf3   : > { %v1372_v22 = vstv %s2639_s5  ;;  %4357 = vst [vmem:[#allocation59_spill] sm:$0xff] %v2930_v35  ;;  %4361 = vst [vmem:[#allocation62_spill] sm:$0xff] %v2959_v60  ;;  %v1278_v26 = vmul.f32 %v2697_v62, %v2930_v35  ;;  %s3233_s5 = sld [smem:[#allocation7 + $0x47]] }
  0xf4   : > { %v2747_v16 = vpop.permute.xlu1 %435  ;;  %v2749_v18 = vpop.permute.xlu0 %433  ;;  %v2795_v9 = vmul.f32 %v1372_v22, %v2442_v63  ;;  %v2807_v8 = vstv %s4335_s9  ;;  %v2819_v22 = vstv %s2668_s3  ;;  %s3387_s3 = sld [smem:[#allocation7 + $0x5c]] }
  0xf5   : > { %4342 = vst [vmem:[#allocation48_spill] sm:$0xff] %v2807_v8  ;;  %4345 = vst [vmem:[#allocation51_spill] sm:$0xff] %v2819_v22  ;;  %v4348_v22 = vrot.slane %v2613_v32, %v2386_v43  ;;  %v2882_v8 = vmul.f32 %v727_v30, %v2442_v63  ;;  %v442_v36 = vsel %vm4258_vm6, %v2749_v18, %v2747_v16  ;;  %v2948_v30 = vstv %s2816_s0  ;;  %s1991_s9 = sld [smem:[#allocation7 + $0x4b]]  ;;  %s2227_s0 = smov 112  }
  0xf6   : > { %611 = vrot.lane.b32.xlu1 %v2486_v19, %s4323_s20  ;;  %609 = vrot.lane.b32.xlu0 %v2490_v20, %s4323_s20  ;;  %4340 = vst [vmem:[#allocation46_spill] sm:$0xff] %v2795_v9  ;;  %4359 = vst [vmem:[#allocation60_spill] sm:$0xff] %v2948_v30  ;;  %v3001_v30 = vstv %s2900_s7  ;;  %v3029_v9 = vmul.f32 %v2714_v5, %v2930_v35  ;;  %s1976_s20 = sld [smem:[#allocation7 + $0x3c]]  ;;  %s2228_s7 = smov 96  }
  0xf7   : > { %4352 = vst [vmem:[#allocation56_spill] sm:$0xff] %v2882_v8  ;;  %v771_v8 = vmul.f32 %v2637_v40, %v2930_v35  ;;  %4364 = vst [vmem:[#allocation65_spill] sm:$0xff] %v3001_v30 }
  0xf8   : > { %v2802_v11 = vpop.permute.xlu1 %439  ;;  %v2804_v29 = vpop.permute.xlu0 %437  ;;  %4367 = vst [vmem:[#allocation68_spill] sm:$0xff] %v3029_v9  ;;  %v4369_v9 = vrot.slane %v2666_v53, %v2386_v43 }
  0xfa   : > { %886 = vrot.lane.b32.xlu1 %v4347_v27, %s4310_s11  ;;  %884 = vrot.lane.b32.xlu0 %v4348_v22, %s4310_s11  ;;  %v2852_v22 = vmul.f32 %v1709_v51, %v2442_v63  ;;  %v4354_v27 = vrot.slane %v2613_v32, %v2388_v44  ;;  %v2912_v32 = vsel %vm392_vm3, %v421_v28, 0.0  ;;  %v2926_v28 = vsel %vm394_vm4, %v423_v47, 0.0 }
  0xfb   : > { %4355 = vst [vmem:[#allocation57_spill] sm:$0xff] %v2912_v32  ;;  %4356 = vst [vmem:[#allocation58_spill] sm:$0xff] %v2926_v28  ;;  %v770_v18 = vmul.f32 %v2637_v40, %v2912_v32  ;;  %v2956_v51 = vstv %s2827_s28  ;;  %v443_v47 = vsel %vm4258_vm6, %v2747_v16, %v2804_v29  ;;  %v772_v48 = vmul.f32 %v2637_v40, %v2926_v28  ;;  %s3995_s28 = sld [smem:[#allocation7 + $0x52]] }
  0xfc   : > { %4349 = vst [vmem:[#allocation53_spill] sm:$0xff] %v2852_v22  ;;  %v2860_v42 = vpop.permute.xlu1 %456  ;;  %v2862_v7 = vpop.permute.xlu0 %454  ;;  %4360 = vst [vmem:[#allocation61_spill] sm:$0xff] %v2956_v51  ;;  %v939_v60 = vmul.f32 %v2642_v41, %v2912_v32  ;;  %v444_v16 = vsel %vm4258_vm6, %v2804_v29, %v2802_v11  ;;  %v940_v51 = vmul.f32 %v2642_v41, %v2930_v35  ;;  %vm514_vm6 = vcmp.lt.s32.totalorder %v2632_v38, 13 }
  0xfd   : > { %v941_v40 = vmul.f32 %v2642_v41, %v2926_v28  ;;  %v1109_v29 = vmul.f32 %v2654_v50, %v2930_v35  ;;  %v1110_v11 = vmul.f32 %v2654_v50, %v2926_v28  ;;  %v3005_v41 = vsel %vm4256_vm8, %v443_v47, 0.0 }
  0xfe   : > { %890 = vrot.lane.b32.xlu1 %v4353_v37, %s4310_s11  ;;  %888 = vrot.lane.b32.xlu0 %v4354_v27, %s4310_s11  ;;  %v2962_v37 = vstv %s2857_s19  ;;  %v1277_v22 = vmul.f32 %v2697_v62, %v2912_v32  ;;  %v1279_v52 = vmul.f32 %v2697_v62, %v2926_v28  ;;  %v3015_v33 = vsel %vm4255_vm9, %v444_v16, 0.0  ;;  %s4002_s19 = sld [smem:[#allocation7 + $0x53]] }
  0xff   : > { %4362 = vst [vmem:[#allocation63_spill] sm:$0xff] %v2962_v37  ;;  %v2979_v37 = vsel %vm4257_vm7, %v442_v36, 0.0  ;;  %v1108_v36 = vmul.f32 %v2654_v50, %v2912_v32  ;;  %v3025_v21 = vmul.f32 %v2714_v5, %v2912_v32  ;;  %v4368_v35 = vrot.slane %v2666_v53, %v2390_v45 }
 0x100   : > { %v2914_v27 = vpop.permute.xlu1 %460  ;;  %v2916_v63 = vpop.permute.xlu0 %458  ;;  %4363 = vst [vmem:[#allocation64_spill] sm:$0xff] %v2979_v37  ;;  %v774_v47 = vmul.f32 %v2649_v49, %v2979_v37  ;;  %v943_v62 = vmul.f32 %v2676_v55, %v2979_v37  ;;  %v1112_v16 = vmul.f32 %v2682_v57, %v2979_v37  ;;  %v1281_v24 = vmul.f32 %v2700_v0, %v2979_v37 }
 0x101   : > { %v3039_v23 = vmul.f32 %v2717_v6, %v2979_v37  ;;  %v775_v13 = vmul.f32 %v2649_v49, %v3005_v41  ;;  %v3063_v6 = vstv %s2950_s23  ;;  %v944_v43 = vmul.f32 %v2676_v55, %v3005_v41  ;;  %s4023_s23 = sld [smem:[#allocation7 + $0x5f]] }
 0x102   : > { %624 = vrot.lane.b32.xlu1 %v2478_v17, %s4358_s14  ;;  %622 = vrot.lane.b32.xlu0 %v2449_v1, %s4358_s14  ;;  %4372 = vst [vmem:[#allocation71_spill] sm:$0xff] %v3063_v6  ;;  %v1113_v6 = vmul.f32 %v2682_v57, %v3005_v41  ;;  %vm494_vm9 = vcmp.lt.s32.totalorder %v2634_v39, 14  ;;  %vm495_vm8 = vcmp.lt.s32.totalorder %v2623_v34, 14  ;;  %vm474_vm7 = vcmp.lt.s32.totalorder %v2623_v34, 15 }
 0x103   : > { %v4418_v34 = vstv %s2580_s2 }
 0x104   : > { %v2967_v31 = vpop.permute.xlu1 %477  ;;  %v2969_v59 = vpop.permute.xlu0 %475 }
 0x106   : > { %628 = vrot.lane.b32.xlu1 %v2486_v19, %s4358_s14  ;;  %626 = vrot.lane.b32.xlu0 %v2490_v20, %s4358_s14  ;;  %s4019_s14 = sld [smem:[#allocation7 + $0x59]] }
 0x108   : > { %v3017_v50 = vpop.permute.xlu1 %481  ;;  %v3019_v30 = vpop.permute.xlu0 %479 }
 0x109   : > { %4365 = vst [vmem:[#allocation66_spill] sm:$0xff] %v3017_v50  ;;  %4366 = vst [vmem:[#allocation67_spill] sm:$0xff] %v3019_v30  ;;  %v3054_v50 = vmul.f32 %v2714_v5, %v2926_v28  ;;  %v3058_v30 = vmul.f32 %v2742_v14, %v2912_v32  ;;  %v945_v5 = vmul.f32 %v2676_v55, %v3015_v33 }
 0x10a   : > { %1055 = vrot.lane.b32.xlu1 %v4368_v35, %s4310_s11  ;;  %1053 = vrot.lane.b32.xlu0 %v4369_v9, %s4310_s11  ;;  %v463_v35 = vsel %vm4254_vm10, %v2862_v7, %v2860_v42  ;;  %v776_v9 = vmul.f32 %v2649_v49, %v3015_v33  ;;  %v777_v14 = vadd.f32 %v774_v47, %v770_v18 }
 0x10b   : > { %4370 = vst [vmem:[#allocation69_spill] sm:$0xff] %v3054_v50  ;;  %4371 = vst [vmem:[#allocation70_spill] sm:$0xff] %v3058_v30  ;;  %v1114_v7 = vmul.f32 %v2682_v57, %v3015_v33  ;;  %v3084_v49 = vmul.f32 %v2745_v15, %v2979_v37  ;;  %v464_v50 = vsel %vm4254_vm10, %v2860_v42, %v2916_v63  ;;  %v3094_v47 = vsel %vm4251_vm11, %v463_v35, 0.0 }
 0x10c   : > { %v3074_v28 = vpop.permute.xlu1 %498  ;;  %v3076_v32 = vpop.permute.xlu0 %496  ;;  %v465_v55 = vsel %vm4254_vm10, %v2916_v63, %v2914_v27  ;;  %v946_v30 = vadd.f32 %v943_v62, %v939_v60  ;;  %v1115_v18 = vadd.f32 %v1112_v16, %v1108_v36  ;;  %v4373_v57 = vrot.slane %v2666_v53, %v2392_v46 }
 0x10d   : > { %v4374_v37 = vrot.slane %v2666_v53, %v2388_v44  ;;  %v1284_v42 = vadd.f32 %v1281_v24, %v1277_v22  ;;  %v1282_v63 = vmul.f32 %v2700_v0, %v3005_v41  ;;  %v1283_v60 = vmul.f32 %v2700_v0, %v3015_v33 }
 0x10e   : > { %1059 = vrot.lane.b32.xlu1 %v4373_v57, %s4310_s11  ;;  %v778_v27 = vadd.f32 %v775_v13, %v771_v8  ;;  %v779_v36 = vadd.f32 %v776_v9, %v772_v48  ;;  %v947_v62 = vadd.f32 %v944_v43, %v940_v51  ;;  %v948_v16 = vadd.f32 %v945_v5, %v941_v40 }
 0x10f   : > { %1057 = vrot.lane.b32.xlu0 %v4374_v37, %s4310_s11  ;;  %v3114_v53 = vsel %vm4253_vm12, %v464_v50, 0.0  ;;  %v3118_v24 = vsel %vm4252_vm13, %v465_v55, 0.0  ;;  %vm525_vm11 = vcmask 367616   ;;  %v1116_v37 = vadd.f32 %v1113_v6, %v1109_v29 }
 0x110   : > { %4375 = vst [vmem:[#allocation72_spill] sm:$0xff] %v3118_v24  ;;  %v3120_v0 = vpop.permute.xlu1 %502  ;;  %v3122_v22 = vpop.permute.xlu0 %500  ;;  %v1117_v35 = vadd.f32 %v1114_v7, %v1110_v11  ;;  %v781_v43 = vmul.f32 %v2671_v54, %v3094_v47  ;;  %v950_v48 = vmul.f32 %v2679_v56, %v3094_v47  ;;  %v1119_v8 = vmul.f32 %v2685_v58, %v3094_v47 }
 0x111   : > { %v1288_v13 = vmul.f32 %v2703_v2, %v3094_v47  ;;  %v484_v51 = vsel %vm483_vm14, %v2969_v59, %v2967_v31  ;;  %vm504_vm13 = vcmask 375808   ;;  %v1285_v6 = vadd.f32 %v1282_v63, %v1278_v26 }
 0x112   : > { %641 = vrot.lane.b32.xlu1 %v2478_v17, %s4376_s17  ;;  %v1286_v40 = vadd.f32 %v1283_v60, %v1279_v52  ;;  %v3140_v29 = vstv %s3060_s25  ;;  %v782_v11 = vmul.f32 %v2671_v54, %v3114_v53  ;;  %v783_v50 = vmul.f32 %v2671_v54, %v3118_v24  ;;  %s2229_s25 = smov 80  }
 0x113   : > { %639 = vrot.lane.b32.xlu0 %v2449_v1, %s4376_s17  ;;  %4377 = vst [vmem:[#allocation73_spill] sm:$0xff] %v3140_v29  ;;  %v951_v59 = vmul.f32 %v2679_v56, %v3114_v53  ;;  %v952_v9 = vmul.f32 %v2679_v56, %v3118_v24  ;;  %vm473_vm12 = vcmp.lt.s32.totalorder %v2634_v39, 15  ;;  %v1120_v52 = vmul.f32 %v2685_v58, %v3114_v53  ;;  %v4419_v39 = vld [vmem:[#allocation64_spill] sm:$0xff] }
 0x114   : > { %v520_v17 = vpop.permute.xlu1 %519  ;;  %v518_v1 = vpop.permute.xlu0 %517  ;;  %v1121_v26 = vmul.f32 %v2685_v58, %v3118_v24  ;;  %v1453_v5 = vadd.f32 %v3039_v23, %v3025_v21  ;;  %v1457_v54 = vmul.f32 %v2731_v10, %v3094_v47  ;;  %v3161_v56 = vsel %vm4259_vm15, %v484_v51, 0.0 }
 0x115   : > { %4378 = vst [vmem:[#allocation74_spill] sm:$0xff] %v3161_v56  ;;  %vm493_vm10 = vcmp.lt.s32.totalorder %v2632_v38, 14  ;;  %v3166_v7 = vadd.f32 %v781_v43, %v777_v14  ;;  %v3168_v58 = vadd.f32 %v950_v48, %v946_v30  ;;  %v3170_v55 = vadd.f32 %v1119_v8, %v1115_v18 }
 0x116   : > { %645 = vrot.lane.b32.xlu1 %v2486_v19, %s4376_s17  ;;  %vm690_vm15 = vcmask 392192   ;;  %v3178_v21 = vadd.f32 %v1288_v13, %v1284_v42  ;;  %v1289_v14 = vmul.f32 %v2703_v2, %v3114_v53  ;;  %v1290_v23 = vmul.f32 %v2703_v2, %v3118_v24  ;;  %v4386_v13 = vld [vmem:[#allocation23_spill] sm:$0xff] }
 0x117   : > { %643 = vrot.lane.b32.xlu0 %v2490_v20, %s4376_s17  ;;  %v3185_v30 = vstv %s3108_s27  ;;  %v785_v18 = vadd.f32 %v782_v11, %v778_v27  ;;  %v3187_v57 = vadd.f32 %v783_v50, %v779_v36  ;;  %v3189_v63 = vadd.f32 %v951_v59, %v947_v62  ;;  %v4388_v11 = vld [vmem:[#allocation34_spill] sm:$0xff]  ;;  %s4027_s27 = sld [smem:[#allocation7 + $0x5a]] }
 0x118   : > { %4379 = vst [vmem:[#allocation75_spill] sm:$0xff] %v3178_v21  ;;  %4380 = vst [vmem:[#allocation76_spill] sm:$0xff] %v3185_v30  ;;  %v3191_v19 = vadd.f32 %v952_v9, %v948_v16  ;;  %v524_v60 = vpop.permute.xlu1 %523  ;;  %v522_v20 = vpop.permute.xlu0 %521  ;;  %v824_v42 = vmul.f32 %v2692_v61, %v3161_v56  ;;  %v3197_v43 = vmul.f32 %v2706_v3, %v3161_v56  ;;  %v4389_v9 = vld [vmem:[#allocation67_spill] sm:$0xff]  ;;  %v4421_v38 = vstv %s2800_s29  ;;  %s4038_s17 = sld [smem:[#allocation7 + $0x60]] }
 0x119   : > { %v3199_v48 = vadd.f32 %v1120_v52, %v1116_v37  ;;  %v3201_v2 = vadd.f32 %v1121_v26, %v1117_v35  ;;  %v527_v27 = vsel %vm525_vm11, %v520_v17, %v522_v20  ;;  %v528_v36 = vsel %vm525_vm11, %v522_v20, %v524_v60 }
 0x11a   : > { %v3207_v62 = vmul.f32 %v2709_v4, %v3161_v56  ;;  %v3211_v16 = vmul.f32 %v2734_v12, %v3161_v56  ;;  %v3215_v8 = vsel %vm515_vm0, %v527_v27, 0.0  ;;  %v3219_v37 = vsel %vm516_vm1, %v528_v36, 0.0  ;;  %v4393_v27 = vld [vmem:[#allocation66_spill] sm:$0xff] }
 0x11b   : > { %4381 = vst [vmem:[#allocation77_spill] sm:$0xff] %v3201_v2  ;;  %4384 = vst [vmem:[#allocation80_spill] sm:$0xff] %v3219_v37  ;;  %v4385_v35 = vrot.slane %v2761_v25, %v2390_v45  ;;  %v4387_v51 = vrot.slane %v2761_v25, %v4386_v13  ;;  %v1451_v50 = vmul.f32 %v4388_v11, %v3005_v41  ;;  %v4420_v2 = vstv %s2786_s16 }
 0x11c   : > { %4382 = vst [vmem:[#allocation78_spill] sm:$0xff] %v3207_v62  ;;  %4383 = vst [vmem:[#allocation79_spill] sm:$0xff] %v3211_v16  ;;  %v1452_v59 = vmul.f32 %v4388_v11, %v3015_v33  ;;  %v485_v52 = vsel %vm483_vm14, %v2967_v31, %v4389_v9  ;;  %v3238_v26 = vadd.f32 %v1289_v14, %v1285_v6  ;;  %v4395_v11 = vld [vmem:[#allocation36_spill] sm:$0xff]  ;;  %v4397_v14 = vld [vmem:[#allocation70_spill] sm:$0xff] }
 0x11d   : > { %1224 = vrot.lane.b32.xlu1 %v4385_v35, %s4310_s11  ;;  %1222 = vrot.lane.b32.xlu0 %v4387_v51, %s4310_s11  ;;  %v3240_v60 = vadd.f32 %v1290_v23, %v1286_v40  ;;  %v3242_v20 = vadd.f32 %v1457_v54, %v1453_v5  ;;  %v486_v36 = vsel %vm483_vm14, %v4389_v9, %v4393_v27  ;;  %v807_v35 = vpop.permute.xlu1 %806  ;;  %v3247_v51 = vpop.permute.xlu0 %554 }
 0x11e   : > { %4390 = vst [vmem:[#allocation34_spill] sm:$0xff] %v3238_v26  ;;  %4394 = vst [vmem:[#allocation66_spill] sm:$0xff] %v3247_v51  ;;  %v3251_v30 = vmul.f32 %v4395_v11, %v3161_v56  ;;  %v3255_v31 = vmul.f32 %v2731_v10, %v3114_v53  ;;  %v3259_v6 = vmul.f32 %v2731_v10, %v3118_v24  ;;  %v4417_v24 = vld [vmem:[#allocation57_spill] sm:$0xff] }
 0x11f   : > { %4391 = vst [vmem:[#allocation67_spill] sm:$0xff] %v3240_v60  ;;  %4392 = vst [vmem:[#allocation81_spill] sm:$0xff] %v3242_v20  ;;  %v505_v40 = vsel %vm504_vm13, %v3076_v32, %v3074_v28  ;;  %v506_v5 = vsel %vm504_vm13, %v3074_v28, %v3122_v22  ;;  %v507_v54 = vsel %vm504_vm13, %v3122_v22, %v3120_v0  ;;  %v4400_v28 = vld [vmem:[#allocation68_spill] sm:$0xff]  ;;  %v4401_v0 = vld [vmem:[#allocation69_spill] sm:$0xff] }
 0x120   : > { %4396 = vst [vmem:[#allocation82_spill] sm:$0xff] %v3251_v30  ;;  %v3272_v23 = vadd.f32 %v3084_v49, %v4397_v14  ;;  %v526_v9 = vsel %vm525_vm11, %v518_v1, %v520_v17  ;;  %v4398_v10 = vrot.slane %v2761_v25, %v2392_v46  ;;  %v4399_v32 = vrot.slane %v2761_v25, %v2388_v44  ;;  %v4402_v17 = vld [vmem:[#allocation39_spill] sm:$0xff]  ;;  %v4411_v20 = vld [vmem:[#allocation46_spill] sm:$0xff] }
 0x121   : > { %v3284_v27 = vadd.f32 %v1451_v50, %v4400_v28  ;;  %v3287_v22 = vadd.f32 %v1452_v59, %v4401_v0  ;;  %v3291_v49 = vsel %vm473_vm12, %v485_v52, 0.0  ;;  %v3297_v1 = vmul.f32 %v4402_v17, %v3094_v47  ;;  %v4403_v14 = vld [vmem:[#allocation47_spill] sm:$0xff]  ;;  %v4406_v50 = vld [vmem:[#allocation37_spill] sm:$0xff]  ;;  %v4407_v59 = vld [vmem:[#allocation58_spill] sm:$0xff] }
 0x122   : > { %1228 = vrot.lane.b32.xlu1 %v4398_v10, %s4310_s11  ;;  %1226 = vrot.lane.b32.xlu0 %v4399_v32, %s4310_s11  ;;  %v3301_v25 = vmul.f32 %v4403_v14, %v3161_v56  ;;  %v4405_v10 = vld [vmem:[#allocation59_spill] sm:$0xff]  ;;  %v3309_v28 = vmul.f32 %v4406_v50, %v4407_v59  ;;  %v3313_v52 = vsel %vm493_vm10, %v505_v40, 0.0  ;;  %v3317_v0 = vsel %vm494_vm9, %v506_v5, 0.0  ;;  %v809_v14 = vpop.permute.xlu0 %808 }
 0x123   : > { %v3305_v32 = vmul.f32 %v4406_v50, %v4405_v10  ;;  %4408 = vst [vmem:[#allocation68_spill] sm:$0xff] %v3313_v52  ;;  %v3321_v56 = vsel %vm495_vm8, %v507_v54, 0.0  ;;  %v3325_v30 = vsel %vm474_vm7, %v486_v36, 0.0  ;;  %v3329_v50 = vsel %vm514_vm6, %v526_v9, 0.0 }
 0x124   : > { %4404 = vst [vmem:[#allocation70_spill] sm:$0xff] %v3301_v25  ;;  %4409 = vst [vmem:[#allocation69_spill] sm:$0xff] %v3321_v56  ;;  %v811_v25 = vpop.permute.xlu1 %810  ;;  %v814_v40 = vsel %vm690_vm15, %v807_v35, %v809_v14  ;;  %v3335_v5 = vmul.f32 %v2745_v15, %v3005_v41  ;;  %v4412_v36 = vrot.slane %v4411_v20, %v2390_v45 }
 0x125   : > { %4410 = vst [vmem:[#allocation39_spill] sm:$0xff] %v3329_v50  ;;  %v815_v59 = vsel %vm690_vm15, %v809_v14, %v811_v25  ;;  %v820_v54 = vadd.f32 %v814_v40, %v3166_v7  ;;  %v4413_v9 = vrot.slane %v4411_v20, %v4386_v13  ;;  %v825_v35 = vmul.f32 %v2692_v61, %v3291_v49  ;;  %v4415_v7 = vld [vmem:[#allocation38_spill] sm:$0xff] }
 0x126   : > { %v821_v11 = vadd.f32 %v815_v59, %v785_v18  ;;  %1393 = vrot.lane.b32.xlu1 %v4412_v36, %s4310_s11  ;;  %v3349_v14 = vstv %s3233_s5  ;;  %v831_v18 = vmul.f32 %v4415_v7, %v3313_v52  ;;  %v832_v40 = vmul.f32 %v4415_v7, %v3317_v0  ;;  %v813_v26 = vpop.permute.xlu0 %812  ;;  %s4045_s5 = sld [smem:[#allocation7 + $0x61]] }
 0x127   : > { %1391 = vrot.lane.b32.xlu0 %v4413_v9, %s4310_s11  ;;  %4414 = vst [vmem:[#allocation59_spill] sm:$0xff] %v3349_v14  ;;  %v833_v59 = vmul.f32 %v4415_v7, %v3321_v56  ;;  %v826_v36 = vmul.f32 %v2692_v61, %v3325_v30  ;;  %v4416_v9 = vld [vmem:[#allocation44_spill] sm:$0xff]  ;;  %v827_v60 = vadd.f32 %v824_v42, %v820_v54  ;;  %v4425_v54 = vstv %s2786_s16  ;;  %s3976_s16 = sld [smem:[#allocation7 + $0x4c]] }
 0x128   : > { %v838_v29 = vmul.f32 %v4416_v9, %v3329_v50  ;;  %v976_v14 = vpop.permute.xlu1 %975  ;;  %v828_v12 = vadd.f32 %v825_v35, %v821_v11  ;;  %v839_v16 = vmul.f32 %v4416_v9, %v3215_v8  ;;  %v816_v21 = vsel %vm690_vm15, %v811_v25, %v813_v26 }
 0x129   : > { %v657_v7 = vmul.f32 %v4418_v34, %v4417_v24  ;;  %v660_v61 = vmul.f32 %v4420_v2, %v4419_v39  ;;  %v665_v51 = vmul.f32 %v4421_v38, %v3094_v47  ;;  %v834_v62 = vadd.f32 %v831_v18, %v827_v60 }
 0x12a   : > { %v822_v42 = vadd.f32 %v816_v21, %v3187_v57  ;;  %v4422_v11 = vrot.slane %v4411_v20, %v2392_v46  ;;  %v4423_v26 = vrot.slane %v4411_v20, %v2388_v44  ;;  %v835_v34 = vadd.f32 %v832_v40, %v828_v12  ;;  %v978_v12 = vpop.permute.xlu0 %977 }
 0x12b   : > { %v3385_v39 = vstv %s3293_s8  ;;  %v840_v38 = vmul.f32 %v4416_v9, %v3219_v37  ;;  %v994_v47 = vmul.f32 %v2706_v3, %v3291_v49  ;;  %v662_v24 = vadd.f32 %v660_v61, %v657_v7  ;;  %v4431_v61 = vld [vmem:[#allocation40_spill] sm:$0xff]  ;;  %s2230_s8 = smov 64  }
 0x12c   : > { %1397 = vrot.lane.b32.xlu1 %v4422_v11, %s4310_s11  ;;  %1395 = vrot.lane.b32.xlu0 %v4423_v26, %s4310_s11  ;;  %v4424_v21 = vstv %s2580_s2  ;;  %v3396_v2 = vadd.f32 %v838_v29, %v834_v62  ;;  %v980_v60 = vpop.permute.xlu1 %979  ;;  %v829_v20 = vadd.f32 %v826_v36, %v822_v42  ;;  %v3398_v25 = vadd.f32 %v839_v16, %v835_v34  ;;  %v4428_v36 = vld [vmem:[#allocation50_spill] sm:$0xff]  ;;  %s3420_s2 = sld [smem:[#allocation7 + $0x3a]] }
 0x12d   : > { %v658_v57 = vmul.f32 %v4424_v21, %v4405_v10  ;;  %v661_v35 = vmul.f32 %v4425_v54, %v3005_v41  ;;  %v983_v18 = vsel %vm690_vm15, %v976_v14, %v978_v12  ;;  %v984_v40 = vsel %vm690_vm15, %v978_v12, %v980_v60 }
 0x12e   : > { %v3405_v9 = vadd.f32 %v665_v51, %v662_v24  ;;  %v4427_v7 = vstv %s2800_s29  ;;  %v989_v29 = vadd.f32 %v983_v18, %v3168_v58  ;;  %v990_v62 = vadd.f32 %v984_v40, %v3189_v63  ;;  %v982_v24 = vpop.permute.xlu0 %981  ;;  %s3978_s29 = sld [smem:[#allocation7 + $0x51]] }
 0x12f   : > { %v666_v10 = vmul.f32 %v4427_v7, %v3114_v53  ;;  %v4429_v16 = vrot.slane %v4428_v36, %v2390_v45  ;;  %v4430_v41 = vrot.slane %v4428_v36, %v4386_v13  ;;  %v836_v51 = vadd.f32 %v833_v59, %v829_v20  ;;  %v4432_v20 = vld [vmem:[#allocation45_spill] sm:$0xff] }
 0x130   : > { %4426 = vst [vmem:[#allocation37_spill] sm:$0xff] %v3405_v9  ;;  %v3423_v14 = vstv %s3351_s1  ;;  %v1000_v58 = vmul.f32 %v4431_v61, %v3313_v52  ;;  %v1001_v63 = vmul.f32 %v4431_v61, %v3317_v0  ;;  %v1620_v42 = vmul.f32 %v2745_v15, %v3015_v33  ;;  %v1145_v34 = vpop.permute.xlu1 %1144  ;;  %s4059_s1 = sld [smem:[#allocation7 + $0x4]] }
 0x131   : > { %1562 = vrot.lane.b32.xlu1 %v4429_v16, %s4310_s11  ;;  %1560 = vrot.lane.b32.xlu0 %v4430_v41, %s4310_s11  ;;  %v663_v11 = vadd.f32 %v661_v35, %v658_v57  ;;  %v996_v26 = vadd.f32 %v3197_v43, %v989_v29  ;;  %v995_v59 = vmul.f32 %v2706_v3, %v3325_v30  ;;  %v4437_v16 = vld [vmem:[#allocation53_spill] sm:$0xff] }
 0x132   : > { %v3434_v21 = vadd.f32 %v840_v38, %v836_v51  ;;  %v997_v12 = vadd.f32 %v994_v47, %v990_v62  ;;  %v1007_v54 = vmul.f32 %v4432_v20, %v3329_v50  ;;  %v985_v18 = vsel %vm690_vm15, %v980_v60, %v982_v24 }
 0x133   : > { %v1008_v15 = vmul.f32 %v4432_v20, %v3215_v8  ;;  %v3441_v33 = vadd.f32 %v666_v10, %v663_v11  ;;  %v1003_v57 = vadd.f32 %v1000_v58, %v996_v26  ;;  %v991_v43 = vadd.f32 %v985_v18, %v3191_v19 }
 0x134   : > { %v4434_v3 = vrot.slane %v4428_v36, %v2392_v46  ;;  %v4435_v38 = vrot.slane %v4428_v36, %v2388_v44  ;;  %v1004_v47 = vadd.f32 %v1001_v63, %v997_v12  ;;  %v3453_v60 = vstv %s3387_s3  ;;  %v1149_v62 = vpop.permute.xlu1 %1148  ;;  %v4440_v63 = vld [vmem:[#allocation41_spill] sm:$0xff]  ;;  %s4063_s3 = sld [smem:[#allocation7 + $0x5]] }
 0x135   : > { %4433 = vst [vmem:[#allocation58_spill] sm:$0xff] %v3441_v33  ;;  %4436 = vst [vmem:[#allocation46_spill] sm:$0xff] %v3453_v60  ;;  %v3457_v35 = vadd.f32 %v3255_v31, %v3284_v27  ;;  %v3461_v19 = vadd.f32 %v3259_v6, %v3287_v22  ;;  %v3465_v40 = vadd.f32 %v3297_v1, %v3272_v23  ;;  %v1147_v31 = vpop.permute.xlu0 %1146 }
 0x136   : > { %1566 = vrot.lane.b32.xlu1 %v4434_v3, %s4310_s11  ;;  %1564 = vrot.lane.b32.xlu0 %v4435_v38, %s4310_s11  ;;  %v3469_v7 = vadd.f32 %v3335_v5, %v3305_v32  ;;  %v1002_v10 = vmul.f32 %v4431_v61, %v3321_v56  ;;  %v1010_v29 = vadd.f32 %v1007_v54, %v1003_v57  ;;  %v3492_v61 = vstv %s3420_s2  ;;  %v4444_v38 = vld [vmem:[#allocation32_spill] sm:$0xff]  ;;  %s4069_s2 = sld [smem:[#allocation7 + $0x6]] }
 0x137   : > { %v998_v27 = vadd.f32 %v995_v59, %v991_v43  ;;  %v3473_v36 = vadd.f32 %v1008_v15, %v1004_v47  ;;  %v1009_v6 = vmul.f32 %v4432_v20, %v3219_v37  ;;  %v1152_v23 = vsel %vm690_vm15, %v1145_v34, %v1147_v31  ;;  %v4441_v34 = vld [vmem:[#allocation78_spill] sm:$0xff]  ;;  %v4442_v15 = vld [vmem:[#allocation48_spill] sm:$0xff] }
 0x138   : > { %v1153_v22 = vsel %vm690_vm15, %v1147_v31, %v1149_v62  ;;  %v1163_v1 = vmul.f32 %v2709_v4, %v3291_v49  ;;  %v1158_v32 = vadd.f32 %v1152_v23, %v3170_v55  ;;  %v4438_v41 = vrot.slane %v4437_v16, %v2390_v45  ;;  %v557_v59 = vpop.permute.xlu1 %556  ;;  %v4443_v43 = vld [vmem:[#allocation66_spill] sm:$0xff]  ;;  %v4448_v23 = vld [vmem:[#allocation60_spill] sm:$0xff] }
 0x139   : > { %v1159_v5 = vadd.f32 %v1153_v22, %v3199_v48  ;;  %v4439_v51 = vrot.slane %v4437_v16, %v4386_v13  ;;  %v1005_v58 = vadd.f32 %v1002_v10, %v998_v27  ;;  %v1169_v11 = vmul.f32 %v4440_v63, %v3313_v52  ;;  %v1151_v12 = vpop.permute.xlu0 %1150  ;;  %v4445_v10 = vld [vmem:[#allocation77_spill] sm:$0xff] }
 0x13a   : > { %1730 = vrot.lane.b32.xlu1 %v4438_v41, %s4310_s11  ;;  %v1170_v55 = vmul.f32 %v4440_v63, %v3317_v0  ;;  %v3499_v48 = vadd.f32 %v1620_v42, %v3309_v28  ;;  %v3503_v26 = vmul.f32 %v4402_v17, %v3114_v53  ;;  %v1165_v24 = vadd.f32 %v4441_v34, %v1158_v32 }
 0x13b   : > { %1728 = vrot.lane.b32.xlu0 %v4439_v51, %s4310_s11  ;;  %v1164_v20 = vmul.f32 %v2709_v4, %v3325_v30  ;;  %v1012_v54 = vadd.f32 %v1009_v6, %v1005_v58  ;;  %v1166_v18 = vadd.f32 %v1163_v1, %v1159_v5  ;;  %v1176_v57 = vmul.f32 %v4442_v15, %v3329_v50  ;;  %v4449_v1 = vld [vmem:[#allocation61_spill] sm:$0xff] }
 0x13c   : > { %v562_v28 = vsel %vm420_vm2, %v4443_v43, %v557_v59  ;;  %v1154_v42 = vsel %vm690_vm15, %v1149_v62, %v1151_v12  ;;  %v1177_v53 = vmul.f32 %v4442_v15, %v3215_v8  ;;  %v1172_v3 = vadd.f32 %v1169_v11, %v1165_v24  ;;  %v561_v51 = vpop.permute.xlu1 %560 }
 0x13d   : > { %v3517_v47 = vsel %vm392_vm3, %v562_v28, 0.0  ;;  %v1160_v4 = vadd.f32 %v1154_v42, %v4445_v10  ;;  %v4446_v31 = vrot.slane %v4437_v16, %v2392_v46  ;;  %v4447_v27 = vrot.slane %v4437_v16, %v2388_v44  ;;  %v4450_v46 = vld [vmem:[#allocation62_spill] sm:$0xff]  ;;  %v559_v58 = vpop.permute.xlu0 %558  ;;  %v4452_v28 = vld [vmem:[#allocation31_spill] sm:$0xff] }
 0x13e   : > { %v1173_v62 = vadd.f32 %v1170_v55, %v1166_v18  ;;  %v1171_v6 = vmul.f32 %v4440_v63, %v3321_v56  ;;  %v845_v22 = vmul.f32 %v4448_v23, %v3517_v47  ;;  %v1014_v32 = vmul.f32 %v4449_v1, %v3517_v47  ;;  %v4451_v18 = vld [vmem:[#allocation33_spill] sm:$0xff] }
 0x13f   : > { %1734 = vrot.lane.b32.xlu1 %v4446_v31, %s4310_s11  ;;  %1732 = vrot.lane.b32.xlu0 %v4447_v27, %s4310_s11  ;;  %v1183_v5 = vmul.f32 %v4450_v46, %v3517_v47  ;;  %v1178_v41 = vmul.f32 %v4442_v15, %v3219_v37  ;;  %v1179_v16 = vadd.f32 %v1176_v57, %v1172_v3  ;;  %v4456_v27 = vld [vmem:[#allocation72_spill] sm:$0xff]  ;;  %vm4474_vm3 = vcmp.ge.s32.totalorder %v4444_v38, 2 }
 0x140   : > { %v1167_v11 = vadd.f32 %v1164_v20, %v1160_v4  ;;  %v1180_v55 = vadd.f32 %v1177_v53, %v1173_v62  ;;  %v563_v34 = vsel %vm420_vm2, %v557_v59, %v559_v58  ;;  %v564_v63 = vsel %vm420_vm2, %v559_v58, %v561_v51  ;;  %v4453_v20 = vld [vmem:[#allocation55_spill] sm:$0xff]  ;;  %v1316_v4 = vpop.permute.xlu1 %1315 }
 0x141   : > { %v3543_v24 = vadd.f32 %v845_v22, %v3396_v2  ;;  %v3545_v12 = vadd.f32 %v1014_v32, %v1010_v29  ;;  %v3549_v43 = vsel %vm393_vm5, %v563_v34, 0.0  ;;  %v3553_v15 = vsel %vm394_vm4, %v564_v63, 0.0  ;;  %v1314_v31 = vpop.permute.xlu0 %1313  ;;  %v4457_v51 = vld [vmem:[#allocation75_spill] sm:$0xff] }
 0x142   : > { %v4454_v57 = vrot.slane %v4453_v20, %v2390_v45  ;;  %v4455_v2 = vrot.slane %v4453_v20, %v4386_v13  ;;  %v3565_v29 = vadd.f32 %v1183_v5, %v1179_v16  ;;  %v1174_v59 = vadd.f32 %v1171_v6, %v1167_v11  ;;  %v4462_v63 = vld [vmem:[#allocation43_spill] sm:$0xff] }
 0x143   : > { %v846_v42 = vmul.f32 %v4448_v23, %v3549_v43  ;;  %v847_v53 = vmul.f32 %v4448_v23, %v3553_v15  ;;  %v1015_v3 = vmul.f32 %v4449_v1, %v3549_v43  ;;  %v1016_v10 = vmul.f32 %v4449_v1, %v3553_v15 }
 0x144   : > { %686 = vrot.lane.b32.xlu1 %v4454_v57, %s4310_s11  ;;  %684 = vrot.lane.b32.xlu0 %v4455_v2, %s4310_s11  ;;  %v1627_v62 = vmul.f32 %v4402_v17, %v4456_v27  ;;  %v1181_v22 = vadd.f32 %v1178_v41, %v1174_v59  ;;  %v1184_v6 = vmul.f32 %v4450_v46, %v3549_v43  ;;  %vm4472_vm2 = vcmask 408576  }
 0x145   : > { %v1185_v32 = vmul.f32 %v4450_v46, %v3553_v15  ;;  %v1321_v23 = vsel %vm690_vm15, %v1314_v31, %v1316_v4  ;;  %v3583_v5 = vadd.f32 %v846_v42, %v3398_v25  ;;  %v3586_v16 = vadd.f32 %v847_v53, %v3434_v21  ;;  %v4459_v46 = vld [vmem:[#allocation56_spill] sm:$0xff]  ;;  %v4464_v42 = vld [vmem:[#allocation49_spill] sm:$0xff]  ;;  %v4465_v53 = vld [vmem:[#allocation79_spill] sm:$0xff] }
 0x146   : > { %v3589_v1 = vadd.f32 %v1015_v3, %v3473_v36  ;;  %v1327_v17 = vadd.f32 %v1321_v23, %v4457_v51  ;;  %v4458_v41 = vrot.slane %v4453_v20, %v2388_v44  ;;  %v4460_v58 = vrot.slane %v4459_v46, %v4386_v13  ;;  %v4461_v36 = vld [vmem:[#allocation42_spill] sm:$0xff]  ;;  %v1320_v3 = vpop.permute.xlu1 %1319  ;;  %vm4478_vm4 = vmmov %vm4472_vm2 }
 0x147   : > { %v3601_v25 = vstv %s3528_s4  ;;  %v3603_v11 = vadd.f32 %v1016_v10, %v1012_v54  ;;  %v3605_v21 = vadd.f32 %v1184_v6, %v1180_v55  ;;  %v1338_v34 = vmul.f32 %v4461_v36, %v3313_v52  ;;  %v4463_v20 = vld [vmem:[#allocation54_spill] sm:$0xff]  ;;  %v1318_v10 = vpop.permute.xlu0 %1317  ;;  %vm4479_vm5 = vmmov %vm4472_vm2  ;;  %s4081_s4 = sld [smem:[#allocation7 + $0x31]] }
 0x148   : > { %688 = vrot.lane.b32.xlu0 %v4458_v41, %s4310_s11  ;;  %742 = vrot.lane.b32.xlu1 %v4460_v58, %s4310_s11  ;;  %v3611_v57 = vmul.f32 %v4462_v63, %v3313_v52  ;;  %v3615_v2 = vmul.f32 %v4463_v20, %v3313_v52  ;;  %v3617_v59 = vadd.f32 %v1185_v32, %v1181_v22  ;;  %v4466_v32 = vld [vmem:[#allocation35_spill] sm:$0xff]  ;;  %v4467_v41 = vld [vmem:[#allocation34_spill] sm:$0xff] }
 0x149   : > { %v1345_v54 = vmul.f32 %v4464_v42, %v3329_v50  ;;  %v1334_v55 = vadd.f32 %v4465_v53, %v1327_v17  ;;  %v3624_v31 = vadd.f32 %v3503_v26, %v3469_v7  ;;  %v3627_v27 = vadd.f32 %v1627_v62, %v3499_v48  ;;  %v4468_v53 = vld [vmem:[#allocation67_spill] sm:$0xff] }
 0x14a   : > { %v1322_v6 = vsel %vm690_vm15, %v1316_v4, %v1318_v10  ;;  %v1323_v22 = vsel %vm690_vm15, %v1318_v10, %v1320_v3  ;;  %v1333_v23 = vmul.f32 %v4466_v32, %v3325_v30  ;;  %v1332_v51 = vmul.f32 %v4466_v32, %v3291_v49  ;;  %v574_v3 = vpop.permute.xlu1 %573 }
 0x14b   : > { %v1341_v17 = vadd.f32 %v1338_v34, %v1334_v55  ;;  %v1328_v58 = vadd.f32 %v1322_v6, %v4467_v41  ;;  %v1329_v13 = vadd.f32 %v1323_v22, %v4468_v53  ;;  %v4469_v7 = vrot.slane %v4459_v46, %v2390_v45  ;;  %v4473_v41 = vld [vmem:[#allocation51_spill] sm:$0xff] }
 0x14c   : > { %v4470_v48 = vrot.slane %v4459_v46, %v2388_v44  ;;  %v3646_v26 = vstv %s3563_s26  ;;  %v1339_v4 = vmul.f32 %v4461_v36, %v3317_v0  ;;  %v1340_v62 = vmul.f32 %v4461_v36, %v3321_v56  ;;  %v572_v44 = vpop.permute.xlu0 %571  ;;  %v4471_v46 = vld [vmem:[#allocation63_spill] sm:$0xff]  ;;  %s4090_s26 = sld [smem:[#allocation7 + $0x32]] }
 0x14d   : > { %744 = vrot.lane.b32.xlu0 %v4469_v7, %s4310_s11  ;;  %v3654_v34 = vmul.f32 %v4462_v63, %v3317_v0  ;;  %v3658_v45 = vmul.f32 %v4462_v63, %v3321_v56  ;;  %v1348_v55 = vadd.f32 %v1345_v54, %v1341_v17  ;;  %v1352_v10 = vmul.f32 %v4471_v46, %v3517_v47 }
 0x14e   : > { %746 = vrot.lane.b32.xlu1 %v4470_v48, %s4310_s11  ;;  %v1335_v6 = vadd.f32 %v1332_v51, %v1328_v58  ;;  %v1336_v22 = vadd.f32 %v1333_v23, %v1329_v13  ;;  %v1347_v32 = vmul.f32 %v4464_v42, %v3219_v37  ;;  %v579_v36 = vsel %vm4472_vm2, %v572_v44, %v574_v3  ;;  %v4475_v13 = vld [vmem:[#allocation73_spill] sm:$0xff]  ;;  %v4476_v58 = vld [vmem:[#allocation76_spill] sm:$0xff]  ;;  %v4477_v44 = vld [vmem:[#allocation59_spill] sm:$0xff] }
 0x14f   : > { %v3667_v53 = vmul.f32 %v4473_v41, %v3329_v50  ;;  %v1346_v63 = vmul.f32 %v4464_v42, %v3215_v8  ;;  %v3673_v54 = vsel %vm4474_vm3, %v579_v36, 0.0  ;;  %v1355_v17 = vadd.f32 %v1352_v10, %v1348_v55  ;;  %v578_v42 = vpop.permute.xlu1 %577 }
 0x150   : > { %v1342_v7 = vadd.f32 %v1339_v4, %v1335_v6  ;;  %v1343_v51 = vadd.f32 %v1340_v62, %v1336_v22  ;;  %v852_v23 = vmul.f32 %v4475_v13, %v3673_v54  ;;  %v1021_v48 = vmul.f32 %v4476_v58, %v3673_v54  ;;  %v576_v9 = vpop.permute.xlu0 %575 }
 0x151   : > { %v1190_v33 = vmul.f32 %v4477_v44, %v3673_v54  ;;  %v1359_v52 = vmul.f32 %v3385_v39, %v3673_v54  ;;  %v1353_v4 = vmul.f32 %v4471_v46, %v3549_v43  ;;  %v1354_v62 = vmul.f32 %v4471_v46, %v3553_v15 }
 0x152   : > { %v1349_v36 = vadd.f32 %v1346_v63, %v1342_v7  ;;  %v1350_v55 = vadd.f32 %v1347_v32, %v1343_v51  ;;  %v580_v10 = vsel %vm4478_vm4, %v574_v3, %v576_v9  ;;  %v581_v6 = vsel %vm4479_vm5, %v576_v9, %v578_v42 }
 0x153   : > { %v3692_v22 = vadd.f32 %v852_v23, %v3543_v24  ;;  %v3695_v60 = vadd.f32 %v1021_v48, %v3545_v12  ;;  %vm4480_vm2 = vcmp.ge.s32.totalorder %v4451_v18, 2  ;;  %vm4481_vm3 = vcmp.ge.s32.totalorder %v4452_v28, 2  ;;  %v1485_v51 = vpop.permute.xlu1 %1484 }
 0x154   : > { %v3699_v63 = vsel %vm4480_vm2, %v580_v10, 0.0  ;;  %v3703_v32 = vsel %vm4481_vm3, %v581_v6, 0.0  ;;  %v3706_v46 = vadd.f32 %v1190_v33, %v3565_v29  ;;  %v3708_v3 = vadd.f32 %v1359_v52, %v1355_v17  ;;  %v1483_v23 = vpop.permute.xlu0 %1482  ;;  %v4482_v10 = vld [vmem:[#allocation81_spill] sm:$0xff] }
 0x155   : > { %v853_v9 = vmul.f32 %v4475_v13, %v3699_v63  ;;  %v854_v24 = vmul.f32 %v4475_v13, %v3703_v32  ;;  %v1022_v12 = vmul.f32 %v4476_v58, %v3699_v63  ;;  %v1023_v7 = vmul.f32 %v4476_v58, %v3703_v32 }
 0x156   : > { %v1191_v52 = vmul.f32 %v4477_v44, %v3699_v63  ;;  %v1192_v33 = vmul.f32 %v4477_v44, %v3703_v32  ;;  %v1356_v29 = vadd.f32 %v1353_v4, %v1349_v36  ;;  %v1357_v17 = vadd.f32 %v1354_v62, %v1350_v55  ;;  %v4485_v62 = vld [vmem:[#allocation82_spill] sm:$0xff] }
 0x157   : > { %v1490_v13 = vsel %vm690_vm15, %v1483_v23, %v1485_v51  ;;  %v3726_v48 = vadd.f32 %v853_v9, %v3583_v5  ;;  %v3729_v58 = vadd.f32 %v854_v24, %v3586_v16  ;;  %v3732_v42 = vadd.f32 %v1022_v12, %v3589_v1  ;;  %v4483_v5 = vld [vmem:[#allocation52_spill] sm:$0xff]  ;;  %v1489_v9 = vpop.permute.xlu1 %1488  ;;  %v4486_v12 = vld [vmem:[#allocation47_spill] sm:$0xff] }
 0x158   : > { %v1496_v6 = vadd.f32 %v1490_v13, %v4482_v10  ;;  %v3736_v56 = vadd.f32 %v1023_v7, %v3603_v11  ;;  %v3739_v44 = vadd.f32 %v1191_v52, %v3605_v21  ;;  %v3742_v36 = vadd.f32 %v1192_v33, %v3617_v59  ;;  %v4484_v16 = vld [vmem:[#allocation36_spill] sm:$0xff]  ;;  %v1487_v24 = vpop.permute.xlu0 %1486 }
 0x159   : > { %v3746_v55 = vmul.f32 %v4483_v5, %v3329_v50  ;;  %v1502_v4 = vmul.f32 %v4484_v16, %v3325_v30  ;;  %v1360_v1 = vmul.f32 %v3385_v39, %v3699_v63  ;;  %v1361_v11 = vmul.f32 %v3385_v39, %v3703_v32 }
 0x15a   : > { %v1516_v21 = vmul.f32 %v4473_v41, %v3219_v37  ;;  %v1503_v59 = vadd.f32 %v4485_v62, %v1496_v6  ;;  %v3759_v7 = vmul.f32 %v4486_v12, %v3325_v30  ;;  %v1365_v23 = vstv %s3683_s22  ;;  %v4487_v62 = vld [vmem:[#allocation65_spill] sm:$0xff]  ;;  %s2231_s22 = smov 32  }
 0x15b   : > { %v1491_v52 = vsel %vm690_vm15, %v1485_v51, %v1487_v24  ;;  %v1492_v33 = vsel %vm690_vm15, %v1487_v24, %v1489_v9  ;;  %v1363_v13 = vadd.f32 %v1360_v1, %v1356_v29  ;;  %v1364_v10 = vadd.f32 %v1361_v11, %v1357_v17  ;;  %v591_v17 = vpop.permute.xlu1 %590 }
 0x15c   : > { %v1510_v39 = vadd.f32 %v3611_v57, %v1503_v59  ;;  %v1497_v50 = vadd.f32 %v1491_v52, %v3457_v35  ;;  %v1498_v37 = vadd.f32 %v1492_v33, %v3461_v19  ;;  %v1501_v6 = vmul.f32 %v4484_v16, %v3291_v49  ;;  %v589_v35 = vpop.permute.xlu0 %588 }
 0x15d   : > { %v1521_v30 = vmul.f32 %v4487_v62, %v3517_v47  ;;  %v3772_v5 = vstv %s3718_s24  ;;  %v1515_v51 = vmul.f32 %v4473_v41, %v3215_v8  ;;  %v1522_v29 = vmul.f32 %v4487_v62, %v3549_v43  ;;  %s4104_s24 = sld [smem:[#allocation7 + $0x35]] }
 0x15e   : > { %v1517_v57 = vadd.f32 %v3667_v53, %v1510_v39  ;;  %v1504_v1 = vadd.f32 %v1501_v6, %v1497_v50  ;;  %v1505_v19 = vadd.f32 %v1502_v4, %v1498_v37  ;;  %v1523_v16 = vmul.f32 %v4487_v62, %v3553_v15 }
 0x15f   : > { %vm4488_vm4 = vcmask 400384   ;;  %v1528_v59 = vmul.f32 %v3423_v14, %v3673_v54  ;;  %v1529_v41 = vmul.f32 %v3423_v14, %v3699_v63  ;;  %v1530_v9 = vmul.f32 %v3423_v14, %v3703_v32  ;;  %v595_v39 = vpop.permute.xlu1 %594 }
 0x160   : > { %v596_v11 = vsel %vm4488_vm4, %v589_v35, %v591_v17  ;;  %vm4489_vm5 = vcmp.ge.s32.totalorder %v4444_v38, 1  ;;  %v1524_v50 = vadd.f32 %v1521_v30, %v1517_v57  ;;  %v1511_v37 = vadd.f32 %v3654_v34, %v1504_v1  ;;  %v593_v6 = vpop.permute.xlu0 %592  ;;  %vm4490_vm2 = vmmov %vm4488_vm4 }
 0x161   : > { %v3790_v53 = vsel %vm4489_vm5, %v596_v11, 0.0  ;;  %v1512_v4 = vadd.f32 %v3658_v45, %v1505_v19  ;;  %v597_v45 = vsel %vm4490_vm2, %v591_v17, %v593_v6  ;;  %vm4491_vm3 = vmmov %vm4490_vm2  ;;  %vm4492_vm4 = vcmp.ge.s32.totalorder %v4451_v18, 1 }
 0x162   : > { %v859_v24 = vmul.f32 %v3492_v61, %v3790_v53  ;;  %v1028_v52 = vmul.f32 %v3601_v25, %v3790_v53  ;;  %v1197_v33 = vmul.f32 %v3646_v26, %v3790_v53  ;;  %v1366_v14 = vmul.f32 %v1365_v23, %v3790_v53 }
 0x163   : > { %v1531_v62 = vadd.f32 %v1528_v59, %v1524_v50  ;;  %v1535_v30 = vmul.f32 %v3772_v5, %v3790_v53  ;;  %v1518_v34 = vadd.f32 %v1515_v51, %v1511_v37  ;;  %v1519_v57 = vadd.f32 %v1516_v21, %v1512_v4  ;;  %v1653_v37 = vpop.permute.xlu1 %1652 }
 0x164   : > { %v598_v35 = vsel %vm4491_vm3, %v593_v6, %v595_v39  ;;  %v3806_v1 = vadd.f32 %v859_v24, %v3692_v22  ;;  %v3809_v19 = vadd.f32 %v1028_v52, %v3695_v60  ;;  %v3813_v11 = vsel %vm4492_vm4, %v597_v45, 0.0  ;;  %v1651_v4 = vpop.permute.xlu0 %1650 }
 0x165   : > { %vm4493_vm5 = vcmp.ge.s32.totalorder %v4452_v28, 1  ;;  %v3820_v21 = vadd.f32 %v1197_v33, %v3706_v46  ;;  %v3823_v51 = vadd.f32 %v1366_v14, %v3708_v3  ;;  %v860_v22 = vmul.f32 %v3492_v61, %v3813_v11 }
 0x166   : > { %v3817_v59 = vsel %vm4493_vm5, %v598_v35, 0.0  ;;  %v1029_v17 = vmul.f32 %v3601_v25, %v3813_v11  ;;  %v1198_v46 = vmul.f32 %v3646_v26, %v3813_v11  ;;  %v1367_v24 = vmul.f32 %v1365_v23, %v3813_v11  ;;  %v4494_v35 = vld [vmem:[#allocation70_spill] sm:$0xff] }
 0x167   : > { %v861_v60 = vmul.f32 %v3492_v61, %v3817_v59  ;;  %v1030_v50 = vmul.f32 %v3601_v25, %v3817_v59  ;;  %v1199_v3 = vmul.f32 %v3646_v26, %v3817_v59  ;;  %v1368_v52 = vmul.f32 %v1365_v23, %v3817_v59 }
 0x168   : > { %v1658_v61 = vsel %vm690_vm15, %v1651_v4, %v1653_v37  ;;  %v3841_v33 = vadd.f32 %v860_v22, %v3726_v48  ;;  %v3847_v25 = vadd.f32 %v1029_v17, %v3732_v42  ;;  %v3856_v23 = vadd.f32 %v1198_v46, %v3739_v44 }
 0x169   : > { %v3844_v14 = vadd.f32 %v861_v60, %v3729_v58  ;;  %v1664_v39 = vadd.f32 %v1658_v61, %v3465_v40  ;;  %v3853_v26 = vadd.f32 %v1030_v50, %v3736_v56  ;;  %v3859_v6 = vadd.f32 %v1199_v3, %v3742_v36  ;;  %v1657_v60 = vpop.permute.xlu1 %1656  ;;  %v1655_v40 = vpop.permute.xlu0 %1654  ;;  %v4498_v61 = vld [vmem:[#allocation46_spill] sm:$0xff] }
 0x16a   : > { %v3861_v48 = vadd.f32 %v1367_v24, %v1363_v13  ;;  %v3863_v58 = vadd.f32 %v1368_v52, %v1364_v10  ;;  %v3865_v45 = vadd.f32 %v1535_v30, %v1531_v62  ;;  %v1525_v42 = vadd.f32 %v1522_v29, %v1518_v34  ;;  %v4497_v24 = vld [vmem:[#allocation52_spill] sm:$0xff] }
 0x16b   : > { %v1671_v22 = vadd.f32 %v4494_v35, %v1664_v39  ;;  %v1526_v17 = vadd.f32 %v1523_v16, %v1519_v57  ;;  %v1536_v56 = vmul.f32 %v3772_v5, %v3813_v11  ;;  %v1537_v44 = vmul.f32 %v3772_v5, %v3817_v59  ;;  %v4495_v5 = vld [vmem:[#allocation69_spill] sm:$0xff] }
 0x16c   : > { %v1659_v36 = vsel %vm690_vm15, %v1653_v37, %v1655_v40  ;;  %v1660_v13 = vsel %vm690_vm15, %v1655_v40, %v1657_v60  ;;  %v1532_v10 = vadd.f32 %v1529_v41, %v1525_v42  ;;  %v1669_v62 = vmul.f32 %v4486_v12, %v3291_v49  ;;  %v4496_v41 = vld [vmem:[#allocation71_spill] sm:$0xff] }
 0x16d   : > { %v1678_v29 = vadd.f32 %v3615_v2, %v1671_v22  ;;  %v1665_v30 = vadd.f32 %v1659_v36, %v3624_v31  ;;  %v1666_v16 = vadd.f32 %v1660_v13, %v3627_v27  ;;  %v1533_v34 = vadd.f32 %v1530_v9, %v1526_v17  ;;  %v608_v2 = vpop.permute.xlu1 %607  ;;  %v606_v46 = vpop.permute.xlu0 %605  ;;  %v4499_v22 = vld [vmem:[#allocation80_spill] sm:$0xff] }
 0x16e   : > { %v1676_v57 = vmul.f32 %v4463_v20, %v3317_v0  ;;  %v1677_v50 = vmul.f32 %v4463_v20, %v4495_v5  ;;  %v3883_v37 = vadd.f32 %v1536_v56, %v1532_v10  ;;  %v1689_v12 = vmul.f32 %v4496_v41, %v3517_v47 }
 0x16f   : > { %v1685_v4 = vadd.f32 %v3746_v55, %v1678_v29  ;;  %v3888_v31 = vadd.f32 %v1537_v44, %v1533_v34  ;;  %v1672_v27 = vadd.f32 %v1669_v62, %v1665_v30  ;;  %v1673_v9 = vadd.f32 %v3759_v7, %v1666_v16 }
 0x170   : > { %v1702_v3 = vstv %s3849_s15  ;;  %v1683_v52 = vmul.f32 %v4497_v24, %v3215_v8  ;;  %v1696_v39 = vmul.f32 %v4498_v61, %v3673_v54  ;;  %v1684_v55 = vmul.f32 %v4497_v24, %v4499_v22  ;;  %s4110_s15 = sld [smem:[#allocation7 + $0x36]] }
 0x171   : > { %v1692_v20 = vadd.f32 %v1689_v12, %v1685_v4  ;;  %v1679_v42 = vadd.f32 %v1676_v57, %v1672_v27  ;;  %v1680_v35 = vadd.f32 %v1677_v50, %v1673_v9  ;;  %v1690_v60 = vmul.f32 %v4496_v41, %v3549_v43  ;;  %v612_v17 = vpop.permute.xlu1 %611  ;;  %v610_v7 = vpop.permute.xlu0 %609 }
 0x172   : > { %v613_v40 = vsel %vm483_vm14, %v606_v46, %v608_v2  ;;  %v1703_v44 = vmul.f32 %v1702_v3, %v3790_v53  ;;  %vm4500_vm2 = vcmp.lt.s32.totalorder %v4444_v38, 15  ;;  %v901_v30 = vstv %s1976_s20  ;;  %s4115_s20 = sld [smem:[#allocation7 + $0x37]] }
 0x173   : > { %v1699_v56 = vadd.f32 %v1696_v39, %v1692_v20  ;;  %v1686_v36 = vadd.f32 %v1683_v52, %v1679_v42  ;;  %v1687_v13 = vadd.f32 %v1684_v55, %v1680_v35  ;;  %v3906_v29 = vsel %vm4500_vm2, %v613_v40, 0.0 }
 0x174   : > { %v1691_v16 = vmul.f32 %v4496_v41, %v3553_v15  ;;  %v614_v34 = vsel %vm483_vm14, %v608_v2, %v610_v7  ;;  %v615_v57 = vsel %vm483_vm14, %v610_v7, %v612_v17  ;;  %v1697_v12 = vmul.f32 %v4498_v61, %v3699_v63 }
 0x175   : > { %v3902_v10 = vadd.f32 %v1703_v44, %v1699_v56  ;;  %v1693_v62 = vadd.f32 %v1690_v60, %v1686_v36  ;;  %v887_v5 = vpop.permute.xlu1 %886  ;;  %v885_v50 = vpop.permute.xlu0 %884  ;;  %v1698_v27 = vmul.f32 %v4498_v61, %v3703_v32  ;;  %v902_v9 = vmul.f32 %v901_v30, %v3906_v29 }
 0x176   : > { %v892_v4 = vsel %vm690_vm15, %v885_v50, %v887_v5  ;;  %v1694_v46 = vadd.f32 %v1691_v16, %v1687_v13  ;;  %v1704_v2 = vmul.f32 %v1702_v3, %v3813_v11  ;;  %v3922_v24 = vsel %vm473_vm12, %v614_v34, 0.0 }
 0x177   : > { %v898_v15 = vadd.f32 %v892_v4, %v3806_v1  ;;  %v1700_v41 = vadd.f32 %v1697_v12, %v1693_v62  ;;  %v3926_v52 = vsel %vm474_vm7, %v615_v57, 0.0  ;;  %v1705_v39 = vmul.f32 %v1702_v3, %v3817_v59 }
 0x178   : > { %v1701_v20 = vadd.f32 %v1698_v27, %v1694_v46  ;;  %v903_v60 = vmul.f32 %v901_v30, %v3922_v24  ;;  %v904_v40 = vmul.f32 %v901_v30, %v3926_v52  ;;  %v908_v36 = vstv %s1977_s10  ;;  %s4506_s10 = sld [smem:[#allocation22_spill]] }
 0x179   : > { %v905_v42 = vadd.f32 %v902_v9, %v898_v15  ;;  %v891_v32 = vpop.permute.xlu1 %890  ;;  %v889_v61 = vpop.permute.xlu0 %888  ;;  %v3929_v35 = vadd.f32 %v1704_v2, %v1700_v41  ;;  %v1070_v12 = vstv %s1983_s21  ;;  %v1077_v15 = vstv %s1984_s6  ;;  %s4507_s21 = sld [smem:[#allocation16_spill]] }
 0x17a   : > { %v893_v1 = vsel %vm690_vm15, %v887_v5, %v889_v61  ;;  %v894_v22 = vsel %vm690_vm15, %v889_v61, %v891_v32  ;;  %v3933_v55 = vadd.f32 %v1705_v39, %v1701_v20  ;;  %v1071_v39 = vmul.f32 %v1070_v12, %v3906_v29  ;;  %s4508_s6 = sld [smem:[#allocation21_spill]] }
 0x17b   : > { %v899_v17 = vadd.f32 %v893_v1, %v3841_v33  ;;  %v900_v7 = vadd.f32 %v894_v22, %v3844_v14  ;;  %v1246_v18 = vstv %s1991_s9  ;;  %vm1100_vm7 = vcmask 785408  }
 0x17d   : > { %v906_v59 = vadd.f32 %v903_v60, %v899_v17  ;;  %v907_v3 = vadd.f32 %v904_v40, %v900_v7  ;;  %v625_v56 = vpop.permute.xlu1 %624  ;;  %v623_v44 = vpop.permute.xlu0 %622  ;;  %v1072_v60 = vmul.f32 %v1070_v12, %v3922_v24 }
 0x17e   : > { %v630_v13 = vsel %vm504_vm13, %v623_v44, %v625_v56  ;;  %v1084_v44 = vstv %s1985_s30 }
 0x17f   : > { %v3942_v62 = vsel %vm493_vm10, %v630_v13, 0.0  ;;  %vm1775_vm10 = vcmask 261120   ;;  %s2022_s30 = sshll.u32 %s4507_s21, 7 }
 0x180   : > { %v909_v16 = vmul.f32 %v908_v36, %v3942_v62  ;;  %v1078_v32 = vmul.f32 %v1077_v15, %v3942_v62 }
 0x181   : > { %v629_v30 = vpop.permute.xlu1 %628  ;;  %v627_v34 = vpop.permute.xlu0 %626 }
 0x182   : > { %v631_v33 = vsel %vm504_vm13, %v625_v56, %v627_v34  ;;  %v632_v14 = vsel %vm504_vm13, %v627_v34, %v629_v30  ;;  %v912_v57 = vadd.f32 %v909_v16, %v905_v42  ;;  %v1073_v56 = vmul.f32 %v1070_v12, %v3926_v52 }
 0x183   : > { %v3949_v5 = vsel %vm494_vm9, %v631_v33, 0.0  ;;  %v3953_v50 = vsel %vm495_vm8, %v632_v14, 0.0  ;;  %vm1269_vm8 = vcmask 654336   ;;  %vm1438_vm9 = vcmask 523264  }
 0x184   : > { %v911_v4 = vmul.f32 %v908_v36, %v3953_v50  ;;  %v910_v46 = vmul.f32 %v908_v36, %v3949_v5  ;;  %v1079_v36 = vmul.f32 %v1077_v15, %v3949_v5  ;;  %v1080_v13 = vmul.f32 %v1077_v15, %v3953_v50 }
 0x185   : > { %v1056_v27 = vpop.permute.xlu1 %1055  ;;  %v1054_v9 = vpop.permute.xlu0 %1053 }
 0x186   : > { %v1061_v41 = vsel %vm690_vm15, %v1054_v9, %v1056_v27  ;;  %v914_v2 = vadd.f32 %v911_v4, %v907_v3  ;;  %v913_v20 = vadd.f32 %v910_v46, %v906_v59 }
 0x187   : > { %v1067_v42 = vadd.f32 %v1061_v41, %v3809_v19  ;;  %v915_v19 = vstv %s1978_s18  ;;  %s4509_s18 = sld [smem:[#allocation20_spill]] }
 0x189   : > { %v1074_v61 = vadd.f32 %v1071_v39, %v1067_v42  ;;  %v1060_v1 = vpop.permute.xlu1 %1059  ;;  %v1058_v22 = vpop.permute.xlu0 %1057 }
 0x18a   : > { %v1062_v40 = vsel %vm690_vm15, %v1056_v27, %v1058_v22  ;;  %v1063_v17 = vsel %vm690_vm15, %v1058_v22, %v1060_v1 }
 0x18b   : > { %v1081_v7 = vadd.f32 %v1078_v32, %v1074_v61  ;;  %v1068_v59 = vadd.f32 %v1062_v40, %v3847_v25  ;;  %v1069_v3 = vadd.f32 %v1063_v17, %v3853_v26  ;;  %v1239_v61 = vstv %s1990_s12  ;;  %s4511_s12 = sshll.u32 %s4508_s6, 3 }
 0x18c   : > { %s173_s9 = scalar_lea.vmem [#allocation8], %s4511_s12 }
 0x18d   : > { %v1075_v16 = vadd.f32 %v1072_v60, %v1068_v59  ;;  %v1076_v30 = vadd.f32 %v1073_v56, %v1069_v3  ;;  %v642_v34 = vpop.permute.xlu1 %641  ;;  %v640_v33 = vpop.permute.xlu0 %639  ;;  %v1240_v3 = vmul.f32 %v1239_v61, %v3906_v29  ;;  %p4513_p11 = scmp.ne.s32.totalorder %s4509_s18, 0 }
 0x18e   : > { %v647_v14 = vsel %vm525_vm11, %v640_v33, %v642_v34  ;;  %v1242_v33 = vmul.f32 %v1239_v61, %v3926_v52 }
 0x18f   : > { %v1082_v4 = vadd.f32 %v1079_v36, %v1075_v16  ;;  %v1083_v12 = vadd.f32 %v1080_v13, %v1076_v30  ;;  %v3972_v25 = vsel %vm514_vm6, %v647_v14, 0.0  ;;  %v1247_v13 = vmul.f32 %v1246_v18, %v3942_v62 }
 0x190   : > { %v916_v26 = vmul.f32 %v915_v19, %v3972_v25  ;;  %v1085_v46 = vmul.f32 %v1084_v44, %v3972_v25  ;;  %v1408_v30 = vstv %s3978_s29  ;;  %vm931_vm6 = vcmask 916480  }
 0x191   : > { %v646_v27 = vpop.permute.xlu1 %645  ;;  %v644_v9 = vpop.permute.xlu0 %643 }
 0x192   : > { %v648_v15 = vsel %vm525_vm11, %v642_v34, %v644_v9  ;;  %v649_v41 = vsel %vm525_vm11, %v644_v9, %v646_v27  ;;  %v919_v39 = vadd.f32 %v916_v26, %v912_v57  ;;  %v1088_v42 = vadd.f32 %v1085_v46, %v1081_v7 }
 0x193   : > { %v3984_v38 = vsel %vm515_vm0, %v648_v15, 0.0  ;;  %v3988_v32 = vsel %vm516_vm1, %v649_v41, 0.0  ;;  %v1241_v34 = vmul.f32 %v1239_v61, %v3922_v24  ;;  %v1248_v27 = vmul.f32 %v1246_v18, %v3949_v5 }
 0x194   : > { %925 = vrot.lane.b32.xlu0 %v919_v39, %s2227_s0  ;;  %v918_v1 = vmul.f32 %v915_v19, %v3988_v32  ;;  %v917_v22 = vmul.f32 %v915_v19, %v3984_v38  ;;  %v1086_v60 = vmul.f32 %v1084_v44, %v3984_v38  ;;  %v1087_v57 = vmul.f32 %v1084_v44, %v3988_v32 }
 0x195   : > { %v1225_v40 = vpop.permute.xlu1 %1224  ;;  %v1223_v17 = vpop.permute.xlu0 %1222  ;;  %v1253_v44 = vstv %s3976_s16  ;;  %v1249_v9 = vmul.f32 %v1246_v18, %v3953_v50  ;;  %s1824_s16 = sshll.u32 %s173_s9, 4  ;;  %s1825_s16 = int_to_ptr.vmem [resolvable:$true] %s1824_s16 }
 0x196   : > { %v1230_v7 = vsel %vm690_vm15, %v1223_v17, %v1225_v40  ;;  %v921_v28 = vadd.f32 %v918_v1, %v914_v2  ;;  %v920_v56 = vadd.f32 %v917_v22, %v913_v20  ;;  %v1089_v59 = vadd.f32 %v1086_v60, %v1082_v4 }
 0x197   : > { %v1236_v19 = vadd.f32 %v1230_v7, %v3820_v21  ;;  %v1090_v36 = vadd.f32 %v1087_v57, %v1083_v12  ;;  %v1254_v46 = vmul.f32 %v1253_v44, %v3972_v25  ;;  %v1415_v22 = vstv %s3995_s28  ;;  %s4512_s28 = sld [smem:[#allocation85_spill]] }
 0x198   : > { %929 = vrot.lane.b32.xlu0 %v921_v28, %s2227_s0  ;;  %927 = vrot.lane.b32.xlu1 %v920_v56, %s2227_s0  ;;  %v1256_v60 = vmul.f32 %v1253_v44, %v3988_v32  ;;  %v1255_v18 = vmul.f32 %v1253_v44, %v3984_v38  ;;  %v1577_v17 = vstv %s3999_s13  ;;  %v1422_v7 = vstv %s4002_s19  ;;  %s1810_s19 = scalar_lea.sflag [#allocation5], %s4508_s6 }
 0x199   : > { %v1243_v2 = vadd.f32 %v1240_v3, %v1236_v19  ;;  %v1229_v16 = vpop.permute.xlu1 %1228  ;;  %v1227_v20 = vpop.permute.xlu0 %1226  ;;  %v1416_v28 = vmul.f32 %v1415_v22, %v3942_v62  ;;  %v1411_v44 = vmul.f32 %v1408_v30, %v3926_v52 }
 0x19a   : > { %v1231_v21 = vsel %vm690_vm15, %v1225_v40, %v1227_v20  ;;  %v1232_v14 = vsel %vm690_vm15, %v1227_v20, %v1229_v16 }
 0x19b   : > { %v1250_v4 = vadd.f32 %v1247_v13, %v1243_v2  ;;  %v1237_v12 = vadd.f32 %v1231_v21, %v3856_v23  ;;  %v1238_v26 = vadd.f32 %v1232_v14, %v3859_v6  ;;  %v1409_v23 = vmul.f32 %v1408_v30, %v3906_v29 }
 0x19c   : > { %1096 = vrot.lane.b32.xlu0 %v1089_v59, %s2228_s7  ;;  %1094 = vrot.lane.b32.xlu1 %v1088_v42, %s2228_s7  ;;  %v1417_v21 = vmul.f32 %v1415_v22, %v3949_v5 }
 0x19d   : > { %v1244_v15 = vadd.f32 %v1241_v34, %v1237_v12  ;;  %v1245_v41 = vadd.f32 %v1242_v33, %v1238_v26  ;;  %v1394_v39 = vpop.permute.xlu1 %1393  ;;  %v1392_v61 = vpop.permute.xlu0 %1391  ;;  %v1257_v1 = vadd.f32 %v1254_v46, %v1250_v4  ;;  %v1423_v33 = vmul.f32 %v1422_v7, %v3972_v25  ;;  %s1822_s13 = scalar_lea.hbm %s4512_s28, %s2022_s30 }
 0x19e   : > { %v1399_v6 = vsel %vm690_vm15, %v1392_v61, %v1394_v39  ;;  %v1425_v61 = vmul.f32 %v1422_v7, %v3988_v32 }
 0x19f   : > { %v1251_v57 = vadd.f32 %v1248_v27, %v1244_v15  ;;  %v1252_v42 = vadd.f32 %v1249_v9, %v1245_v41  ;;  %v1405_v40 = vadd.f32 %v1399_v6, %v3823_v51  ;;  %v1410_v51 = vmul.f32 %v1408_v30, %v3922_v24 }
 0x1a0   : > { %1098 = vrot.lane.b32.xlu1 %v1090_v36, %s2228_s7  ;;  %1263 = vrot.lane.b32.xlu0 %v1257_v1, %s2229_s25  ;;  %v1418_v30 = vmul.f32 %v1415_v22, %v3953_v50  ;;  %v1424_v9 = vmul.f32 %v1422_v7, %v3984_v38  ;;  %v1745_v1 = vstv %s4023_s23  ;;  %s2146_s7 = scalar_lea.vmem %s1825_s16, 128 }
 0x1a1   : > { %v1412_v56 = vadd.f32 %v1409_v23, %v1405_v40  ;;  %v1398_v59 = vpop.permute.xlu1 %1397  ;;  %v1396_v3 = vpop.permute.xlu0 %1395  ;;  %v1259_v19 = vadd.f32 %v1256_v60, %v1252_v42  ;;  %v1258_v13 = vadd.f32 %v1255_v18, %v1251_v57  ;;  %v1591_v23 = vstv %s4027_s27  ;;  %p2147_p9 = scmp.ne.s32.totalorder %s1825_s16, %s2146_s7 }
 0x1a2   : > { %v1400_v2 = vsel %vm690_vm15, %v1394_v39, %v1396_v3  ;;  %v1401_v36 = vsel %vm690_vm15, %v1396_v3, %v1398_v59  ;;  %v1579_v18 = vmul.f32 %v1577_v17, %v3922_v24 }
 0x1a3   : > { %v1419_v16 = vadd.f32 %v1416_v28, %v1412_v56  ;;  %v1406_v20 = vadd.f32 %v1400_v2, %v3861_v48  ;;  %v1407_v34 = vadd.f32 %v1401_v36, %v3863_v58  ;;  %v1578_v48 = vmul.f32 %v1577_v17, %v3906_v29  ;;  %p2148_p13 = pnand %p2147_p9, %p4513_p11 }
 0x1a4   : > { %1267 = vrot.lane.b32.xlu0 %v1259_v19, %s2229_s25  ;;  %1265 = vrot.lane.b32.xlu1 %v1258_v13, %s2229_s25  ;;  %v1584_v58 = vstv %s4019_s14  ;;  %v1580_v28 = vmul.f32 %v1577_v17, %v3926_v52  ;;  %v1592_v19 = vmul.f32 %v1591_v23, %v3972_v25  ;;  %s2232_s14 = smov [#allocation8]  }
 0x1a5   : > { %v1413_v14 = vadd.f32 %v1410_v51, %v1406_v20  ;;  %v1414_v4 = vadd.f32 %v1411_v44, %v1407_v34  ;;  %v1563_v12 = vpop.permute.xlu1 %1562  ;;  %v1561_v26 = vpop.permute.xlu0 %1560  ;;  %v1426_v46 = vadd.f32 %v1423_v33, %v1419_v16  ;;  %v1585_v22 = vmul.f32 %v1584_v58, %v3942_v62  ;;  %p2149_p10 = pneg %p2148_p13  ;;  %s2150_s23 = sshll.u32 %s2232_s14, 4  ;;  %s2151_s23 = int_to_ptr.vmem [resolvable:$false] %s2150_s23 }
 0x1a6   : > { %v1568_v27 = vsel %vm690_vm15, %v1561_v26, %v1563_v12  ;;  %v1586_v13 = vmul.f32 %v1584_v58, %v3949_v5  ;;  %v1752_v51 = vstv %s4038_s17  ;;  %v1587_v17 = vmul.f32 %v1584_v58, %v3953_v50  ;;  %s2152_s25 = scalar_lea.vmem %s2151_s23, 256  ;;  %p2153_p2 = scmp.lt.s32.totalorder %s1825_s16, %s2151_s23 }
 0x1a7   : > { %v1420_v15 = vadd.f32 %v1417_v21, %v1413_v14  ;;  %v1421_v41 = vadd.f32 %v1418_v30, %v1414_v4  ;;  %v1574_v39 = vadd.f32 %v1568_v27, %v3865_v45  ;;  %v1594_v34 = vmul.f32 %v1591_v23, %v3988_v32  ;;  %p2154_p1 = scmp.lt.s32.totalorder %s2152_s25, %s2146_s7 }
 0x1a8   : > { %1432 = vrot.lane.b32.xlu1 %v1426_v46, %s2230_s8  ;;  %v1759_v33 = vstv %s4045_s5  ;;  %v1593_v4 = vmul.f32 %v1591_v23, %v3984_v38  ;;  %v1753_v26 = vmul.f32 %v1752_v51, %v3942_v62 }
 0x1a9   : > { %v1581_v6 = vadd.f32 %v1578_v48, %v1574_v39  ;;  %v1567_v60 = vpop.permute.xlu1 %1566  ;;  %v1565_v57 = vpop.permute.xlu0 %1564  ;;  %v1427_v42 = vadd.f32 %v1424_v9, %v1420_v15  ;;  %v1428_v40 = vadd.f32 %v1425_v61, %v1421_v41  ;;  %v1748_v15 = vmul.f32 %v1745_v1, %v3926_v52  ;;  %p2155_p0 = por %p2154_p1, %p2153_p2 }
 0x1aa   : > { %v1569_v45 = vsel %vm690_vm15, %v1563_v12, %v1565_v57  ;;  %v1570_v7 = vsel %vm690_vm15, %v1565_v57, %v1567_v60  ;;  %v1747_v12 = vmul.f32 %v1745_v1, %v3922_v24  ;;  %v1760_v39 = vmul.f32 %v1759_v33, %v3972_v25 }
 0x1ab   : > { %v1588_v56 = vadd.f32 %v1585_v22, %v1581_v6  ;;  %v1575_v59 = vadd.f32 %v1569_v45, %v3883_v37  ;;  %v1576_v3 = vadd.f32 %v1570_v7, %v3888_v31  ;;  %1434 = vrot.lane.b32.xlu0 %v1427_v42, %s2230_s8  ;;  %v1746_v31 = vmul.f32 %v1745_v1, %v3906_v29  ;;  %p2156_p3 = pnand %p2155_p0, %p2149_p10 }
 0x1ac   : > { %1436 = vrot.lane.b32.xlu1 %v1428_v40, %s2230_s8  ;;  %v697_v6 = vstv %s4059_s1  ;;  %v1754_v52 = vmul.f32 %v1752_v51, %v3949_v5  ;;  %v702_v1 = vstv %s4063_s3  ;;  %v1755_v60 = vmul.f32 %v1752_v51, %v3953_v50  ;;  %v4503_v51 = vld [vmem:[#allocation68_spill] sm:$0xff] }
 0x1ad   : > { %v1582_v44 = vadd.f32 %v1579_v18, %v1575_v59  ;;  %v1583_v2 = vadd.f32 %v1580_v28, %v1576_v3  ;;  %v1731_v36 = vpop.permute.xlu1 %1730  ;;  %v1729_v37 = vpop.permute.xlu0 %1728  ;;  %v1595_v16 = vadd.f32 %v1592_v19, %v1588_v56  ;;  %v1762_v56 = vmul.f32 %v1759_v33, %v3988_v32  ;;  %v4502_v19 = vld [vmem:[#allocation37_spill] sm:$0xff] }
 0x1ae   : > { %v1736_v20 = vsel %vm690_vm15, %v1729_v37, %v1731_v36  ;;  %v1761_v50 = vmul.f32 %v1759_v33, %v3984_v38  ;;  %v717_v33 = vstv %s4090_s26 }
 0x1af   : > { %v1589_v21 = vadd.f32 %v1586_v13, %v1582_v44  ;;  %v1590_v30 = vadd.f32 %v1587_v17, %v1583_v2  ;;  %v1742_v14 = vadd.f32 %v1736_v20, %v3902_v10  ;;  %1601 = vrot.lane.b32.xlu0 %v1595_v16, %s4310_s11  ;;  %v703_v17 = vmul.f32 %v702_v1, %v4503_v51  ;;  %v4504_v16 = vld [vmem:[#allocation39_spill] sm:$0xff] }
 0x1b0   : > { %v712_v20 = vstv %s4081_s4 }
 0x1b1   : > { %v1749_v46 = vadd.f32 %v1746_v31, %v1742_v14  ;;  %v1735_v48 = vpop.permute.xlu1 %1734  ;;  %v1733_v58 = vpop.permute.xlu0 %1732  ;;  %v1597_v27 = vadd.f32 %v1594_v34, %v1590_v30  ;;  %v1596_v9 = vadd.f32 %v1593_v4, %v1589_v21  ;;  %v699_v21 = vmul.f32 %v697_v6, %v3291_v49  ;;  %v4505_v30 = vld [vmem:[#allocation58_spill] sm:$0xff] }
 0x1b2   : > { %v1737_v41 = vsel %vm690_vm15, %v1731_v36, %v1733_v58  ;;  %v1738_v10 = vsel %vm690_vm15, %v1733_v58, %v1735_v48  ;;  %v713_v48 = vmul.f32 %v712_v20, %v3517_v47 }
 0x1b3   : > { %v1756_v61 = vadd.f32 %v1753_v26, %v1749_v46  ;;  %v1743_v23 = vadd.f32 %v1737_v41, %v3929_v35  ;;  %v1744_v22 = vadd.f32 %v1738_v10, %v3933_v55  ;;  %1605 = vrot.lane.b32.xlu0 %v1597_v27, %s4310_s11  ;;  %1603 = vrot.lane.b32.xlu1 %v1596_v9, %s4310_s11  ;;  %v4501_v35 = vld [vmem:[#allocation74_spill] sm:$0xff]  ;;  %v707_v55 = vstv %s4069_s2  ;;  %s4097_s11 = sld [smem:[#allocation7 + $0x33]] }
 0x1b4   : > { %v698_v45 = vmul.f32 %v697_v6, %v4501_v35  ;;  %v708_v32 = vmul.f32 %v707_v55, %v4504_v16  ;;  %v709_v49 = vmul.f32 %v707_v55, %v3215_v8  ;;  %v719_v8 = vmul.f32 %v717_v33, %v3699_v63 }
 0x1b5   : > { %v1750_v57 = vadd.f32 %v1747_v12, %v1743_v23  ;;  %v1751_v42 = vadd.f32 %v1748_v15, %v1744_v22  ;;  %v1763_v28 = vadd.f32 %v1760_v39, %v1756_v61  ;;  %v704_v12 = vmul.f32 %v702_v1, %v3317_v0 }
 0x1b6   : > { %v687_v40 = vpop.permute.xlu1 %686  ;;  %v685_v18 = vpop.permute.xlu0 %684  ;;  %v718_v15 = vmul.f32 %v717_v33, %v3673_v54  ;;  %v714_v61 = vmul.f32 %v712_v20, %v3549_v43  ;;  %v754_v23 = vstv %s4104_s24  ;;  %v759_v1 = vstv %s4110_s15 }
 0x1b7   : > { %v691_v7 = vsel %vm690_vm15, %v685_v18, %v687_v40  ;;  %v1757_v59 = vadd.f32 %v1754_v52, %v1750_v57  ;;  %v1758_v3 = vadd.f32 %v1755_v60, %v1751_v42  ;;  %1769 = vrot.lane.b32.xlu1 %v1763_v28, %s2231_s22  ;;  %v755_v60 = vmul.f32 %v754_v23, %v3906_v29 }
 0x1b8   : > { %v695_v13 = vadd.f32 %v691_v7, %v4502_v19  ;;  %v760_v28 = vmul.f32 %v759_v1, %v3942_v62  ;;  %v761_v29 = vmul.f32 %v759_v1, %v3949_v5 }
 0x1b9   : > { %v1765_v36 = vadd.f32 %v1762_v56, %v1758_v3  ;;  %v1764_v37 = vadd.f32 %v1761_v50, %v1757_v59  ;;  %v722_v58 = vstv %s4097_s11 }
 0x1ba   : > { %v700_v44 = vadd.f32 %v698_v45, %v695_v13  ;;  %v689_v2 = vpop.permute.xlu0 %688  ;;  %v743_v46 = vpop.permute.xlu1 %742  ;;  %v723_v0 = vmul.f32 %v722_v58, %v3790_v53  ;;  %v724_v42 = vmul.f32 %v722_v58, %v3813_v11  ;;  %v764_v53 = vstv %s4115_s20 }
 0x1bb   : > { %v692_v31 = vsel %vm690_vm15, %v687_v40, %v689_v2  ;;  %1773 = vrot.lane.b32.xlu1 %v1765_v36, %s2231_s22  ;;  %1771 = vrot.lane.b32.xlu0 %v1764_v37, %s2231_s22  ;;  %v756_v45 = vmul.f32 %v754_v23, %v3922_v24  ;;  %v765_v55 = vmul.f32 %v764_v53, %v3972_v25 }
 0x1bc   : > { %v705_v34 = vadd.f32 %v703_v17, %v700_v44  ;;  %v696_v14 = vadd.f32 %v692_v31, %v4505_v30  ;;  %v766_v11 = vmul.f32 %v764_v53, %v3984_v38  ;;  %v4510_v53 = vld [vmem:[#allocation23_spill] sm:$0xff] }
 0x1be   : > { %v710_v4 = vadd.f32 %v708_v32, %v705_v34  ;;  %v701_v26 = vadd.f32 %v699_v21, %v696_v14 }
 0x1bf   : > { %v745_v41 = vpop.permute.xlu0 %744 }
 0x1c0   : > { %v706_v27 = vadd.f32 %v704_v12, %v701_v26  ;;  %v715_v9 = vadd.f32 %v713_v48, %v710_v4  ;;  %v748_v47 = vsel %vm690_vm15, %v743_v46, %v745_v41  ;;  %v747_v6 = vpop.permute.xlu1 %746 }
 0x1c1   : > { %v749_v40 = vsel %vm690_vm15, %v745_v41, %v747_v6 }
 0x1c2   : > { %v711_v10 = vadd.f32 %v709_v49, %v706_v27  ;;  %v720_v39 = vadd.f32 %v718_v15, %v715_v9 }
 0x1c4   : > { %v725_v22 = vadd.f32 %v723_v0, %v720_v39  ;;  %v716_v52 = vadd.f32 %v714_v61, %v711_v10 }
 0x1c6   : > { %v752_v54 = vadd.f32 %v748_v47, %v725_v22  ;;  %v721_v57 = vadd.f32 %v719_v8, %v716_v52 }
 0x1c8   : > { %v757_v18 = vadd.f32 %v755_v60, %v752_v54  ;;  %v726_v43 = vadd.f32 %v724_v42, %v721_v57 }
 0x1ca   : > { %v753_v35 = vadd.f32 %v749_v40, %v726_v43  ;;  %v762_v63 = vadd.f32 %v760_v28, %v757_v18  ;;  %v1794_v28 = vld [vmem:[%s4506_s10] sm:$0xff] }
 0x1cc   : > { %v758_v7 = vadd.f32 %v756_v45, %v753_v35  ;;  %v767_v56 = vadd.f32 %v765_v55, %v762_v63 }
 0x1ce   : > { %v763_v59 = vadd.f32 %v761_v29, %v758_v7 }
 0x1d0   : > { %v768_v3 = vadd.f32 %v766_v11, %v763_v59 }
 0x206   : > { %v926_v19 = vpop.permute.xlu0 %925 }
 0x20a   : > { %v928_v13 = vpop.permute.xlu1 %927  ;;  %v930_v50 = vpop.permute.xlu0 %929 }
 0x20b   : > { %v932_v5 = vsel %vm931_vm6, %v926_v19, %v928_v13  ;;  %v933_v32 = vsel %vm931_vm6, %v928_v13, %v930_v50 }
 0x20c   : > { %v936_v20 = vadd.f32 %v932_v5, %v767_v56  ;;  %v937_v34 = vadd.f32 %v933_v32, %v768_v3 }
 0x20e   : > { %v1095_v51 = vpop.permute.xlu1 %1094  ;;  %v1097_v17 = vpop.permute.xlu0 %1096 }
 0x20f   : > { %v1101_v38 = vsel %vm1100_vm7, %v1095_v51, %v1097_v17 }
 0x210   : > { %v1105_v33 = vadd.f32 %v1101_v38, %v936_v20 }
 0x212   : > { %v1099_v62 = vpop.permute.xlu1 %1098  ;;  %v1264_v44 = vpop.permute.xlu0 %1263 }
 0x213   : > { %v1102_v31 = vsel %vm1100_vm7, %v1097_v17, %v1099_v62 }
 0x214   : > { %v1106_v4 = vadd.f32 %v1102_v31, %v937_v34 }
 0x216   : > { %v1266_v2 = vpop.permute.xlu1 %1265  ;;  %v1268_v24 = vpop.permute.xlu0 %1267 }
 0x217   : > { %v1270_v30 = vsel %vm1269_vm8, %v1264_v44, %v1266_v2  ;;  %v1271_v14 = vsel %vm1269_vm8, %v1266_v2, %v1268_v24 }
 0x218   : > { %v1274_v48 = vadd.f32 %v1270_v30, %v1105_v33  ;;  %v1275_v58 = vadd.f32 %v1271_v14, %v1106_v4 }
 0x21a   : > { %v1433_v36 = vpop.permute.xlu1 %1432 }
 0x21d   : > { %v1435_v25 = vpop.permute.xlu0 %1434 }
 0x21e   : > { %v1437_v37 = vpop.permute.xlu1 %1436  ;;  %v1439_v26 = vsel %vm1438_vm9, %v1433_v36, %v1435_v25 }
 0x21f   : > { %v1440_v46 = vsel %vm1438_vm9, %v1435_v25, %v1437_v37  ;;  %v1443_v15 = vadd.f32 %v1439_v26, %v1274_v48 }
 0x220   : > { %v1444_v41 = vadd.f32 %v1440_v46, %v1275_v58 }
 0x221   : > { %v1602_v16 = vpop.permute.xlu0 %1601 }
 0x225   : > { %v1604_v21 = vpop.permute.xlu1 %1603  ;;  %v1606_v12 = vpop.permute.xlu0 %1605 }
 0x226   : > { %v1607_v27 = vsel %vm690_vm15, %v1602_v16, %v1604_v21  ;;  %v1608_v9 = vsel %vm690_vm15, %v1604_v21, %v1606_v12 }
 0x227   : > { %v1611_v10 = vadd.f32 %v1607_v27, %v1443_v15  ;;  %v1612_v39 = vadd.f32 %v1608_v9, %v1444_v41 }
 0x229   : > { %v1770_v49 = vpop.permute.xlu1 %1769 }
 0x22d   : > { %v1774_v0 = vpop.permute.xlu1 %1773  ;;  %v1772_v61 = vpop.permute.xlu0 %1771 }
 0x22e   : > { %v1776_v23 = vsel %vm1775_vm10, %v1770_v49, %v1772_v61  ;;  %v1777_v47 = vsel %vm1775_vm10, %v1772_v61, %v1774_v0 }
 0x22f   : > { %v1780_v22 = vadd.f32 %v1776_v23, %v1611_v10  ;;  %v1781_v6 = vadd.f32 %v1777_v47, %v1612_v39 }
 0x231   : > { %v2014_v52 = vmul.f32 -1.442695, %v1780_v22  ;;  %v2015_v8 = vmul.f32 -1.442695, %v1781_v6 }
 0x233   : > { %2095 = vpow2.f32 %v2014_v52 }
 0x234   : > { %2097 = vpow2.f32 %v2015_v8 }
 0x240   : > { %v2096_v1 = vpop.eup %2095 }
 0x241   : > { %v2098_v60 = vpop.eup %2097  ;;  %v1788_v54 = vadd.f32 1.0, %v2096_v1 }
 0x242   : > { %v1789_v57 = vadd.f32 1.0, %v2098_v60 }
 0x243   : > { %2099 = vrcp.f32 %v1788_v54 }
 0x244   : > { %2101 = vrcp.f32 %v1789_v57 }
 0x250   : > { %v2100_v42 = vpop.eup %2099 }
 0x251   : > { %v2102_v40 = vpop.eup %2101  ;;  %v1798_v18 = vrot.slane %v2100_v42, %v4510_v53 }
 0x252   : > { %v1802_v43 = vrot.slane %v2102_v40, %v4510_v53 }
 0x254   : > { %v1805_v35 = vcombine.low %v1798_v18, %v1802_v43 }
 0x256   : > { %v1807_v45 = vmul.f32 %v1805_v35, %v1794_v28 }
 0x258   : > { %1808 = vst [vmem:[%s173_s9] sm:$0xff] %v1807_v45 }
 0x259   : > { %2159 = shalt.err (!%p2156_p3)
}
 0x25a   : > { %s2160_s27 = scalar_lea.hbm %s1822_s13, 128  ;;  %s2164_s8 = scalar_lea.hbm %s4512_s28, 256 }
 0x25b   : > { %p2161_p12 = scmp.ne.s32.totalorder %s1822_s13, %s2160_s27  ;;  %p2165_p4 = scmp.lt.s32.totalorder %s1822_s13, %s4512_s28 }
 0x25c   : > { %p2166_p6 = scmp.lt.s32.totalorder %s2164_s8, %s2160_s27 }
 0x25d   : > { %p2162_p5 = pnand %p2161_p12, %p4513_p11 }
 0x25e   : > { %p2167_p8 = por %p2166_p6, %p2165_p4 }
 0x25f   : > { %p2163_p7 = pneg %p2162_p5 }
 0x261   : > { %p2168_p9 = pnand %p2167_p8, %p2163_p7 }
 0x263   : > { %2171 = shalt.err (!%p2168_p9)
}
 0x264   : > { %2029 = dma.vmem_to_hbm [thread:$0]  (%p4513_p11), %s1825_s16, 128, %s1822_s13, %s1810_s19  }
 0x265 PF: > { %s4514_s2 = sld [smem:[#allocation12_spill]] }
 0x266   : > { %s4515_s4 = sld [smem:[#allocation17_spill]] }
 0x267   : > { %s4516_s26 = sld [smem:[#allocation15_spill]] }
 0x26b   : > { %s1836_s11 = sand.u32 1, %s4514_s2  }
 0x26c   : > { %p4517_p13 = scmp.ne.s32.totalorder %s4515_s4, 0  ;;  %s1837_s22 = scalar_lea.sflag [#allocation5], %s1836_s11 }
 0x26d   : > { %p4518_p10 = scmp.ge.s32.totalorder %s4516_s26, 2 }
 0x26f   : > { %p2040_p2 = pnand %p4518_p10, %p4517_p13 }
 0x271   : > { %p2041_p1 = pneg %p2040_p2 }
 0x273   : > { %2197 = dma.done.wait (%p2041_p1), %s1837_s22, 128  }
 0x274   : > { %2199 = vsyncadd (%p2041_p1), %s1837_s22, 4294967168  ;;  %s4519_s12 = sld [smem:[#allocation18_spill]] }
 0x275   : > { %s4520_s9 = sld [smem:[#allocation13_spill]] }
 0x276   : > { %s4521_s10 = sld [smem:[#allocation14_spill]] }
 0x277   : > { %s4522_s11 = sld [smem:[#allocation19_spill]] }
 0x27a   : > { %p16_p0 = scmp.ge.s32.totalorder %s4519_s12, 4  }
 0x27c   :  { %18 = sbr.rel (!%p16_p0) target bundleno = 10 (0xa), region = 81 }
 0x281   :  { %1842 = vsyncpa [#allocation4], 1 }
 0x282   :  { %1844 = vsyncpa [#allocation4 + $0x1], 1 }
 0x283   :  { %1845 = vsyncpa [#allocation5], 1 }
 0x284   :  { %1847 = vsyncpa [#allocation5 + $0x1], 1 }
 0x285   :  { %1848 = vsyncpa [#allocation6], 1 }
 0x286   :  { %1850 = vsyncpa [#allocation6 + $0x1], 1 }

</bundles_post_ra>
